<compile_context>
chip_gen: v7x
topology: tpu7x:2x2x1
jax: 0.10.0
libtpu: 0.0.40
codegen_flags: <defaults>
</compile_context>

<pallas_src>
import functools

import jax
import jax.numpy as jnp
from jax.experimental import pallas as pl
from jax.experimental.pallas import tpu as pltpu


# ----------------------------------------------------------------------------
# Pallas kernels
# ----------------------------------------------------------------------------
def _conv_matmul_bias_kernel(w_ref, p_ref, b_ref, o_ref):
    """o (tc, M) = w (tc, K) @ p (K, M) + b (tc, 1); lane-dense output."""
    acc = jnp.dot(w_ref[...], p_ref[...], preferred_element_type=jnp.float32)
    acc = acc + b_ref[...]
    o_ref[...] = acc.astype(o_ref.dtype)


def conv_matmul_bias(w, patches, b):
    """w: (Cout, K) bf16, patches: (K, M) bf16, b: (Cout,) f32 -> (Cout, M) bf16."""
    cout, k = w.shape
    k2, m = patches.shape
    assert k == k2
    bcol = b.reshape(cout, 1).astype(jnp.float32)
    # Split Cout over 2 "parallel" steps so v7x's two TensorCores both get
    # work; on single-TC v5e/v6e this costs only one extra pipeline step.
    tc = cout // 2 if (cout % 2 == 0 and (cout // 2) % 8 == 0) else cout
    grid = (cout // tc,)
    return pl.pallas_call(
        _conv_matmul_bias_kernel,
        out_shape=jax.ShapeDtypeStruct((cout, m), jnp.bfloat16),
        grid=grid,
        in_specs=[
            pl.BlockSpec((tc, k), lambda i: (i, 0)),
            pl.BlockSpec((k, m), lambda i: (0, 0)),   # same block every step
            pl.BlockSpec((tc, 1), lambda i: (i, 0)),
        ],
        out_specs=pl.BlockSpec((tc, m), lambda i: (i, 0)),
        compiler_params=pltpu.CompilerParams(
            dimension_semantics=("parallel",)),
    )(w, patches, bcol)


def _pool2x2_relu_kernel(a_ref, b_ref, c_ref, d_ref, o_ref):
    m = jnp.maximum(jnp.maximum(a_ref[...], b_ref[...]),
                    jnp.maximum(c_ref[...], d_ref[...]))
    o_ref[...] = jnp.maximum(m, 0).astype(o_ref.dtype)


def pool2x2_relu(x):
    """x: (C, N, H, W) -> max_pool2d(k=2) then relu -> (C, N, H//2, W//2)."""
    c, n, h, w = x.shape
    assert h % 2 == 0 and w % 2 == 0, "pool2x2 expects even spatial dims"
    oh, ow = h // 2, w // 2
    m = n * oh * ow
    corners = [x[:, :, di::2, dj::2].reshape(c, m)
               for di in (0, 1) for dj in (0, 1)]
    out = pl.pallas_call(
        _pool2x2_relu_kernel,
        out_shape=jax.ShapeDtypeStruct((c, m), x.dtype),
    )(*corners)
    return out.reshape(c, n, oh, ow)


def _fc_fused_kernel(x_ref, w1_ref, b1_ref, w2_ref, b2_ref, o_ref):
    h = jnp.dot(x_ref[...], w1_ref[...], preferred_element_type=jnp.float32)
    h = jnp.maximum(h + b1_ref[...], 0.0)
    o = jnp.dot(h.astype(w2_ref.dtype), w2_ref[...],
                preferred_element_type=jnp.float32)
    o_ref[...] = (o + b2_ref[...]).astype(o_ref.dtype)


def fc_fused(x, w1, b1, w2, b2):
    """relu(x @ w1 + b1) @ w2 + b2 in one pallas_call (weights VMEM-resident)."""
    n = x.shape[0]
    h1 = w1.shape[1]
    nc = w2.shape[1]
    return pl.pallas_call(
        _fc_fused_kernel,
        out_shape=jax.ShapeDtypeStruct((n, nc), jnp.float32),
    )(x, w1, b1.reshape(1, h1).astype(jnp.float32),
      w2, b2.reshape(1, nc).astype(jnp.float32))


# ----------------------------------------------------------------------------
# Glue: transposed im2col (pad + static slices + stack, no transposes)
# ----------------------------------------------------------------------------
def im2col_t(x, kh, kw, pad, stride):
    """x: (C, N, H, W) -> patches^T (C*kh*kw, N*OH*OW), plus (OH, OW)."""
    c, n, h, w = x.shape
    xp = jnp.pad(x, ((0, 0), (0, 0), (pad, pad), (pad, pad)))
    oh = (h + 2 * pad - kh) // stride + 1
    ow = (w + 2 * pad - kw) // stride + 1
    taps = []
    for i in range(kh):
        for j in range(kw):
            taps.append(xp[:, :, i:i + stride * oh:stride,
                           j:j + stride * ow:stride])
    p = jnp.stack(taps, axis=1)                   # (C, kh*kw, N, OH, OW)
    return p.reshape(c * kh * kw, n * oh * ow), oh, ow


def conv2d_bias(x, w, b, *, kernel, pad, stride):
    """x: (Cin, N, H, W) bf16; w: (Cout, Cin*k*k) bf16 (torch weight.reshape);
    b: (Cout,) f32 -> (Cout, N, OH, OW) bf16 (C-major)."""
    _, n, _, _ = x.shape
    patches, oh, ow = im2col_t(x, kernel, kernel, pad, stride)
    out = conv_matmul_bias(w, patches, b)
    return out.reshape(w.shape[0], n, oh, ow)


# ----------------------------------------------------------------------------
# Model
# ----------------------------------------------------------------------------
def init_params(key, *, num_classes, kernel, h1):
    ks = jax.random.split(key, 8)
    scale = 0.05
    bf = jnp.bfloat16
    # conv weights stored as (Cout, Cin*kh*kw) == torch (Cout,Cin,KH,KW).reshape
    conv1_w = scale * jax.random.normal(ks[0], (16, 3 * kernel * kernel), jnp.float32)
    conv1_b = scale * jax.random.normal(ks[1], (16,), jnp.float32)
    conv2_w = scale * jax.random.normal(ks[2], (32, 16 * kernel * kernel), jnp.float32)
    conv2_b = scale * jax.random.normal(ks[3], (32,), jnp.float32)
    fc1_w = scale * jax.random.normal(ks[4], (8320, h1), jnp.float32)   # (in, out)
    fc1_b = scale * jax.random.normal(ks[5], (h1,), jnp.float32)
    fc2_w = scale * jax.random.normal(ks[6], (h1, num_classes), jnp.float32)
    fc2_b = scale * jax.random.normal(ks[7], (num_classes,), jnp.float32)
    return dict(conv1_w=conv1_w.astype(bf), conv1_b=conv1_b,
                conv2_w=conv2_w.astype(bf), conv2_b=conv2_b,
                fc1_w=fc1_w.astype(bf), fc1_b=fc1_b,
                fc2_w=fc2_w.astype(bf), fc2_b=fc2_b)


def convnet_model5_forward(x_nchw, params, *, kernel, pad, stride):
    n = x_nchw.shape[0]
    # NCHW -> C-major (C, N, H, W): tiny leading-axis transpose (C=3, N=2).
    x = jnp.transpose(x_nchw, (1, 0, 2, 3)).astype(jnp.bfloat16)

    # conv1 -> maxpool(2) -> relu
    y = conv2d_bias(x, params["conv1_w"], params["conv1_b"],
                    kernel=kernel, pad=pad, stride=stride)
    y = pool2x2_relu(y)

    # conv2 -> maxpool(2) -> relu
    y = conv2d_bias(y, params["conv2_w"], params["conv2_b"],
                    kernel=kernel, pad=pad, stride=stride)
    y = pool2x2_relu(y)

    # TODO(synk): dropout layers (p=0.25, p=0.1) are eval-mode identity here.

    # flatten in torch NCHW order: (C,N,h,w) -> (N,C,h,w) -> (N, 8320)
    y = jnp.transpose(y, (1, 0, 2, 3)).reshape(n, -1)

    # fc1 + relu + fc2 fused in a single pallas_call
    return fc_fused(y, params["fc1_w"], params["fc1_b"],
                    params["fc2_w"], params["fc2_b"])


if __name__ == "__main__":
    NUM_CLASSES, PAD, KERNEL, H1, STRIDE = 10, 1, 3, 64, 1
    N, C, H, W = 2, 3, 80, 52   # -> 32*20*13 = 8320 features into fc1

    key = jax.random.PRNGKey(0)
    kx, kp = jax.random.split(key)
    x = jax.random.normal(kx, (N, C, H, W), jnp.float32)
    params = init_params(kp, num_classes=NUM_CLASSES, kernel=KERNEL, h1=H1)

    fwd = jax.jit(functools.partial(convnet_model5_forward,
                                    kernel=KERNEL, pad=PAD, stride=STRIDE))
    out = fwd(x, params)
    jax.block_until_ready(out)
    assert out.shape == (N, NUM_CLASSES), out.shape
    print("KERNEL_OK")
</pallas_src>

<mosaic_0001>
module attributes {stable_mosaic.version = 11 : i64} {
  func.func @_conv_matmul_bias_kernel(%arg0: i32, %arg1: memref<8x27xbf16, #tpu.memory_space<vmem>>, %arg2: memref<27x8320xbf16, #tpu.memory_space<vmem>>, %arg3: memref<8x1xf32, #tpu.memory_space<vmem>>, %arg4: memref<8x8320xbf16, #tpu.memory_space<vmem>>) attributes {dimension_semantics = [#tpu.dimension_semantics<parallel>], iteration_bounds = array<i64: 2>, scalar_prefetch = 0 : i64, scratch_operands = 0 : i64, tpu.core_type = #tpu.core_type<tc>, window_params = [{transform_indices = @transform_0, window_bounds = array<i64: 8, 27>}, {pipeline_mode = #tpu.pipeline_mode<synchronous>, transform_indices = @transform_1, window_bounds = array<i64: 27, 8320>}, {transform_indices = @transform_2, window_bounds = array<i64: 8, 1>}, {transform_indices = @transform_3, window_bounds = array<i64: 8, 8320>}]} {
    %c0 = arith.constant 0 : index
    %c0_0 = arith.constant 0 : index
    %0 = vector.load %arg1[%c0, %c0_0] : memref<8x27xbf16, #tpu.memory_space<vmem>>, vector<8x27xbf16>
    %c0_1 = arith.constant 0 : index
    %c0_2 = arith.constant 0 : index
    %1 = vector.load %arg2[%c0_1, %c0_2] : memref<27x8320xbf16, #tpu.memory_space<vmem>>, vector<27x8320xbf16>
    %cst = arith.constant dense<0.000000e+00> : vector<8x8320xf32>
    %2 = tpu.matmul %0, %1, %cst {dimension_numbers = #tpu.dot_dimension_numbers<[1], [0], [0], [1], [0, 0, 1, 1], [], []>} : vector<8x27xbf16>, vector<27x8320xbf16>, vector<8x8320xf32> -> vector<8x8320xf32>
    %c0_3 = arith.constant 0 : index
    %c0_4 = arith.constant 0 : index
    %3 = vector.load %arg3[%c0_3, %c0_4] : memref<8x1xf32, #tpu.memory_space<vmem>>, vector<8x1xf32>
    %4 = vector.broadcast %3 : vector<8x1xf32> to vector<8x8320xf32>
    %5 = arith.addf %2, %4 : vector<8x8320xf32>
    %6 = arith.truncf %5 : vector<8x8320xf32> to vector<8x8320xbf16>
    %c0_5 = arith.constant 0 : index
    %c0_6 = arith.constant 0 : index
    %7 = vector.load %arg4[%c0_5, %c0_6] : memref<8x8320xbf16, #tpu.memory_space<vmem>>, vector<8x8320xbf16>
    tpu.vector_store %arg4[%c0_5, %c0_6], %6 {strides = array<i32>} : memref<8x8320xbf16, #tpu.memory_space<vmem>>, vector<8x8320xbf16>,
    return
  }
  func.func @transform_0(%arg0: i32) -> (i32, i32) {
    %c0_i32 = arith.constant 0 : i32
    %c0_i32_0 = arith.constant 0 : i32
    return %arg0, %c0_i32 : i32, i32
  }
  func.func @transform_1(%arg0: i32) -> (i32, i32) {
    %c0_i32 = arith.constant 0 : i32
    %c0_i32_0 = arith.constant 0 : i32
    %c0_i32_1 = arith.constant 0 : i32
    return %c0_i32, %c0_i32_0 : i32, i32
  }
  func.func @transform_2(%arg0: i32) -> (i32, i32) {
    %c0_i32 = arith.constant 0 : i32
    %c0_i32_0 = arith.constant 0 : i32
    return %arg0, %c0_i32 : i32, i32
  }
  func.func @transform_3(%arg0: i32) -> (i32, i32) {
    %c0_i32 = arith.constant 0 : i32
    %c0_i32_0 = arith.constant 0 : i32
    return %arg0, %c0_i32 : i32, i32
  }
}

module attributes {stable_mosaic.version = 11 : i64} {
  func.func @_pool2x2_relu_kernel(%arg0: memref<16x2080xbf16, #tpu.memory_space<vmem>>, %arg1: memref<16x2080xbf16, #tpu.memory_space<vmem>>, %arg2: memref<16x2080xbf16, #tpu.memory_space<vmem>>, %arg3: memref<16x2080xbf16, #tpu.memory_space<vmem>>, %arg4: memref<16x2080xbf16, #tpu.memory_space<vmem>>) attributes {dimension_semantics = [], scalar_prefetch = 0 : i64, scratch_operands = 0 : i64, tpu.core_type = #tpu.core_type<tc>} {
    %c0 = arith.constant 0 : index
    %c0_0 = arith.constant 0 : index
    %0 = vector.load %arg0[%c0, %c0_0] : memref<16x2080xbf16, #tpu.memory_space<vmem>>, vector<16x2080xbf16>
    %c0_1 = arith.constant 0 : index
    %c0_2 = arith.constant 0 : index
    %1 = vector.load %arg1[%c0_1, %c0_2] : memref<16x2080xbf16, #tpu.memory_space<vmem>>, vector<16x2080xbf16>
    %2 = arith.maximumf %0, %1 : vector<16x2080xbf16>
    %c0_3 = arith.constant 0 : index
    %c0_4 = arith.constant 0 : index
    %3 = vector.load %arg2[%c0_3, %c0_4] : memref<16x2080xbf16, #tpu.memory_space<vmem>>, vector<16x2080xbf16>
    %c0_5 = arith.constant 0 : index
    %c0_6 = arith.constant 0 : index
    %4 = vector.load %arg3[%c0_5, %c0_6] : memref<16x2080xbf16, #tpu.memory_space<vmem>>, vector<16x2080xbf16>
    %5 = arith.maximumf %3, %4 : vector<16x2080xbf16>
    %6 = arith.maximumf %2, %5 : vector<16x2080xbf16>
    %cst = arith.constant 0.000000e+00 : bf16
    %7 = vector.broadcast %cst : bf16 to vector<16x2080xbf16>
    %8 = arith.maximumf %6, %7 : vector<16x2080xbf16>
    %c0_7 = arith.constant 0 : index
    %c0_8 = arith.constant 0 : index
    %9 = vector.load %arg4[%c0_7, %c0_8] : memref<16x2080xbf16, #tpu.memory_space<vmem>>, vector<16x2080xbf16>
    tpu.vector_store %arg4[%c0_7, %c0_8], %8 {strides = array<i32>} : memref<16x2080xbf16, #tpu.memory_space<vmem>>, vector<16x2080xbf16>,
    return
  }
}

module attributes {stable_mosaic.version = 11 : i64} {
  func.func @_conv_matmul_bias_kernel(%arg0: i32, %arg1: memref<16x144xbf16, #tpu.memory_space<vmem>>, %arg2: memref<144x2080xbf16, #tpu.memory_space<vmem>>, %arg3: memref<16x1xf32, #tpu.memory_space<vmem>>, %arg4: memref<16x2080xbf16, #tpu.memory_space<vmem>>) attributes {dimension_semantics = [#tpu.dimension_semantics<parallel>], iteration_bounds = array<i64: 2>, scalar_prefetch = 0 : i64, scratch_operands = 0 : i64, tpu.core_type = #tpu.core_type<tc>, window_params = [{transform_indices = @transform_0, window_bounds = array<i64: 16, 144>}, {pipeline_mode = #tpu.pipeline_mode<synchronous>, transform_indices = @transform_1, window_bounds = array<i64: 144, 2080>}, {transform_indices = @transform_2, window_bounds = array<i64: 16, 1>}, {transform_indices = @transform_3, window_bounds = array<i64: 16, 2080>}]} {
    %c0 = arith.constant 0 : index
    %c0_0 = arith.constant 0 : index
    %0 = vector.load %arg1[%c0, %c0_0] : memref<16x144xbf16, #tpu.memory_space<vmem>>, vector<16x144xbf16>
    %c0_1 = arith.constant 0 : index
    %c0_2 = arith.constant 0 : index
    %1 = vector.load %arg2[%c0_1, %c0_2] : memref<144x2080xbf16, #tpu.memory_space<vmem>>, vector<144x2080xbf16>
    %cst = arith.constant dense<0.000000e+00> : vector<16x2080xf32>
    %2 = tpu.matmul %0, %1, %cst {dimension_numbers = #tpu.dot_dimension_numbers<[1], [0], [0], [1], [0, 0, 1, 1], [], []>} : vector<16x144xbf16>, vector<144x2080xbf16>, vector<16x2080xf32> -> vector<16x2080xf32>
    %c0_3 = arith.constant 0 : index
    %c0_4 = arith.constant 0 : index
    %3 = vector.load %arg3[%c0_3, %c0_4] : memref<16x1xf32, #tpu.memory_space<vmem>>, vector<16x1xf32>
    %4 = vector.broadcast %3 : vector<16x1xf32> to vector<16x2080xf32>
    %5 = arith.addf %2, %4 : vector<16x2080xf32>
    %6 = arith.truncf %5 : vector<16x2080xf32> to vector<16x2080xbf16>
    %c0_5 = arith.constant 0 : index
    %c0_6 = arith.constant 0 : index
    %7 = vector.load %arg4[%c0_5, %c0_6] : memref<16x2080xbf16, #tpu.memory_space<vmem>>, vector<16x2080xbf16>
    tpu.vector_store %arg4[%c0_5, %c0_6], %6 {strides = array<i32>} : memref<16x2080xbf16, #tpu.memory_space<vmem>>, vector<16x2080xbf16>,
    return
  }
  func.func @transform_0(%arg0: i32) -> (i32, i32) {
    %c0_i32 = arith.constant 0 : i32
    %c0_i32_0 = arith.constant 0 : i32
    return %arg0, %c0_i32 : i32, i32
  }
  func.func @transform_1(%arg0: i32) -> (i32, i32) {
    %c0_i32 = arith.constant 0 : i32
    %c0_i32_0 = arith.constant 0 : i32
    %c0_i32_1 = arith.constant 0 : i32
    return %c0_i32, %c0_i32_0 : i32, i32
  }
  func.func @transform_2(%arg0: i32) -> (i32, i32) {
    %c0_i32 = arith.constant 0 : i32
    %c0_i32_0 = arith.constant 0 : i32
    return %arg0, %c0_i32 : i32, i32
  }
  func.func @transform_3(%arg0: i32) -> (i32, i32) {
    %c0_i32 = arith.constant 0 : i32
    %c0_i32_0 = arith.constant 0 : i32
    return %arg0, %c0_i32 : i32, i32
  }
}

module attributes {stable_mosaic.version = 11 : i64} {
  func.func @_pool2x2_relu_kernel(%arg0: memref<32x520xbf16, #tpu.memory_space<vmem>>, %arg1: memref<32x520xbf16, #tpu.memory_space<vmem>>, %arg2: memref<32x520xbf16, #tpu.memory_space<vmem>>, %arg3: memref<32x520xbf16, #tpu.memory_space<vmem>>, %arg4: memref<32x520xbf16, #tpu.memory_space<vmem>>) attributes {dimension_semantics = [], scalar_prefetch = 0 : i64, scratch_operands = 0 : i64, tpu.core_type = #tpu.core_type<tc>} {
    %c0 = arith.constant 0 : index
    %c0_0 = arith.constant 0 : index
    %0 = vector.load %arg0[%c0, %c0_0] : memref<32x520xbf16, #tpu.memory_space<vmem>>, vector<32x520xbf16>
    %c0_1 = arith.constant 0 : index
    %c0_2 = arith.constant 0 : index
    %1 = vector.load %arg1[%c0_1, %c0_2] : memref<32x520xbf16, #tpu.memory_space<vmem>>, vector<32x520xbf16>
    %2 = arith.maximumf %0, %1 : vector<32x520xbf16>
    %c0_3 = arith.constant 0 : index
    %c0_4 = arith.constant 0 : index
    %3 = vector.load %arg2[%c0_3, %c0_4] : memref<32x520xbf16, #tpu.memory_space<vmem>>, vector<32x520xbf16>
    %c0_5 = arith.constant 0 : index
    %c0_6 = arith.constant 0 : index
    %4 = vector.load %arg3[%c0_5, %c0_6] : memref<32x520xbf16, #tpu.memory_space<vmem>>, vector<32x520xbf16>
    %5 = arith.maximumf %3, %4 : vector<32x520xbf16>
    %6 = arith.maximumf %2, %5 : vector<32x520xbf16>
    %cst = arith.constant 0.000000e+00 : bf16
    %7 = vector.broadcast %cst : bf16 to vector<32x520xbf16>
    %8 = arith.maximumf %6, %7 : vector<32x520xbf16>
    %c0_7 = arith.constant 0 : index
    %c0_8 = arith.constant 0 : index
    %9 = vector.load %arg4[%c0_7, %c0_8] : memref<32x520xbf16, #tpu.memory_space<vmem>>, vector<32x520xbf16>
    tpu.vector_store %arg4[%c0_7, %c0_8], %8 {strides = array<i32>} : memref<32x520xbf16, #tpu.memory_space<vmem>>, vector<32x520xbf16>,
    return
  }
}

module attributes {stable_mosaic.version = 11 : i64} {
  func.func @_fc_fused_kernel(%arg0: memref<2x8320xbf16, #tpu.memory_space<vmem>>, %arg1: memref<8320x64xbf16, #tpu.memory_space<vmem>>, %arg2: memref<1x64xf32, #tpu.memory_space<vmem>>, %arg3: memref<64x10xbf16, #tpu.memory_space<vmem>>, %arg4: memref<1x10xf32, #tpu.memory_space<vmem>>, %arg5: memref<2x10xf32, #tpu.memory_space<vmem>>) attributes {dimension_semantics = [], scalar_prefetch = 0 : i64, scratch_operands = 0 : i64, tpu.core_type = #tpu.core_type<tc>} {
    %c0 = arith.constant 0 : index
    %c0_0 = arith.constant 0 : index
    %0 = vector.load %arg0[%c0, %c0_0] : memref<2x8320xbf16, #tpu.memory_space<vmem>>, vector<2x8320xbf16>
    %c0_1 = arith.constant 0 : index
    %c0_2 = arith.constant 0 : index
    %1 = vector.load %arg1[%c0_1, %c0_2] : memref<8320x64xbf16, #tpu.memory_space<vmem>>, vector<8320x64xbf16>
    %cst = arith.constant dense<0.000000e+00> : vector<2x64xf32>
    %2 = tpu.matmul %0, %1, %cst {dimension_numbers = #tpu.dot_dimension_numbers<[1], [0], [0], [1], [0, 0, 1, 1], [], []>} : vector<2x8320xbf16>, vector<8320x64xbf16>, vector<2x64xf32> -> vector<2x64xf32>
    %c0_3 = arith.constant 0 : index
    %c0_4 = arith.constant 0 : index
    %3 = vector.load %arg2[%c0_3, %c0_4] : memref<1x64xf32, #tpu.memory_space<vmem>>, vector<1x64xf32>
    %4 = vector.broadcast %3 : vector<1x64xf32> to vector<2x64xf32>
    %5 = arith.addf %2, %4 : vector<2x64xf32>
    %cst_5 = arith.constant 0.000000e+00 : f32
    %6 = vector.broadcast %cst_5 : f32 to vector<2x64xf32>
    %7 = arith.maximumf %5, %6 : vector<2x64xf32>
    %8 = arith.truncf %7 : vector<2x64xf32> to vector<2x64xbf16>
    %c0_6 = arith.constant 0 : index
    %c0_7 = arith.constant 0 : index
    %9 = vector.load %arg3[%c0_6, %c0_7] : memref<64x10xbf16, #tpu.memory_space<vmem>>, vector<64x10xbf16>
    %cst_8 = arith.constant dense<0.000000e+00> : vector<2x10xf32>
    %10 = tpu.matmul %8, %9, %cst_8 {dimension_numbers = #tpu.dot_dimension_numbers<[1], [0], [0], [1], [0, 0, 1, 1], [], []>} : vector<2x64xbf16>, vector<64x10xbf16>, vector<2x10xf32> -> vector<2x10xf32>
    %c0_9 = arith.constant 0 : index
    %c0_10 = arith.constant 0 : index
    %11 = vector.load %arg4[%c0_9, %c0_10] : memref<1x10xf32, #tpu.memory_space<vmem>>, vector<1x10xf32>
    %12 = vector.broadcast %11 : vector<1x10xf32> to vector<2x10xf32>
    %13 = arith.addf %10, %12 : vector<2x10xf32>
    %c0_11 = arith.constant 0 : index
    %c0_12 = arith.constant 0 : index
    %14 = vector.load %arg5[%c0_11, %c0_12] : memref<2x10xf32, #tpu.memory_space<vmem>>, vector<2x10xf32>
    tpu.vector_store %arg5[%c0_11, %c0_12], %13 {strides = array<i32>} : memref<2x10xf32, #tpu.memory_space<vmem>>, vector<2x10xf32>,
    return
  }
}

</mosaic_0001>

<bundles_post_ra>
// kernel: convnet_model5_forward.5
= control target key start
LH: loop header
LB: loop body
LE: loop exit
PB: predicated region body
PF: predicated region fallthrough
CT: control target
= control target key end

     0   :  { %s3318_s12 = smov 0   ;;  %s4003_s0 = inlined_call_operand.vmem [shape: bf16[16,27], index: 0, kind: input, shape index: {}]   ;;  %s4004_s1 = inlined_call_operand.vmem [shape: bf16[27,8320], index: 1, kind: input, shape index: {}]   ;;  %s4005_s2 = inlined_call_operand.vmem [shape: f32[16,1], index: 2, kind: input, shape index: {}]   ;;  %s4006_s3 = inlined_call_operand.vmem [shape: bf16[16,8320], index: 3, kind: output, shape index: {}]  }
   0x1 LB: > { %s2828_s13 = sadd.s32 4294967295, %s3292_s12   ;;  %p2832_p0 = scmp.ge.s32.totalorder %s3292_s12, 1  ;;  %s3292_s12 = sphi %s3318_s12, %s13_s12  }
   0x2   : > { %p145_p1 = scmp.lt.s32.totalorder %s3292_s12, 3 }
   0x4   : > { %p146_p2 = pnand %p2832_p0, %p145_p1 }
   0x5   : > { %v3092_v0 = vld [vmem:[%s4004_s1 + $0x4] ss:$260 sps:$4 sm:$0xff] (!%p146_p2)   ;;  %vm916_vm0 = vcmask (!%p146_p2), 1044480   ;;  %vm917_vm1 = vcmask (!%p146_p2), 1045504   ;;  %v3294_v3 = vmov (!%p146_p2), 65535   ;;  %p172_p3 = scmp.lt.s32.totalorder (!%p146_p2), %s2828_s13, 1 }
   0x6   : > { %149 = sbr.rel (%p146_p2) target bundleno = 362 (0x16a), region = 32  ;;  %v3094_v1 = vld [vmem:[%s4004_s1] ss:$260 sps:$4 sm:$0xff] (!%p146_p2)   ;;  %1115 = vmatprep.subr.bf16.mxu0 (!%p146_p2), %v3092_v0  ;;  %v3095_v2 = vld [vmem:[%s4004_s1 + $0x20c] ss:$260 sps:$4 sm:$0x3f] (!%p146_p2)  }
   0x7   : > { %v918_v4 = vsel (!%p146_p2), %vm916_vm0, 4294967295, %v3294_v3  ;;  %1116 = vmatpush1.bf16.msra.mxu0 (!%p146_p2), %v3094_v1  ;;  %v3097_v6 = vld [vmem:[%s4004_s1 + $0x208] ss:$260 sps:$4 sm:$0x3f] (!%p146_p2)   ;;  %v3295_v11 = vmov (!%p146_p2), 0   ;;  %vm912_vm2 = vcmask (!%p146_p2), 220160  }
   0x8   : > { %v3335_v5 = vsel (!%p146_p2), %vm917_vm1, %v918_v4, 0  ;;  %v3098_v7 = vld [vmem:[%s4004_s1 + $0xc] ss:$260 sps:$4 sm:$0xff] (!%p146_p2)   ;;  %1147 = vmatprep.mubr.bf16.mxu0 (!%p146_p2), %v3295_v11  ;;  %v3103_v12 = vld [vmem:[%s4004_s1 + $0x14] ss:$260 sps:$4 sm:$0xff] (!%p146_p2)   ;;  %1188 = vmatprep.mubr.bf16.mxu1 (!%p146_p2), %v3295_v11  ;;  %vm3297_vm3 = vmmov (!%p146_p2), 0  }
   0x9   : > { %v924_v8 = vand.u32 (!%p146_p2), %v3095_v2, %v3335_v5  ;;  %v3100_v9 = vld [vmem:[%s4004_s1 + $0x8] ss:$260 sps:$4 sm:$0xff] (!%p146_p2)   ;;  %v921_v10 = vand.u32 (!%p146_p2), %v3097_v6, %v3335_v5  ;;  %1156 = vmatprep.subr.bf16.mxu1 (!%p146_p2), %v3098_v7  ;;  %v3101_v13 = vld [vmem:[%s4004_s1 + $0x10] ss:$260 sps:$4 sm:$0xff] (!%p146_p2)   ;;  %3091 = vset.pattern.permute.xlu0 (!%p146_p2), %v3295_v11  ;;  %v3112_v21 = vld [vmem:[%s4004_s1 + $0x1c] ss:$260 sps:$4 sm:$0xff] (!%p146_p2)  }
   0xa   : > { %1157 = vmatpush1.bf16.msra.mxu1 (!%p146_p2), %v3100_v9  ;;  %v3104_v14 = vld [vmem:[%s4004_s1 + $0x214] ss:$260 sps:$4 sm:$0x3f] (!%p146_p2)   ;;  %v3109_v19 = vld [vmem:[%s4004_s1 + $0x21c] ss:$260 sps:$4 sm:$0x3f] (!%p146_p2)  }
   0xb   : > { %1117 = vmatprep.subr.bf16.mxu0 (!%p146_p2), %v924_v8  ;;  %v3106_v15 = vld [vmem:[%s4004_s1 + $0x210] ss:$260 sps:$4 sm:$0x3f] (!%p146_p2)   ;;  %v3107_v16 = vld [vmem:[%s4004_s1 + $0x218] ss:$260 sps:$4 sm:$0x3f] (!%p146_p2)   ;;  %v930_v17 = vand.u32 (!%p146_p2), %v3104_v14, %v3335_v5  ;;  %v936_v22 = vand.u32 (!%p146_p2), %v3109_v19, %v3335_v5 }
   0xc   : > { %1118 = vmatpush1.bf16.msra.mxu0 (!%p146_p2), %v921_v10  ;;  %v927_v18 = vand.u32 (!%p146_p2), %v3106_v15, %v3335_v5  ;;  %v3110_v23 = vld [vmem:[%s4004_s1 + $0x18] ss:$260 sps:$4 sm:$0xff] (!%p146_p2)   ;;  %v933_v24 = vand.u32 (!%p146_p2), %v3107_v16, %v3335_v5  ;;  %v3115_v25 = vld [vmem:[%s4004_s1 + $0x24] ss:$260 sps:$4 sm:$0xff] (!%p146_p2)   ;;  %v3124_v34 = vld [vmem:[%s4004_s1 + $0x2c] ss:$260 sps:$4 sm:$0xff] (!%p146_p2)  }
   0xd   : > { %s4008_s13 = smov (!%p172_p3, %s2828_s13), 1  ;;  %1197 = vmatprep.subr.bf16.mxu0 %v3103_v12  ;;  %1158 = vmatprep.subr.bf16.mxu1 %v930_v17  ;;  %v3116_v26 = vld [vmem:[%s4004_s1 + $0x220] ss:$260 sps:$4 sm:$0x3f]   ;;  %v3122_v35 = vld [vmem:[%s4004_s1 + $0x28] ss:$260 sps:$4 sm:$0xff]  }
   0xe   : > { %s2833_s7 = sshll.u32 %s4008_s13, 2  ;;  %1159 = vmatpush1.bf16.msra.mxu1 %v927_v18  ;;  %v3118_v27 = vld [vmem:[%s4004_s1 + $0x224] ss:$260 sps:$4 sm:$0x3f]   ;;  %v939_v31 = vand.u32 %v3116_v26, %v3335_v5  ;;  %v3127_v38 = vld [vmem:[%s4004_s1 + $0x34] ss:$260 sps:$4 sm:$0xff]  }
   0xf   : > { %s175_s14 = scalar_lea.vmem %s4003_s0, %s2833_s7  ;;  %1238 = vmatprep.subr.bf16.mxu1 %v3112_v21  ;;  %v942_v28 = vand.u32 %v3118_v27, %v3335_v5  ;;  %v3121_v29 = vld [vmem:[%s4004_s1 + $0x22c] ss:$260 sps:$4 sm:$0x3f]   ;;  %v3113_v30 = vld [vmem:[%s4004_s1 + $0x20] ss:$260 sps:$4 sm:$0xff]   ;;  %s2834_s21 = sshll.u32 %s4008_s13, 3 }
  0x10   : > { %v3377_v20 = vld [vmem:[%s175_s14] sm:$0xf]  ;;  %v3119_v32 = vld [vmem:[%s4004_s1 + $0x228] ss:$260 sps:$4 sm:$0x3f]   ;;  %v948_v33 = vand.u32 %v3121_v29, %v3335_v5  ;;  %s179_s30 = scalar_lea.vmem %s4005_s2, %s2834_s21  ;;  %s3078_s5 = smul.u32 260, %s4008_s13 }
  0x11   : > { %2966 = vmatmul.mubr.msk.bf16.vlgmr.msra.gmra.mrb[0].mxu0 %vm912_vm2, %v3377_v20  ;;  %2967 = vmatmul.mubr.msk.bf16.vlgmr.msra.gmra.mrb[0].mxu1 %vm912_vm2, %v3377_v20  ;;  %v3130_v36 = vld [vmem:[%s4004_s1 + $0x234] ss:$260 sps:$4 sm:$0x3f]   ;;  %v945_v37 = vand.u32 %v3119_v32, %v3335_v5  ;;  %v3133_v41 = vld [vmem:[%s4004_s1 + $0x23c] ss:$260 sps:$4 sm:$0x3f]  }
  0x12   : > { %1198 = vmatpush1.bf16.msra.mxu0 %v3101_v13  ;;  %1229 = vmatprep.mubr.bf16.mxu0 %v3295_v11  ;;  %v3128_v39 = vld [vmem:[%s4004_s1 + $0x230] ss:$260 sps:$4 sm:$0x3f]   ;;  %v954_v40 = vand.u32 %v3130_v36, %v3335_v5  ;;  %v3131_v43 = vld [vmem:[%s4004_s1 + $0x238] ss:$260 sps:$4 sm:$0x3f]   ;;  %v960_v46 = vand.u32 %v3133_v41, %v3335_v5  ;;  %s3902_s8 = scalar_lea.vmem %s4006_s3, %s3078_s5 }
  0x13   : > { %1199 = vmatprep.subr.bf16.mxu0 %v936_v22  ;;  %1239 = vmatpush1.bf16.msra.mxu1 %v3110_v23  ;;  %v3125_v42 = vld [vmem:[%s4004_s1 + $0x30] ss:$260 sps:$4 sm:$0xff]   ;;  %v951_v44 = vand.u32 %v3128_v39, %v3335_v5  ;;  %v3136_v45 = vld [vmem:[%s4004_s1 + $0x3c] ss:$260 sps:$4 sm:$0xff]   ;;  %v3139_v49 = vld [vmem:[%s4004_s1 + $0x44] ss:$260 sps:$4 sm:$0xff]   ;;  %v957_v50 = vand.u32 %v3131_v43, %v3335_v5 }
  0x14   : > { %1240 = vmatprep.subr.bf16.mxu1 %v942_v28  ;;  %1270 = vmatprep.mubr.bf16.mxu1 %v3295_v11  ;;  %v3142_v47 = vld [vmem:[%s4004_s1 + $0x244] ss:$260 sps:$4 sm:$0x3f]   ;;  %v3134_v48 = vld [vmem:[%s4004_s1 + $0x38] ss:$260 sps:$4 sm:$0xff]  }
  0x15   : > { %v3140_v51 = vld [vmem:[%s4004_s1 + $0x240] ss:$260 sps:$4 sm:$0x3f]   ;;  %v966_v52 = vand.u32 %v3142_v47, %v3335_v5  ;;  %v3145_v53 = vld [vmem:[%s4004_s1 + $0x24c] ss:$260 sps:$4 sm:$0x3f]  }
  0x16   : > { %1200 = vmatpush1.bf16.msra.mxu0 %v933_v24  ;;  %v3137_v54 = vld [vmem:[%s4004_s1 + $0x40] ss:$260 sps:$4 sm:$0xff]   ;;  %v963_v55 = vand.u32 %v3140_v51, %v3335_v5  ;;  %v3143_v56 = vld [vmem:[%s4004_s1 + $0x248] ss:$260 sps:$4 sm:$0x3f]   ;;  %v972_v57 = vand.u32 %v3145_v53, %v3335_v5 }
  0x17   : > { %1279 = vmatprep.subr.bf16.mxu0 %v3115_v25  ;;  %1241 = vmatpush1.bf16.msra.mxu1 %v939_v31  ;;  %v3148_v58 = vld [vmem:[%s4004_s1 + $0x4c] ss:$260 sps:$4 sm:$0xff]   ;;  %v3154_v59 = vld [vmem:[%s4004_s1 + $0x254] ss:$260 sps:$4 sm:$0x3f]   ;;  %v969_v61 = vand.u32 %v3143_v56, %v3335_v5  ;;  %v319_v47 = vld [vmem:[%s179_s30] sm:$0xff] }
  0x18   : > { %1320 = vmatprep.subr.bf16.mxu1 %v3124_v34  ;;  %v3146_v60 = vld [vmem:[%s4004_s1 + $0x48] ss:$260 sps:$4 sm:$0xff]   ;;  %v3152_v62 = vld [vmem:[%s4004_s1 + $0x250] ss:$260 sps:$4 sm:$0x3f]   ;;  %v978_v0 = vand.u32 %v3154_v59, %v3335_v5  ;;  %322 = vperm.xlu0 %3091, %v319_v47  }
  0x19   : > { %2968 = vmatmul.mubr.msk.bf16.vlgmr.msra.gmra.mrb[4].mxu0 %vm912_vm2, %v3377_v20  ;;  %v3151_v63 = vld [vmem:[%s4004_s1 + $0x54] ss:$260 sps:$4 sm:$0xff]   ;;  %v3157_v1 = vld [vmem:[%s4004_s1 + $0x25c] ss:$260 sps:$4 sm:$0x3f]   ;;  %v975_v3 = vand.u32 %v3152_v62, %v3335_v5 }
  0x1a   : > { %1280 = vmatpush1.bf16.msra.mxu0 %v3113_v30  ;;  %1311 = vmatprep.mubr.bf16.mxu0 %v3295_v11  ;;  %v3149_v2 = vld [vmem:[%s4004_s1 + $0x50] ss:$260 sps:$4 sm:$0xff]   ;;  %v3155_v4 = vld [vmem:[%s4004_s1 + $0x258] ss:$260 sps:$4 sm:$0x3f]   ;;  %v984_v7 = vand.u32 %v3157_v1, %v3335_v5 }
  0x1b   : > { %1281 = vmatprep.subr.bf16.mxu0 %v948_v33  ;;  %2969 = vmatmul.mubr.msk.bf16.vlgmr.msra.gmra.mrb[4].mxu1 %vm912_vm2, %v3377_v20  ;;  %v3160_v6 = vld [vmem:[%s4004_s1 + $0x5c] ss:$260 sps:$4 sm:$0xff]   ;;  %v3166_v8 = vld [vmem:[%s4004_s1 + $0x264] ss:$260 sps:$4 sm:$0x3f]   ;;  %v981_v10 = vand.u32 %v3155_v4, %v3335_v5 }
  0x1c   : > { %1321 = vmatpush1.bf16.msra.mxu1 %v3122_v35  ;;  %1352 = vmatprep.mubr.bf16.mxu1 %v3295_v11  ;;  %v3158_v9 = vld [vmem:[%s4004_s1 + $0x58] ss:$260 sps:$4 sm:$0xff]   ;;  %v3163_v12 = vld [vmem:[%s4004_s1 + $0x64] ss:$260 sps:$4 sm:$0xff]   ;;  %v990_v14 = vand.u32 %v3166_v8, %v3335_v5  ;;  %v3172_v19 = vld [vmem:[%s4004_s1 + $0x6c] ss:$260 sps:$4 sm:$0xff]  }
  0x1d   : > { %1322 = vmatprep.subr.bf16.mxu1 %v954_v40  ;;  %v3164_v13 = vld [vmem:[%s4004_s1 + $0x260] ss:$260 sps:$4 sm:$0x3f]   ;;  %v3169_v15 = vld [vmem:[%s4004_s1 + $0x26c] ss:$260 sps:$4 sm:$0x3f]  }
  0x1e   : > { %1282 = vmatpush1.bf16.msra.mxu0 %v945_v37  ;;  %v3161_v16 = vld [vmem:[%s4004_s1 + $0x60] ss:$260 sps:$4 sm:$0xff]   ;;  %v3167_v17 = vld [vmem:[%s4004_s1 + $0x268] ss:$260 sps:$4 sm:$0x3f]   ;;  %v987_v18 = vand.u32 %v3164_v13, %v3335_v5  ;;  %v996_v21 = vand.u32 %v3169_v15, %v3335_v5 }
  0x1f   : > { %1361 = vmatprep.subr.bf16.mxu0 %v3127_v38  ;;  %v3178_v22 = vld [vmem:[%s4004_s1 + $0x274] ss:$260 sps:$4 sm:$0x3f]   ;;  %v3170_v23 = vld [vmem:[%s4004_s1 + $0x68] ss:$260 sps:$4 sm:$0xff]   ;;  %v993_v25 = vand.u32 %v3167_v17, %v3335_v5 }
  0x20   : > { %1323 = vmatpush1.bf16.msra.mxu1 %v951_v44  ;;  %v3175_v24 = vld [vmem:[%s4004_s1 + $0x74] ss:$260 sps:$4 sm:$0xff]   ;;  %v1002_v27 = vand.u32 %v3178_v22, %v3335_v5  ;;  %v3181_v28 = vld [vmem:[%s4004_s1 + $0x27c] ss:$260 sps:$4 sm:$0x3f]  }
  0x21   : > { %2970 = vmatmul.mubr.msk.bf16.vlgmr.msra.gmra.mrb[8].mxu0 %vm912_vm2, %v3377_v20  ;;  %1402 = vmatprep.subr.bf16.mxu1 %v3136_v45  ;;  %v3176_v26 = vld [vmem:[%s4004_s1 + $0x270] ss:$260 sps:$4 sm:$0x3f]   ;;  %v3179_v31 = vld [vmem:[%s4004_s1 + $0x278] ss:$260 sps:$4 sm:$0x3f]   ;;  %v1008_v32 = vand.u32 %v3181_v28, %v3335_v5 }
  0x22   : > { %1362 = vmatpush1.bf16.msra.mxu0 %v3125_v42  ;;  %1393 = vmatprep.mubr.bf16.mxu0 %v3295_v11  ;;  %v3173_v29 = vld [vmem:[%s4004_s1 + $0x70] ss:$260 sps:$4 sm:$0xff]   ;;  %v999_v30 = vand.u32 %v3176_v26, %v3335_v5  ;;  %v3184_v33 = vld [vmem:[%s4004_s1 + $0x7c] ss:$260 sps:$4 sm:$0xff]   ;;  %v1005_v35 = vand.u32 %v3179_v31, %v3335_v5  ;;  %v3187_v38 = vld [vmem:[%s4004_s1 + $0x84] ss:$260 sps:$4 sm:$0xff]  }
  0x23   : > { %1363 = vmatprep.subr.bf16.mxu0 %v960_v46  ;;  %2971 = vmatmul.mubr.msk.bf16.vlgmr.msra.gmra.mrb[8].mxu1 %vm912_vm2, %v3377_v20  ;;  %v3190_v34 = vld [vmem:[%s4004_s1 + $0x284] ss:$260 sps:$4 sm:$0x3f]   ;;  %v3182_v36 = vld [vmem:[%s4004_s1 + $0x78] ss:$260 sps:$4 sm:$0xff]  }
  0x24   : > { %1403 = vmatpush1.bf16.msra.mxu1 %v3134_v48  ;;  %1434 = vmatprep.mubr.bf16.mxu1 %v3295_v11  ;;  %v3188_v37 = vld [vmem:[%s4004_s1 + $0x280] ss:$260 sps:$4 sm:$0x3f]   ;;  %v1014_v39 = vand.u32 %v3190_v34, %v3335_v5  ;;  %v3193_v40 = vld [vmem:[%s4004_s1 + $0x28c] ss:$260 sps:$4 sm:$0x3f]  }
  0x25   : > { %1404 = vmatprep.subr.bf16.mxu1 %v966_v52  ;;  %v3185_v41 = vld [vmem:[%s4004_s1 + $0x80] ss:$260 sps:$4 sm:$0xff]   ;;  %v1011_v42 = vand.u32 %v3188_v37, %v3335_v5  ;;  %v3191_v43 = vld [vmem:[%s4004_s1 + $0x288] ss:$260 sps:$4 sm:$0x3f]   ;;  %v1020_v45 = vand.u32 %v3193_v40, %v3335_v5 }
  0x26   : > { %1364 = vmatpush1.bf16.msra.mxu0 %v957_v50  ;;  %v3196_v44 = vld [vmem:[%s4004_s1 + $0x8c] ss:$260 sps:$4 sm:$0xff]   ;;  %v3202_v46 = vld [vmem:[%s4004_s1 + $0x294] ss:$260 sps:$4 sm:$0x3f]   ;;  %v1017_v50 = vand.u32 %v3191_v43, %v3335_v5 }
  0x27   : > { %1443 = vmatprep.subr.bf16.mxu0 %v3139_v49  ;;  %v3194_v48 = vld [vmem:[%s4004_s1 + $0x88] ss:$260 sps:$4 sm:$0xff]   ;;  %v3199_v49 = vld [vmem:[%s4004_s1 + $0x94] ss:$260 sps:$4 sm:$0xff]   ;;  %v1026_v52 = vand.u32 %v3202_v46, %v3335_v5 }
  0x28   : > { %1405 = vmatpush1.bf16.msra.mxu1 %v963_v55  ;;  %v3200_v51 = vld [vmem:[%s4004_s1 + $0x290] ss:$260 sps:$4 sm:$0x3f]   ;;  %v3205_v53 = vld [vmem:[%s4004_s1 + $0x29c] ss:$260 sps:$4 sm:$0x3f]  }
  0x29   : > { %2972 = vmatmul.mubr.msk.bf16.vlgmr.msra.gmra.mrb[12].mxu0 %vm912_vm2, %v3377_v20  ;;  %1484 = vmatprep.subr.bf16.mxu1 %v3148_v58  ;;  %v1023_v55 = vand.u32 %v3200_v51, %v3335_v5  ;;  %v3203_v56 = vld [vmem:[%s4004_s1 + $0x298] ss:$260 sps:$4 sm:$0x3f]   ;;  %v3214_v59 = vld [vmem:[%s4004_s1 + $0x2a4] ss:$260 sps:$4 sm:$0x3f]  }
  0x2a   : > { %1444 = vmatpush1.bf16.msra.mxu0 %v3137_v54  ;;  %1475 = vmatprep.mubr.bf16.mxu0 %v3295_v11  ;;  %v3197_v54 = vld [vmem:[%s4004_s1 + $0x90] ss:$260 sps:$4 sm:$0xff]   ;;  %v3208_v58 = vld [vmem:[%s4004_s1 + $0x9c] ss:$260 sps:$4 sm:$0xff]  }
  0x2b   : > { %1445 = vmatprep.subr.bf16.mxu0 %v972_v57  ;;  %2973 = vmatmul.mubr.msk.bf16.vlgmr.msra.gmra.mrb[12].mxu1 %vm912_vm2, %v3377_v20  ;;  %v1032_v57 = vand.u32 %v3205_v53, %v3335_v5  ;;  %v3212_v62 = vld [vmem:[%s4004_s1 + $0x2a0] ss:$260 sps:$4 sm:$0x3f]   ;;  %v3217_v1 = vld [vmem:[%s4004_s1 + $0x2ac] ss:$260 sps:$4 sm:$0x3f]  }
  0x2c   : > { %1485 = vmatpush1.bf16.msra.mxu1 %v3146_v60  ;;  %1516 = vmatprep.mubr.bf16.mxu1 %v3295_v11  ;;  %v3206_v60 = vld [vmem:[%s4004_s1 + $0x98] ss:$260 sps:$4 sm:$0xff]   ;;  %v3215_v4 = vld [vmem:[%s4004_s1 + $0x2a8] ss:$260 sps:$4 sm:$0x3f]  }
  0x2d   : > { %1486 = vmatprep.subr.bf16.mxu1 %v978_v0  ;;  %v1038_v0 = vand.u32 %v3214_v59, %v3335_v5  ;;  %v3226_v8 = vld [vmem:[%s4004_s1 + $0x2b4] ss:$260 sps:$4 sm:$0x3f]   ;;  %v3229_v15 = vld [vmem:[%s4004_s1 + $0x2bc] ss:$260 sps:$4 sm:$0x3f]  }
  0x2e   : > { %1446 = vmatpush1.bf16.msra.mxu0 %v969_v61  ;;  %v1029_v61 = vand.u32 %v3203_v56, %v3335_v5  ;;  %v3224_v13 = vld [vmem:[%s4004_s1 + $0x2b0] ss:$260 sps:$4 sm:$0x3f]   ;;  %v3227_v17 = vld [vmem:[%s4004_s1 + $0x2b8] ss:$260 sps:$4 sm:$0x3f]  }
  0x2f   : > { %1525 = vmatprep.subr.bf16.mxu0 %v3151_v63  ;;  %v3211_v63 = vld [vmem:[%s4004_s1 + $0xa4] ss:$260 sps:$4 sm:$0xff]   ;;  %v3241_v26 = vld [vmem:[%s4004_s1 + $0x2cc] ss:$260 sps:$4 sm:$0x3f]  }
  0x30   : > { %1487 = vmatpush1.bf16.msra.mxu1 %v975_v3  ;;  %v1035_v3 = vand.u32 %v3212_v62, %v3335_v5  ;;  %v3238_v22 = vld [vmem:[%s4004_s1 + $0x2c4] ss:$260 sps:$4 sm:$0x3f]   ;;  %v3250_v34 = vld [vmem:[%s4004_s1 + $0x2d4] ss:$260 sps:$4 sm:$0x3f]  }
  0x31   : > { %2974 = vmatmul.mubr.msk.bf16.vlgmr.msra.gmra.mrb[16].mxu0 %vm912_vm2, %v3377_v20  ;;  %1566 = vmatprep.subr.bf16.mxu1 %v3160_v6  ;;  %v3220_v6 = vld [vmem:[%s4004_s1 + $0xac] ss:$260 sps:$4 sm:$0xff]   ;;  %v1062_v28 = vand.u32 %v3238_v22, %v3335_v5  ;;  %v3253_v40 = vld [vmem:[%s4004_s1 + $0x2dc] ss:$260 sps:$4 sm:$0x3f]  }
  0x32   : > { %1526 = vmatpush1.bf16.msra.mxu0 %v3149_v2  ;;  %1557 = vmatprep.mubr.bf16.mxu0 %v3295_v11  ;;  %v3209_v2 = vld [vmem:[%s4004_s1 + $0xa0] ss:$260 sps:$4 sm:$0xff]   ;;  %v3239_v31 = vld [vmem:[%s4004_s1 + $0x2c8] ss:$260 sps:$4 sm:$0x3f]  }
  0x33   : > { %1527 = vmatprep.subr.bf16.mxu0 %v984_v7  ;;  %2975 = vmatmul.mubr.msk.bf16.vlgmr.msra.gmra.mrb[16].mxu1 %vm912_vm2, %v3377_v20  ;;  %v1044_v7 = vand.u32 %v3217_v1, %v3335_v5  ;;  %v3248_v37 = vld [vmem:[%s4004_s1 + $0x2d0] ss:$260 sps:$4 sm:$0x3f]   ;;  %v3251_v43 = vld [vmem:[%s4004_s1 + $0x2d8] ss:$260 sps:$4 sm:$0x3f]  }
  0x34   : > { %1567 = vmatpush1.bf16.msra.mxu1 %v3158_v9  ;;  %1598 = vmatprep.mubr.bf16.mxu1 %v3295_v11  ;;  %v3218_v9 = vld [vmem:[%s4004_s1 + $0xa8] ss:$260 sps:$4 sm:$0xff]   ;;  %v1077_v47 = vand.u32 %v3251_v43, %v3335_v5  ;;  %v3257_v53 = vld [vmem:[%s4004_s1 + $0xe0] ss:$260 sps:$4 sm:$0xff]   ;;  %v3271_v62 = vld [vmem:[%s4004_s1 + $0xf4] ss:$260 sps:$4 sm:$0xff]  }
  0x35   : > { %1568 = vmatprep.subr.bf16.mxu1 %v990_v14  ;;  %v1050_v14 = vand.u32 %v3226_v8, %v3335_v5  ;;  %v3262_v46 = vld [vmem:[%s4004_s1 + $0x2e4] ss:$260 sps:$4 sm:$0x3f]   ;;  %v3269_v1 = vld [vmem:[%s4004_s1 + $0xf0] ss:$260 sps:$4 sm:$0xff]  }
  0x36   : > { %1528 = vmatpush1.bf16.msra.mxu0 %v981_v10  ;;  %v1041_v10 = vand.u32 %v3215_v4, %v3335_v5  ;;  %v1086_v51 = vand.u32 %v3262_v46, %v3335_v5 }
  0x37   : > { %1607 = vmatprep.subr.bf16.mxu0 %v3163_v12  ;;  %v3223_v12 = vld [vmem:[%s4004_s1 + $0xb4] ss:$260 sps:$4 sm:$0xff]  }
  0x38   : > { %1569 = vmatpush1.bf16.msra.mxu1 %v987_v18  ;;  %v1047_v18 = vand.u32 %v3224_v13, %v3335_v5  ;;  %v3284_v13 = vld [vmem:[%s4004_s1 + $0x100] ss:$260 sps:$4 sm:$0xff]  }
  0x39   : > { %2976 = vmatmul.mubr.msk.bf16.vlgmr.msra.gmra.mrb[20].mxu0 %vm912_vm2, %v3377_v20  ;;  %1648 = vmatprep.subr.bf16.mxu1 %v3172_v19  ;;  %v3232_v19 = vld [vmem:[%s4004_s1 + $0xbc] ss:$260 sps:$4 sm:$0xff]  }
  0x3a   : > { %1608 = vmatpush1.bf16.msra.mxu0 %v3161_v16  ;;  %1639 = vmatprep.mubr.bf16.mxu0 %v3295_v11  ;;  %v3221_v16 = vld [vmem:[%s4004_s1 + $0xb0] ss:$260 sps:$4 sm:$0xff]  }
  0x3b   : > { %1609 = vmatprep.subr.bf16.mxu0 %v996_v21  ;;  %2977 = vmatmul.mubr.msk.bf16.vlgmr.msra.gmra.mrb[20].mxu1 %vm912_vm2, %v3377_v20  ;;  %v1056_v21 = vand.u32 %v3229_v15, %v3335_v5  ;;  %v3285_v15 = vld [vmem:[%s4004_s1 + $0x308] ss:$260 sps:$4 sm:$0x3f]  }
  0x3c   : > { %1649 = vmatpush1.bf16.msra.mxu1 %v3170_v23  ;;  %1680 = vmatprep.mubr.bf16.mxu1 %v3295_v11  ;;  %v3230_v23 = vld [vmem:[%s4004_s1 + $0xb8] ss:$260 sps:$4 sm:$0xff]  }
  0x3d   : > { %1650 = vmatprep.subr.bf16.mxu1 %v1002_v27  ;;  %v3235_v27 = vld [vmem:[%s4004_s1 + $0xc4] ss:$260 sps:$4 sm:$0xff]  }
  0x3e   : > { %1610 = vmatpush1.bf16.msra.mxu0 %v993_v25  ;;  %v1053_v25 = vand.u32 %v3227_v17, %v3335_v5  ;;  %v1113_v17 = vand.u32 %v3285_v15, %v3335_v5 }
  0x3f   : > { %1689 = vmatprep.subr.bf16.mxu0 %v3175_v24  ;;  %v3236_v24 = vld [vmem:[%s4004_s1 + $0x2c0] ss:$260 sps:$4 sm:$0x3f]  }
  0x40   : > { %1651 = vmatpush1.bf16.msra.mxu1 %v999_v30  ;;  %v1059_v30 = vand.u32 %v3236_v24, %v3335_v5 }
  0x41   : > { %2978 = vmatmul.mubr.msk.bf16.vlgmr.msra.gmra.mrb[24].mxu0 %vm912_vm2, %v3377_v20  ;;  %1730 = vmatprep.subr.bf16.mxu1 %v3184_v33  ;;  %v3244_v33 = vld [vmem:[%s4004_s1 + $0xcc] ss:$260 sps:$4 sm:$0xff]  }
  0x42   : > { %1690 = vmatpush1.bf16.msra.mxu0 %v3173_v29  ;;  %1721 = vmatprep.mubr.bf16.mxu0 %v3295_v11  ;;  %v3233_v29 = vld [vmem:[%s4004_s1 + $0xc0] ss:$260 sps:$4 sm:$0xff]  }
  0x43   : > { %1691 = vmatprep.subr.bf16.mxu0 %v1008_v32  ;;  %2979 = vmatmul.mubr.msk.bf16.vlgmr.msra.gmra.mrb[24].mxu1 %vm912_vm2, %v3377_v20  ;;  %v1068_v32 = vand.u32 %v3241_v26, %v3335_v5 }
  0x44   : > { %1731 = vmatpush1.bf16.msra.mxu1 %v3182_v36  ;;  %1762 = vmatprep.mubr.bf16.mxu1 %v3295_v11  ;;  %v3242_v36 = vld [vmem:[%s4004_s1 + $0xc8] ss:$260 sps:$4 sm:$0xff]  }
  0x45   : > { %1732 = vmatprep.subr.bf16.mxu1 %v1014_v39  ;;  %v1074_v39 = vand.u32 %v3250_v34, %v3335_v5 }
  0x46   : > { %1692 = vmatpush1.bf16.msra.mxu0 %v1005_v35  ;;  %v1065_v35 = vand.u32 %v3239_v31, %v3335_v5 }
  0x47   : > { %1771 = vmatprep.subr.bf16.mxu0 %v3187_v38  ;;  %v3247_v38 = vld [vmem:[%s4004_s1 + $0xd4] ss:$260 sps:$4 sm:$0xff]  }
  0x48   : > { %1733 = vmatpush1.bf16.msra.mxu1 %v1011_v42  ;;  %v1071_v42 = vand.u32 %v3248_v37, %v3335_v5 }
  0x49   : > { %2980 = vmatmul.mubr.msk.bf16.vlgmr.msra.gmra.mrb[28].mxu0 %vm912_vm2, %v3377_v20  ;;  %1812 = vmatprep.subr.bf16.mxu1 %v3196_v44  ;;  %v1080_v44 = vand.u32 %v3253_v40, %v3335_v5 }
  0x4a   : > { %1772 = vmatpush1.bf16.msra.mxu0 %v3185_v41  ;;  %1803 = vmatprep.mubr.bf16.mxu0 %v3295_v11  ;;  %v3245_v41 = vld [vmem:[%s4004_s1 + $0xd0] ss:$260 sps:$4 sm:$0xff]  }
  0x4b   : > { %1773 = vmatprep.subr.bf16.mxu0 %v1020_v45  ;;  %2981 = vmatmul.mubr.msk.bf16.vlgmr.msra.gmra.mrb[28].mxu1 %vm912_vm2, %v3377_v20  ;;  %v3256_v45 = vld [vmem:[%s4004_s1 + $0xdc] ss:$260 sps:$4 sm:$0xff]  }
  0x4c   : > { %1813 = vmatpush1.bf16.msra.mxu1 %v3194_v48  ;;  %1844 = vmatprep.mubr.bf16.mxu1 %v3295_v11  ;;  %v3254_v48 = vld [vmem:[%s4004_s1 + $0xd8] ss:$260 sps:$4 sm:$0xff]  }
  0x4d   : > { %1814 = vmatprep.subr.bf16.mxu1 %v1026_v52  ;;  %v3265_v52 = vld [vmem:[%s4004_s1 + $0x2ec] ss:$260 sps:$4 sm:$0x3f]  }
  0x4e   : > { %1774 = vmatpush1.bf16.msra.mxu0 %v1017_v50  ;;  %v3259_v50 = vld [vmem:[%s4004_s1 + $0xe4] ss:$260 sps:$4 sm:$0xff]   ;;  %v1092_v56 = vand.u32 %v3265_v52, %v3335_v5 }
  0x4f   : > { %1853 = vmatprep.subr.bf16.mxu0 %v3199_v49  ;;  %v3260_v49 = vld [vmem:[%s4004_s1 + $0x2e0] ss:$260 sps:$4 sm:$0x3f]  }
  0x50   : > { %1815 = vmatpush1.bf16.msra.mxu1 %v1023_v55  ;;  %v3263_v55 = vld [vmem:[%s4004_s1 + $0x2e8] ss:$260 sps:$4 sm:$0x3f]  }
  0x51   : > { %2982 = vmatmul.mubr.msk.bf16.vlgmr.msra.gmra.mrb[32].mxu0 %vm912_vm2, %v3377_v20  ;;  %1894 = vmatprep.subr.bf16.mxu1 %v3208_v58  ;;  %v3274_v58 = vld [vmem:[%s4004_s1 + $0x2f4] ss:$260 sps:$4 sm:$0x3f]   ;;  %v1089_v59 = vand.u32 %v3263_v55, %v3335_v5 }
  0x52   : > { %1854 = vmatpush1.bf16.msra.mxu0 %v3197_v54  ;;  %1885 = vmatprep.mubr.bf16.mxu0 %v3295_v11  ;;  %v1083_v54 = vand.u32 %v3260_v49, %v3335_v5 }
  0x53   : > { %1855 = vmatprep.subr.bf16.mxu0 %v1032_v57  ;;  %2983 = vmatmul.mubr.msk.bf16.vlgmr.msra.gmra.mrb[32].mxu1 %vm912_vm2, %v3377_v20  ;;  %v3268_v57 = vld [vmem:[%s4004_s1 + $0xec] ss:$260 sps:$4 sm:$0xff]  }
  0x54   : > { %1895 = vmatpush1.bf16.msra.mxu1 %v3206_v60  ;;  %1926 = vmatprep.mubr.bf16.mxu1 %v3295_v11  ;;  %v3266_v60 = vld [vmem:[%s4004_s1 + $0xe8] ss:$260 sps:$4 sm:$0xff]  }
  0x55   : > { %1896 = vmatprep.subr.bf16.mxu1 %v1038_v0  ;;  %v3277_v0 = vld [vmem:[%s4004_s1 + $0x2fc] ss:$260 sps:$4 sm:$0x3f]  }
  0x56   : > { %1856 = vmatpush1.bf16.msra.mxu0 %v1029_v61  ;;  %v3272_v61 = vld [vmem:[%s4004_s1 + $0x2f0] ss:$260 sps:$4 sm:$0x3f]   ;;  %v1104_v4 = vand.u32 %v3277_v0, %v3335_v5 }
  0x57   : > { %1935 = vmatprep.subr.bf16.mxu0 %v3211_v63  ;;  %v1098_v63 = vand.u32 %v3274_v58, %v3335_v5 }
  0x58   : > { %1897 = vmatpush1.bf16.msra.mxu1 %v1035_v3  ;;  %v3275_v3 = vld [vmem:[%s4004_s1 + $0x2f8] ss:$260 sps:$4 sm:$0x3f]  }
  0x59   : > { %2984 = vmatmul.mubr.msk.bf16.vlgmr.msra.gmra.mrb[36].mxu0 %vm912_vm2, %v3377_v20  ;;  %1976 = vmatprep.subr.bf16.mxu1 %v3220_v6  ;;  %v3280_v6 = vld [vmem:[%s4004_s1 + $0xfc] ss:$260 sps:$4 sm:$0xff]   ;;  %v1101_v8 = vand.u32 %v3275_v3, %v3335_v5 }
  0x5a   : > { %1936 = vmatpush1.bf16.msra.mxu0 %v3209_v2  ;;  %1967 = vmatprep.mubr.bf16.mxu0 %v3295_v11  ;;  %v1095_v2 = vand.u32 %v3272_v61, %v3335_v5 }
  0x5b   : > { %1937 = vmatprep.subr.bf16.mxu0 %v1044_v7  ;;  %2985 = vmatmul.mubr.msk.bf16.vlgmr.msra.gmra.mrb[36].mxu1 %vm912_vm2, %v3377_v20  ;;  %v3283_v7 = vld [vmem:[%s4004_s1 + $0x304] ss:$260 sps:$4 sm:$0x3f]  }
  0x5c   : > { %1977 = vmatpush1.bf16.msra.mxu1 %v3218_v9  ;;  %2008 = vmatprep.mubr.bf16.mxu1 %v3295_v11  ;;  %v3278_v9 = vld [vmem:[%s4004_s1 + $0xf8] ss:$260 sps:$4 sm:$0xff]  }
  0x5d   : > { %1978 = vmatprep.subr.bf16.mxu1 %v1050_v14 }
  0x5e   : > { %1938 = vmatpush1.bf16.msra.mxu0 %v1041_v10  ;;  %v3281_v10 = vld [vmem:[%s4004_s1 + $0x300] ss:$260 sps:$4 sm:$0x3f]  }
  0x5f   : > { %2017 = vmatprep.subr.bf16.mxu0 %v3223_v12  ;;  %v1110_v12 = vand.u32 %v3283_v7, %v3335_v5  ;;  %v1107_v14 = vand.u32 %v3281_v10, %v3335_v5 }
  0x60   : > { %1979 = vmatpush1.bf16.msra.mxu1 %v1047_v18 }
  0x61   : > { %2986 = vmatmul.mubr.msk.bf16.vlgmr.msra.gmra.mrb[40].mxu0 %vm912_vm2, %v3377_v20  ;;  %2058 = vmatprep.subr.bf16.mxu1 %v3232_v19 }
  0x62   : > { %2018 = vmatpush1.bf16.msra.mxu0 %v3221_v16  ;;  %2049 = vmatprep.mubr.bf16.mxu0 %v3295_v11  ;;  %v3296_v16 = vmov 0.0  }
  0x63   : > { %2019 = vmatprep.subr.bf16.mxu0 %v1056_v21  ;;  %2987 = vmatmul.mubr.msk.bf16.vlgmr.msra.gmra.mrb[40].mxu1 %vm912_vm2, %v3377_v20 }
  0x64   : > { %2059 = vmatpush1.bf16.msra.mxu1 %v3230_v23  ;;  %2090 = vmatprep.mubr.bf16.mxu1 %v3295_v11 }
  0x65   : > { %2060 = vmatprep.subr.bf16.mxu1 %v1062_v28 }
  0x66   : > { %2020 = vmatpush1.bf16.msra.mxu0 %v1053_v25 }
  0x67   : > { %2099 = vmatprep.subr.bf16.mxu0 %v3235_v27 }
  0x68   : > { %2061 = vmatpush1.bf16.msra.mxu1 %v1059_v30 }
  0x69   : > { %2988 = vmatmul.mubr.msk.bf16.vlgmr.msra.gmra.mrb[44].mxu0 %vm912_vm2, %v3377_v20  ;;  %2140 = vmatprep.subr.bf16.mxu1 %v3244_v33 }
  0x6a   : > { %2100 = vmatpush1.bf16.msra.mxu0 %v3233_v29  ;;  %2131 = vmatprep.mubr.bf16.mxu0 %v3295_v11 }
  0x6b   : > { %2101 = vmatprep.subr.bf16.mxu0 %v1068_v32  ;;  %2989 = vmatmul.mubr.msk.bf16.vlgmr.msra.gmra.mrb[44].mxu1 %vm912_vm2, %v3377_v20 }
  0x6c   : > { %2141 = vmatpush1.bf16.msra.mxu1 %v3242_v36  ;;  %2172 = vmatprep.mubr.bf16.mxu1 %v3295_v11 }
  0x6d   : > { %2142 = vmatprep.subr.bf16.mxu1 %v1074_v39 }
  0x6e   : > { %2102 = vmatpush1.bf16.msra.mxu0 %v1065_v35 }
  0x6f   : > { %2181 = vmatprep.subr.bf16.mxu0 %v3247_v38 }
  0x70   : > { %2143 = vmatpush1.bf16.msra.mxu1 %v1071_v42 }
  0x71   : > { %2990 = vmatmul.mubr.msk.bf16.vlgmr.msra.gmra.mrb[48].mxu0 %vm912_vm2, %v3377_v20  ;;  %2222 = vmatprep.subr.bf16.mxu1 %v3256_v45 }
  0x72   : > { %2182 = vmatpush1.bf16.msra.mxu0 %v3245_v41  ;;  %2213 = vmatprep.mubr.bf16.mxu0 %v3295_v11 }
  0x73   : > { %2183 = vmatprep.subr.bf16.mxu0 %v1080_v44  ;;  %2991 = vmatmul.mubr.msk.bf16.vlgmr.msra.gmra.mrb[48].mxu1 %vm912_vm2, %v3377_v20 }
  0x74   : > { %2223 = vmatpush1.bf16.msra.mxu1 %v3254_v48  ;;  %2254 = vmatprep.mubr.bf16.mxu1 %v3295_v11 }
  0x75   : > { %2224 = vmatprep.subr.bf16.mxu1 %v1086_v51 }
  0x76   : > { %2184 = vmatpush1.bf16.msra.mxu0 %v1077_v47 }
  0x77   : > { %2263 = vmatprep.subr.bf16.mxu0 %v3259_v50 }
  0x78   : > { %2225 = vmatpush1.bf16.msra.mxu1 %v1083_v54 }
  0x79   : > { %2992 = vmatmul.mubr.msk.bf16.vlgmr.msra.gmra.mrb[52].mxu0 %vm912_vm2, %v3377_v20  ;;  %2304 = vmatprep.subr.bf16.mxu1 %v3268_v57 }
  0x7a   : > { %2264 = vmatpush1.bf16.msra.mxu0 %v3257_v53  ;;  %2295 = vmatprep.mubr.bf16.mxu0 %v3295_v11 }
  0x7b   : > { %2265 = vmatprep.subr.bf16.mxu0 %v1092_v56  ;;  %2993 = vmatmul.mubr.msk.bf16.vlgmr.msra.gmra.mrb[52].mxu1 %vm912_vm2, %v3377_v20 }
  0x7c   : > { %2305 = vmatpush1.bf16.msra.mxu1 %v3266_v60  ;;  %2336 = vmatprep.mubr.bf16.mxu1 %v3295_v11 }
  0x7d   : > { %2306 = vmatprep.subr.bf16.mxu1 %v1098_v63 }
  0x7e   : > { %2266 = vmatpush1.bf16.msra.mxu0 %v1089_v59 }
  0x7f   : > { %2345 = vmatprep.subr.bf16.mxu0 %v3271_v62 }
  0x80   : > { %2307 = vmatpush1.bf16.msra.mxu1 %v1095_v2 }
  0x81   : > { %2994 = vmatmul.mubr.msk.bf16.vlgmr.msra.gmra.mrb[56].mxu0 %vm912_vm2, %v3377_v20  ;;  %2386 = vmatprep.subr.bf16.mxu1 %v3280_v6 }
  0x82   : > { %2346 = vmatpush1.bf16.msra.mxu0 %v3269_v1  ;;  %2377 = vmatprep.mubr.bf16.mxu0 %v3295_v11 }
  0x83   : > { %2347 = vmatprep.subr.bf16.mxu0 %v1104_v4  ;;  %2995 = vmatmul.mubr.msk.bf16.vlgmr.msra.gmra.mrb[56].mxu1 %vm912_vm2, %v3377_v20 }
  0x84   : > { %2387 = vmatpush1.bf16.msra.mxu1 %v3278_v9  ;;  %2418 = vmatprep.mubr.bf16.mxu1 %v3295_v11 }
  0x85   : > { %2388 = vmatprep.subr.bf16.mxu1 %v1110_v12 }
  0x86   : > { %2348 = vmatpush1.bf16.msra.mxu0 %v1101_v8 }
  0x87   : > { %3070 = vmatprep.subr.bf16.mxu0 %v3296_v16 }
  0x88   : > { %2389 = vmatpush1.bf16.msra.mxu1 %v1107_v14 }
  0x89   : > { %2996 = vmatmul.mubr.msk.bf16.vlgmr.msra.gmra.mrb[60].mxu0 %vm912_vm2, %v3377_v20 }
  0x8a   : > { %3071 = vmatpush3.bf16.msra.mxu0 %v3284_v13  ;;  %3074 = vmatprep.mubr.msk.bf16.mxu0 %vm3297_vm3, %v3296_v16 }
  0x8b   : > { %3072 = vmatprep.subr.bf16.mxu0 %v3296_v16  ;;  %2997 = vmatmul.mubr.msk.bf16.vlgmr.msra.gmra.mrb[60].mxu1 %vm912_vm2, %v3377_v20 }
  0x8e   : > { %3073 = vmatpush3.bf16.msra.mxu0 %v1113_v17 }
  0x91   : > { %3075 = vmatmul.mubr.msk.bf16.vlgmr.msra.gmra.mrb[64].mxu0 %vm912_vm2, %v3377_v20 }
  0x97   : > { %v3894_v18 = vpop.permute.xlu0 %322 }
  0xe4   : > { %v1149_v11 = vpop.f32.mrb[0].mxu0  ;;  %v1190_v20 = vpop.f32.mrb[0].mxu1 }
  0xe5   : > { %v1150_v19 = vadd.f32 %v1149_v11, %v3894_v18  ;;  %v1151_v21 = vpop.f32.mrb[1].mxu0  ;;  %v1191_v25 = vadd.f32 %v1190_v20, %v3894_v18  ;;  %v1192_v26 = vpop.f32.mrb[1].mxu1 }
  0xe6   : > { %v1152_v22 = vadd.f32 %v1151_v21, %v3894_v18  ;;  %v1153_v5 = vpop.f32.mrb[2].mxu0  ;;  %v1193_v27 = vadd.f32 %v1192_v26, %v3894_v18  ;;  %v1194_v28 = vpop.f32.mrb[2].mxu1 }
  0xe7   : > { %v1154_v23 = vpop.f32.mrb[3].mxu0  ;;  %v1195_v29 = vpop.f32.mrb[3].mxu1 }
  0xe8   : > { %v3034_v24 = vpack.c.bf16 %v1152_v22, %v1150_v19  ;;  %v3035_v30 = vpack.c.bf16 %v1193_v27, %v1191_v25 }
  0xea   : > { %2728 = vst [vmem:[%s3902_s8] sm:$0xff] %v3034_v24  ;;  %2729 = vst [vmem:[%s3902_s8 + $0x8] sm:$0xff] %v3035_v30 }
  0xec   : > { %v1231_v31 = vpop.f32.mrb[4].mxu0 }
  0xed   : > { %v1232_v32 = vadd.f32 %v1231_v31, %v3894_v18  ;;  %v1233_v33 = vpop.f32.mrb[5].mxu0 }
  0xee   : > { %v1234_v34 = vadd.f32 %v1233_v33, %v3894_v18  ;;  %v1235_v35 = vpop.f32.mrb[6].mxu0  ;;  %v1272_v38 = vpop.f32.mrb[4].mxu1 }
  0xef   : > { %v1236_v36 = vpop.f32.mrb[7].mxu0  ;;  %v1273_v39 = vadd.f32 %v1272_v38, %v3894_v18  ;;  %v1274_v40 = vpop.f32.mrb[5].mxu1 }
  0xf0   : > { %v3036_v37 = vpack.c.bf16 %v1234_v34, %v1232_v32  ;;  %v1275_v41 = vadd.f32 %v1274_v40, %v3894_v18  ;;  %v1276_v42 = vpop.f32.mrb[6].mxu1 }
  0xf1   : > { %v1277_v43 = vpop.f32.mrb[7].mxu1 }
  0xf2   : > { %2730 = vst [vmem:[%s3902_s8 + $0x10] sm:$0xff] %v3036_v37  ;;  %v3037_v44 = vpack.c.bf16 %v1275_v41, %v1273_v39 }
  0xf4   : > { %v1313_v45 = vpop.f32.mrb[8].mxu0  ;;  %2731 = vst [vmem:[%s3902_s8 + $0x18] sm:$0xff] %v3037_v44 }
  0xf5   : > { %v1314_v46 = vadd.f32 %v1313_v45, %v3894_v18  ;;  %v1315_v47 = vpop.f32.mrb[9].mxu0 }
  0xf6   : > { %v1316_v48 = vadd.f32 %v1315_v47, %v3894_v18  ;;  %v1317_v49 = vpop.f32.mrb[10].mxu0  ;;  %v1354_v52 = vpop.f32.mrb[8].mxu1 }
  0xf7   : > { %v1318_v50 = vpop.f32.mrb[11].mxu0  ;;  %v1355_v53 = vadd.f32 %v1354_v52, %v3894_v18  ;;  %v1356_v54 = vpop.f32.mrb[9].mxu1 }
  0xf8   : > { %v3038_v51 = vpack.c.bf16 %v1316_v48, %v1314_v46  ;;  %v1357_v55 = vadd.f32 %v1356_v54, %v3894_v18  ;;  %v1358_v56 = vpop.f32.mrb[10].mxu1 }
  0xf9   : > { %v1359_v57 = vpop.f32.mrb[11].mxu1 }
  0xfa   : > { %2732 = vst [vmem:[%s3902_s8 + $0x20] sm:$0xff] %v3038_v51  ;;  %v3039_v58 = vpack.c.bf16 %v1357_v55, %v1355_v53 }
  0xfc   : > { %v1395_v59 = vpop.f32.mrb[12].mxu0  ;;  %2733 = vst [vmem:[%s3902_s8 + $0x28] sm:$0xff] %v3039_v58 }
  0xfd   : > { %v1396_v60 = vadd.f32 %v1395_v59, %v3894_v18  ;;  %v1397_v61 = vpop.f32.mrb[13].mxu0 }
  0xfe   : > { %v1398_v62 = vadd.f32 %v1397_v61, %v3894_v18  ;;  %v1399_v63 = vpop.f32.mrb[14].mxu0  ;;  %v1436_v2 = vpop.f32.mrb[12].mxu1 }
  0xff   : > { %v1400_v0 = vpop.f32.mrb[15].mxu0  ;;  %v1437_v3 = vadd.f32 %v1436_v2, %v3894_v18  ;;  %v1438_v4 = vpop.f32.mrb[13].mxu1 }
 0x100   : > { %v3040_v1 = vpack.c.bf16 %v1398_v62, %v1396_v60  ;;  %v1439_v6 = vadd.f32 %v1438_v4, %v3894_v18  ;;  %v1440_v7 = vpop.f32.mrb[14].mxu1 }
 0x101   : > { %v1441_v8 = vpop.f32.mrb[15].mxu1 }
 0x102   : > { %2734 = vst [vmem:[%s3902_s8 + $0x30] sm:$0xff] %v3040_v1  ;;  %v3041_v9 = vpack.c.bf16 %v1439_v6, %v1437_v3 }
 0x104   : > { %v1477_v10 = vpop.f32.mrb[16].mxu0  ;;  %2735 = vst [vmem:[%s3902_s8 + $0x38] sm:$0xff] %v3041_v9 }
 0x105   : > { %v1478_v12 = vadd.f32 %v1477_v10, %v3894_v18  ;;  %v1479_v13 = vpop.f32.mrb[17].mxu0 }
 0x106   : > { %v1480_v14 = vadd.f32 %v1479_v13, %v3894_v18  ;;  %v1481_v15 = vpop.f32.mrb[18].mxu0  ;;  %v1518_v11 = vpop.f32.mrb[16].mxu1 }
 0x107   : > { %v1482_v16 = vpop.f32.mrb[19].mxu0  ;;  %v1519_v19 = vadd.f32 %v1518_v11, %v3894_v18  ;;  %v1520_v21 = vpop.f32.mrb[17].mxu1 }
 0x108   : > { %v3042_v17 = vpack.c.bf16 %v1480_v14, %v1478_v12  ;;  %v1521_v22 = vadd.f32 %v1520_v21, %v3894_v18  ;;  %v1522_v5 = vpop.f32.mrb[18].mxu1 }
 0x109   : > { %v1523_v23 = vpop.f32.mrb[19].mxu1 }
 0x10a   : > { %2736 = vst [vmem:[%s3902_s8 + $0x40] sm:$0xff] %v3042_v17  ;;  %v3043_v24 = vpack.c.bf16 %v1521_v22, %v1519_v19 }
 0x10c   : > { %v1559_v20 = vpop.f32.mrb[20].mxu0  ;;  %2737 = vst [vmem:[%s3902_s8 + $0x48] sm:$0xff] %v3043_v24 }
 0x10d   : > { %v1560_v25 = vadd.f32 %v1559_v20, %v3894_v18  ;;  %v1561_v26 = vpop.f32.mrb[21].mxu0 }
 0x10e   : > { %v1562_v27 = vadd.f32 %v1561_v26, %v3894_v18  ;;  %v1563_v28 = vpop.f32.mrb[22].mxu0  ;;  %v1600_v31 = vpop.f32.mrb[20].mxu1 }
 0x10f   : > { %v1564_v29 = vpop.f32.mrb[23].mxu0  ;;  %v1601_v32 = vadd.f32 %v1600_v31, %v3894_v18  ;;  %v1602_v33 = vpop.f32.mrb[21].mxu1 }
 0x110   : > { %v3044_v30 = vpack.c.bf16 %v1562_v27, %v1560_v25  ;;  %v1603_v34 = vadd.f32 %v1602_v33, %v3894_v18  ;;  %v1604_v35 = vpop.f32.mrb[22].mxu1 }
 0x111   : > { %v1605_v36 = vpop.f32.mrb[23].mxu1 }
 0x112   : > { %2738 = vst [vmem:[%s3902_s8 + $0x50] sm:$0xff] %v3044_v30  ;;  %v3045_v37 = vpack.c.bf16 %v1603_v34, %v1601_v32 }
 0x114   : > { %v1641_v38 = vpop.f32.mrb[24].mxu0  ;;  %2739 = vst [vmem:[%s3902_s8 + $0x58] sm:$0xff] %v3045_v37 }
 0x115   : > { %v1642_v39 = vadd.f32 %v1641_v38, %v3894_v18  ;;  %v1643_v40 = vpop.f32.mrb[25].mxu0 }
 0x116   : > { %v1644_v41 = vadd.f32 %v1643_v40, %v3894_v18  ;;  %v1645_v42 = vpop.f32.mrb[26].mxu0  ;;  %v1682_v45 = vpop.f32.mrb[24].mxu1 }
 0x117   : > { %v1646_v43 = vpop.f32.mrb[27].mxu0  ;;  %v1683_v46 = vadd.f32 %v1682_v45, %v3894_v18  ;;  %v1684_v47 = vpop.f32.mrb[25].mxu1 }
 0x118   : > { %v3046_v44 = vpack.c.bf16 %v1644_v41, %v1642_v39  ;;  %v1685_v48 = vadd.f32 %v1684_v47, %v3894_v18  ;;  %v1686_v49 = vpop.f32.mrb[26].mxu1 }
 0x119   : > { %v1687_v50 = vpop.f32.mrb[27].mxu1 }
 0x11a   : > { %2740 = vst [vmem:[%s3902_s8 + $0x60] sm:$0xff] %v3046_v44  ;;  %v3047_v51 = vpack.c.bf16 %v1685_v48, %v1683_v46 }
 0x11c   : > { %v1723_v52 = vpop.f32.mrb[28].mxu0  ;;  %2741 = vst [vmem:[%s3902_s8 + $0x68] sm:$0xff] %v3047_v51 }
 0x11d   : > { %v1724_v53 = vadd.f32 %v1723_v52, %v3894_v18  ;;  %v1725_v54 = vpop.f32.mrb[29].mxu0 }
 0x11e   : > { %v1726_v55 = vadd.f32 %v1725_v54, %v3894_v18  ;;  %v1727_v56 = vpop.f32.mrb[30].mxu0  ;;  %v1764_v59 = vpop.f32.mrb[28].mxu1 }
 0x11f   : > { %v1728_v57 = vpop.f32.mrb[31].mxu0  ;;  %v1765_v60 = vadd.f32 %v1764_v59, %v3894_v18  ;;  %v1766_v61 = vpop.f32.mrb[29].mxu1 }
 0x120   : > { %v3048_v58 = vpack.c.bf16 %v1726_v55, %v1724_v53  ;;  %v1767_v62 = vadd.f32 %v1766_v61, %v3894_v18  ;;  %v1768_v63 = vpop.f32.mrb[30].mxu1 }
 0x121   : > { %v1769_v0 = vpop.f32.mrb[31].mxu1 }
 0x122   : > { %2742 = vst [vmem:[%s3902_s8 + $0x70] sm:$0xff] %v3048_v58  ;;  %v3049_v1 = vpack.c.bf16 %v1767_v62, %v1765_v60 }
 0x124   : > { %v1805_v2 = vpop.f32.mrb[32].mxu0  ;;  %2743 = vst [vmem:[%s3902_s8 + $0x78] sm:$0xff] %v3049_v1 }
 0x125   : > { %v1806_v3 = vadd.f32 %v1805_v2, %v3894_v18  ;;  %v1807_v4 = vpop.f32.mrb[33].mxu0 }
 0x126   : > { %v1808_v6 = vadd.f32 %v1807_v4, %v3894_v18  ;;  %v1809_v7 = vpop.f32.mrb[34].mxu0  ;;  %v1846_v10 = vpop.f32.mrb[32].mxu1 }
 0x127   : > { %v1810_v8 = vpop.f32.mrb[35].mxu0  ;;  %v1847_v12 = vadd.f32 %v1846_v10, %v3894_v18  ;;  %v1848_v13 = vpop.f32.mrb[33].mxu1 }
 0x128   : > { %v3050_v9 = vpack.c.bf16 %v1808_v6, %v1806_v3  ;;  %v1849_v14 = vadd.f32 %v1848_v13, %v3894_v18  ;;  %v1850_v15 = vpop.f32.mrb[34].mxu1 }
 0x129   : > { %v1851_v16 = vpop.f32.mrb[35].mxu1 }
 0x12a   : > { %2744 = vst [vmem:[%s3902_s8 + $0x80] sm:$0xff] %v3050_v9  ;;  %v3051_v17 = vpack.c.bf16 %v1849_v14, %v1847_v12 }
 0x12c   : > { %v1887_v11 = vpop.f32.mrb[36].mxu0  ;;  %2745 = vst [vmem:[%s3902_s8 + $0x88] sm:$0xff] %v3051_v17 }
 0x12d   : > { %v1888_v19 = vadd.f32 %v1887_v11, %v3894_v18  ;;  %v1889_v21 = vpop.f32.mrb[37].mxu0 }
 0x12e   : > { %v1890_v22 = vadd.f32 %v1889_v21, %v3894_v18  ;;  %v1891_v5 = vpop.f32.mrb[38].mxu0  ;;  %v1928_v20 = vpop.f32.mrb[36].mxu1 }
 0x12f   : > { %v1892_v23 = vpop.f32.mrb[39].mxu0  ;;  %v1929_v25 = vadd.f32 %v1928_v20, %v3894_v18  ;;  %v1930_v26 = vpop.f32.mrb[37].mxu1 }
 0x130   : > { %v3052_v24 = vpack.c.bf16 %v1890_v22, %v1888_v19  ;;  %v1931_v27 = vadd.f32 %v1930_v26, %v3894_v18  ;;  %v1932_v28 = vpop.f32.mrb[38].mxu1 }
 0x131   : > { %v1933_v29 = vpop.f32.mrb[39].mxu1 }
 0x132   : > { %2746 = vst [vmem:[%s3902_s8 + $0x90] sm:$0xff] %v3052_v24  ;;  %v3053_v30 = vpack.c.bf16 %v1931_v27, %v1929_v25 }
 0x134   : > { %v1969_v31 = vpop.f32.mrb[40].mxu0  ;;  %2747 = vst [vmem:[%s3902_s8 + $0x98] sm:$0xff] %v3053_v30 }
 0x135   : > { %v1970_v32 = vadd.f32 %v1969_v31, %v3894_v18  ;;  %v1971_v33 = vpop.f32.mrb[41].mxu0 }
 0x136   : > { %v1972_v34 = vadd.f32 %v1971_v33, %v3894_v18  ;;  %v1973_v35 = vpop.f32.mrb[42].mxu0  ;;  %v2010_v38 = vpop.f32.mrb[40].mxu1 }
 0x137   : > { %v1974_v36 = vpop.f32.mrb[43].mxu0  ;;  %v2011_v39 = vadd.f32 %v2010_v38, %v3894_v18  ;;  %v2012_v40 = vpop.f32.mrb[41].mxu1 }
 0x138   : > { %v3054_v37 = vpack.c.bf16 %v1972_v34, %v1970_v32  ;;  %v2013_v41 = vadd.f32 %v2012_v40, %v3894_v18  ;;  %v2014_v42 = vpop.f32.mrb[42].mxu1 }
 0x139   : > { %v2015_v43 = vpop.f32.mrb[43].mxu1 }
 0x13a   : > { %2748 = vst [vmem:[%s3902_s8 + $0xa0] sm:$0xff] %v3054_v37  ;;  %v3055_v44 = vpack.c.bf16 %v2013_v41, %v2011_v39 }
 0x13c   : > { %v2051_v45 = vpop.f32.mrb[44].mxu0  ;;  %2749 = vst [vmem:[%s3902_s8 + $0xa8] sm:$0xff] %v3055_v44 }
 0x13d   : > { %v2052_v46 = vadd.f32 %v2051_v45, %v3894_v18  ;;  %v2053_v47 = vpop.f32.mrb[45].mxu0 }
 0x13e   : > { %v2054_v48 = vadd.f32 %v2053_v47, %v3894_v18  ;;  %v2055_v49 = vpop.f32.mrb[46].mxu0  ;;  %v2092_v52 = vpop.f32.mrb[44].mxu1 }
 0x13f   : > { %v2056_v50 = vpop.f32.mrb[47].mxu0  ;;  %v2093_v53 = vadd.f32 %v2092_v52, %v3894_v18  ;;  %v2094_v54 = vpop.f32.mrb[45].mxu1 }
 0x140   : > { %v3056_v51 = vpack.c.bf16 %v2054_v48, %v2052_v46  ;;  %v2095_v55 = vadd.f32 %v2094_v54, %v3894_v18  ;;  %v2096_v56 = vpop.f32.mrb[46].mxu1 }
 0x141   : > { %v2097_v57 = vpop.f32.mrb[47].mxu1 }
 0x142   : > { %2750 = vst [vmem:[%s3902_s8 + $0xb0] sm:$0xff] %v3056_v51  ;;  %v3057_v58 = vpack.c.bf16 %v2095_v55, %v2093_v53 }
 0x144   : > { %v2133_v59 = vpop.f32.mrb[48].mxu0  ;;  %2751 = vst [vmem:[%s3902_s8 + $0xb8] sm:$0xff] %v3057_v58 }
 0x145   : > { %v2134_v60 = vadd.f32 %v2133_v59, %v3894_v18  ;;  %v2135_v61 = vpop.f32.mrb[49].mxu0 }
 0x146   : > { %v2136_v62 = vadd.f32 %v2135_v61, %v3894_v18  ;;  %v2137_v63 = vpop.f32.mrb[50].mxu0  ;;  %v2174_v2 = vpop.f32.mrb[48].mxu1 }
 0x147   : > { %v2138_v0 = vpop.f32.mrb[51].mxu0  ;;  %v2175_v3 = vadd.f32 %v2174_v2, %v3894_v18  ;;  %v2176_v4 = vpop.f32.mrb[49].mxu1 }
 0x148   : > { %v3058_v1 = vpack.c.bf16 %v2136_v62, %v2134_v60  ;;  %v2177_v6 = vadd.f32 %v2176_v4, %v3894_v18  ;;  %v2178_v7 = vpop.f32.mrb[50].mxu1 }
 0x149   : > { %v2179_v8 = vpop.f32.mrb[51].mxu1 }
 0x14a   : > { %2752 = vst [vmem:[%s3902_s8 + $0xc0] sm:$0xff] %v3058_v1  ;;  %v3059_v9 = vpack.c.bf16 %v2177_v6, %v2175_v3 }
 0x14c   : > { %v2215_v10 = vpop.f32.mrb[52].mxu0  ;;  %2753 = vst [vmem:[%s3902_s8 + $0xc8] sm:$0xff] %v3059_v9 }
 0x14d   : > { %v2216_v12 = vadd.f32 %v2215_v10, %v3894_v18  ;;  %v2217_v13 = vpop.f32.mrb[53].mxu0 }
 0x14e   : > { %v2218_v14 = vadd.f32 %v2217_v13, %v3894_v18  ;;  %v2219_v15 = vpop.f32.mrb[54].mxu0  ;;  %v2256_v11 = vpop.f32.mrb[52].mxu1 }
 0x14f   : > { %v2220_v16 = vpop.f32.mrb[55].mxu0  ;;  %v2257_v19 = vadd.f32 %v2256_v11, %v3894_v18  ;;  %v2258_v21 = vpop.f32.mrb[53].mxu1 }
 0x150   : > { %v3060_v17 = vpack.c.bf16 %v2218_v14, %v2216_v12  ;;  %v2259_v22 = vadd.f32 %v2258_v21, %v3894_v18  ;;  %v2260_v5 = vpop.f32.mrb[54].mxu1 }
 0x151   : > { %v2261_v23 = vpop.f32.mrb[55].mxu1 }
 0x152   : > { %2754 = vst [vmem:[%s3902_s8 + $0xd0] sm:$0xff] %v3060_v17  ;;  %v3061_v24 = vpack.c.bf16 %v2259_v22, %v2257_v19 }
 0x154   : > { %v2297_v20 = vpop.f32.mrb[56].mxu0  ;;  %2755 = vst [vmem:[%s3902_s8 + $0xd8] sm:$0xff] %v3061_v24 }
 0x155   : > { %v2298_v25 = vadd.f32 %v2297_v20, %v3894_v18  ;;  %v2299_v26 = vpop.f32.mrb[57].mxu0 }
 0x156   : > { %v2300_v27 = vadd.f32 %v2299_v26, %v3894_v18  ;;  %v2301_v28 = vpop.f32.mrb[58].mxu0  ;;  %v2338_v31 = vpop.f32.mrb[56].mxu1 }
 0x157   : > { %v2302_v29 = vpop.f32.mrb[59].mxu0  ;;  %v2339_v32 = vadd.f32 %v2338_v31, %v3894_v18  ;;  %v2340_v33 = vpop.f32.mrb[57].mxu1 }
 0x158   : > { %v3062_v30 = vpack.c.bf16 %v2300_v27, %v2298_v25  ;;  %v2341_v34 = vadd.f32 %v2340_v33, %v3894_v18  ;;  %v2342_v35 = vpop.f32.mrb[58].mxu1 }
 0x159   : > { %v2343_v36 = vpop.f32.mrb[59].mxu1 }
 0x15a   : > { %2756 = vst [vmem:[%s3902_s8 + $0xe0] sm:$0xff] %v3062_v30  ;;  %v3063_v37 = vpack.c.bf16 %v2341_v34, %v2339_v32 }
 0x15c   : > { %v2379_v38 = vpop.f32.mrb[60].mxu0  ;;  %2757 = vst [vmem:[%s3902_s8 + $0xe8] sm:$0xff] %v3063_v37 }
 0x15d   : > { %v2380_v39 = vadd.f32 %v2379_v38, %v3894_v18  ;;  %v2381_v40 = vpop.f32.mrb[61].mxu0 }
 0x15e   : > { %v2382_v41 = vadd.f32 %v2381_v40, %v3894_v18  ;;  %v2383_v42 = vpop.f32.mrb[62].mxu0  ;;  %v2420_v45 = vpop.f32.mrb[60].mxu1 }
 0x15f   : > { %v2384_v43 = vpop.f32.mrb[63].mxu0  ;;  %v2421_v46 = vadd.f32 %v2420_v45, %v3894_v18  ;;  %v2422_v47 = vpop.f32.mrb[61].mxu1 }
 0x160   : > { %v3064_v44 = vpack.c.bf16 %v2382_v41, %v2380_v39  ;;  %v2423_v48 = vadd.f32 %v2422_v47, %v3894_v18  ;;  %v2424_v49 = vpop.f32.mrb[62].mxu1 }
 0x161   : > { %v2425_v50 = vpop.f32.mrb[63].mxu1 }
 0x162   : > { %2758 = vst [vmem:[%s3902_s8 + $0xf0] sm:$0xff] %v3064_v44  ;;  %v3065_v51 = vpack.c.bf16 %v2423_v48, %v2421_v46 }
 0x164   : > { %v2461_v52 = vpop.f32.mrb[64].mxu0  ;;  %2759 = vst [vmem:[%s3902_s8 + $0xf8] sm:$0xff] %v3065_v51 }
 0x165   : > { %v2462_v53 = vadd.f32 %v2461_v52, %v3894_v18  ;;  %v3076_v54 = vpop.f32.mrb[65].mxu0 }
 0x166   : > { %v2464_v55 = vpop.f32.mrb[66].mxu0 }
 0x167   : > { %v3066_v56 = vpack.c.bf16 %v2462_v53, %v2462_v53  ;;  %v3077_v57 = vpop.f32.mrb[67].mxu0 }
 0x169   : > { %2760 = vst [vmem:[%s3902_s8 + $0x100] sm:$0xf] %v3066_v56 }
 0x16a PF: > { %s13_s12 = sadd.s32 1, %s3292_s12  }
 0x16b   : > { %p10_p4 = scmp.ge.s32.totalorder %s13_s12, 4  }
 0x16d   :  { %12 = sbr.rel (!%p10_p4) target bundleno = 1 (0x1), region = 65 }

// kernel: convnet_model5_forward.6
= control target key start
LH: loop header
LB: loop body
LE: loop exit
PB: predicated region body
PF: predicated region fallthrough
CT: control target
= control target key end

     0   :  { %v186_v27 = vmov 0   ;;  %vm170_vm0 = vcmask 257024   ;;  %s502_s0 = inlined_call_operand.vmem [shape: bf16[16,2080], index: 0, kind: input, shape index: {}]   ;;  %s503_s1 = inlined_call_operand.vmem [shape: bf16[16,2080], index: 1, kind: input, shape index: {}]   ;;  %s504_s2 = inlined_call_operand.vmem [shape: bf16[16,2080], index: 2, kind: input, shape index: {}]   ;;  %s505_s3 = inlined_call_operand.vmem [shape: bf16[16,2080], index: 3, kind: input, shape index: {}]   ;;  %s506_s4 = inlined_call_operand.vmem [shape: bf16[16,2080], index: 4, kind: output, shape index: {}]  }
   0x1   :  { %v18_v0 = vld [vmem:[%s502_s0] sm:$0xff]  ;;  %v19_v5 = vld [vmem:[%s502_s0 + $0x8] sm:$0xff]  ;;  %v20_v11 = vld [vmem:[%s502_s0 + $0x10] sm:$0xff] }
   0x2   :  { %v36_v1 = vld [vmem:[%s503_s1] sm:$0xff]  ;;  %v37_v6 = vld [vmem:[%s503_s1 + $0x8] sm:$0xff]  ;;  %v38_v13 = vld [vmem:[%s503_s1 + $0x10] sm:$0xff] }
   0x3   :  { %v72_v2 = vld [vmem:[%s504_s2] sm:$0xff]  ;;  %v54_v3 = vmax.bf16 %v36_v1, %v18_v0  ;;  %v55_v8 = vmax.bf16 %v37_v6, %v19_v5  ;;  %v73_v9 = vld [vmem:[%s504_s2 + $0x8] sm:$0xff]  ;;  %v74_v14 = vld [vmem:[%s504_s2 + $0x10] sm:$0xff]  ;;  %v56_v17 = vmax.bf16 %v38_v13, %v20_v11 }
   0x4   :  { %v90_v4 = vld [vmem:[%s505_s3] sm:$0xff]  ;;  %v91_v10 = vld [vmem:[%s505_s3 + $0x8] sm:$0xff]  ;;  %v92_v15 = vld [vmem:[%s505_s3 + $0x10] sm:$0xff] }
   0x5   :  { %v108_v7 = vmax.bf16 %v90_v4, %v72_v2  ;;  %v109_v12 = vmax.bf16 %v91_v10, %v73_v9  ;;  %v110_v18 = vmax.bf16 %v92_v15, %v74_v14  ;;  %v21_v19 = vld [vmem:[%s502_s0 + $0x18] sm:$0xff]  ;;  %v22_v25 = vld [vmem:[%s502_s0 + $0x20] sm:$0xff]  ;;  %v23_v34 = vld [vmem:[%s502_s0 + $0x28] sm:$0xff] }
   0x6   :  { %v39_v20 = vld [vmem:[%s503_s1 + $0x18] sm:$0xff]  ;;  %v40_v26 = vld [vmem:[%s503_s1 + $0x20] sm:$0xff]  ;;  %v41_v37 = vld [vmem:[%s503_s1 + $0x28] sm:$0xff] }
   0x7   :  { %v126_v16 = vmax.bf16 %v108_v7, %v54_v3  ;;  %v75_v21 = vld [vmem:[%s504_s2 + $0x18] sm:$0xff]  ;;  %v127_v22 = vmax.bf16 %v109_v12, %v55_v8  ;;  %v57_v23 = vmax.bf16 %v39_v20, %v21_v19  ;;  %v128_v29 = vmax.bf16 %v110_v18, %v56_v17  ;;  %v76_v32 = vld [vmem:[%s504_s2 + $0x20] sm:$0xff]  ;;  %v77_v38 = vld [vmem:[%s504_s2 + $0x28] sm:$0xff] }
   0x8   :  { %v93_v24 = vld [vmem:[%s505_s3 + $0x18] sm:$0xff]  ;;  %v58_v31 = vmax.bf16 %v40_v26, %v22_v25  ;;  %v94_v33 = vld [vmem:[%s505_s3 + $0x20] sm:$0xff]  ;;  %v95_v39 = vld [vmem:[%s505_s3 + $0x28] sm:$0xff]  ;;  %v59_v42 = vmax.bf16 %v41_v37, %v23_v34 }
   0x9   :  { %v144_v28 = vmax.bf16 %v186_v27, %v126_v16  ;;  %v111_v30 = vmax.bf16 %v93_v24, %v75_v21  ;;  %v145_v35 = vmax.bf16 %v186_v27, %v127_v22  ;;  %v112_v36 = vmax.bf16 %v94_v33, %v76_v32  ;;  %v24_v44 = vld [vmem:[%s502_s0 + $0x30] sm:$0xff]  ;;  %v25_v50 = vld [vmem:[%s502_s0 + $0x38] sm:$0xff]  ;;  %v26_v58 = vld [vmem:[%s502_s0 + $0x40] sm:$0xf] }
   0xa   :  { %v146_v40 = vmax.bf16 %v186_v27, %v128_v29  ;;  %v113_v43 = vmax.bf16 %v95_v39, %v77_v38  ;;  %v42_v45 = vld [vmem:[%s503_s1 + $0x30] sm:$0xff]  ;;  %v43_v51 = vld [vmem:[%s503_s1 + $0x38] sm:$0xff]  ;;  %v44_v61 = vld [vmem:[%s503_s1 + $0x40] sm:$0xf] }
   0xb   :  { %162 = vst [vmem:[%s506_s4] sm:$0xff] %v144_v28  ;;  %v129_v41 = vmax.bf16 %v111_v30, %v57_v23  ;;  %v78_v46 = vld [vmem:[%s504_s2 + $0x30] sm:$0xff]  ;;  %163 = vst [vmem:[%s506_s4 + $0x8] sm:$0xff] %v145_v35  ;;  %v130_v47 = vmax.bf16 %v112_v36, %v58_v31  ;;  %v60_v48 = vmax.bf16 %v42_v45, %v24_v44  ;;  %v79_v56 = vld [vmem:[%s504_s2 + $0x38] sm:$0xff] }
   0xc   :  { %v96_v49 = vld [vmem:[%s505_s3 + $0x30] sm:$0xff]  ;;  %164 = vst [vmem:[%s506_s4 + $0x10] sm:$0xff] %v146_v40  ;;  %v131_v53 = vmax.bf16 %v113_v43, %v59_v42  ;;  %v61_v55 = vmax.bf16 %v43_v51, %v25_v50  ;;  %v97_v57 = vld [vmem:[%s505_s3 + $0x38] sm:$0xff]  ;;  %v80_v62 = vld [vmem:[%s504_s2 + $0x40] sm:$0xf]  ;;  %v62_v2 = vmax.bf16 %v44_v61, %v26_v58 }
   0xd   :  { %v147_v52 = vmax.bf16 %v186_v27, %v129_v41  ;;  %v114_v54 = vmax.bf16 %v96_v49, %v78_v46  ;;  %v148_v59 = vmax.bf16 %v186_v27, %v130_v47  ;;  %v115_v60 = vmax.bf16 %v97_v57, %v79_v56  ;;  %v98_v63 = vld [vmem:[%s505_s3 + $0x40] sm:$0xf]  ;;  %v27_v4 = vld [vmem:[%s502_s0 + $0x44] sm:$0xff]  ;;  %v28_v10 = vld [vmem:[%s502_s0 + $0x4c] sm:$0xff] }
   0xe   :  { %v149_v0 = vmax.bf16 %v186_v27, %v131_v53  ;;  %v116_v3 = vmax.bf16 %v98_v63, %v80_v62  ;;  %v45_v5 = vld [vmem:[%s503_s1 + $0x44] sm:$0xff]  ;;  %v46_v11 = vld [vmem:[%s503_s1 + $0x4c] sm:$0xff]  ;;  %v29_v18 = vld [vmem:[%s502_s0 + $0x54] sm:$0xff] }
   0xf   :  { %165 = vst [vmem:[%s506_s4 + $0x18] sm:$0xff] %v147_v52  ;;  %v132_v1 = vmax.bf16 %v114_v54, %v60_v48  ;;  %v81_v6 = vld [vmem:[%s504_s2 + $0x44] sm:$0xff]  ;;  %166 = vst [vmem:[%s506_s4 + $0x20] sm:$0xff] %v148_v59  ;;  %v133_v7 = vmax.bf16 %v115_v60, %v61_v55  ;;  %v63_v8 = vmax.bf16 %v45_v5, %v27_v4  ;;  %v82_v16 = vld [vmem:[%s504_s2 + $0x4c] sm:$0xff] }
  0x10   :  { %v99_v9 = vld [vmem:[%s505_s3 + $0x44] sm:$0xff]  ;;  %167 = vst [vmem:[%s506_s4 + $0x28] sm:$0xff] %v149_v0  ;;  %v134_v13 = vmax.bf16 %v116_v3, %v62_v2  ;;  %v64_v15 = vmax.bf16 %v46_v11, %v28_v10  ;;  %v100_v17 = vld [vmem:[%s505_s3 + $0x4c] sm:$0xff]  ;;  %v47_v21 = vld [vmem:[%s503_s1 + $0x54] sm:$0xff] }
  0x11   :  { %v150_v12 = vmax.bf16 %v186_v27, %v132_v1  ;;  %v117_v14 = vmax.bf16 %v99_v9, %v81_v6  ;;  %v151_v19 = vmax.bf16 %v186_v27, %v133_v7  ;;  %v118_v20 = vmax.bf16 %v100_v17, %v82_v16  ;;  %v83_v22 = vld [vmem:[%s504_s2 + $0x54] sm:$0xff]  ;;  %v30_v29 = vld [vmem:[%s502_s0 + $0x5c] sm:$0xff]  ;;  %v31_v35 = vld [vmem:[%s502_s0 + $0x64] sm:$0xff] }
  0x12   :  { %v101_v23 = vld [vmem:[%s505_s3 + $0x54] sm:$0xff]  ;;  %v152_v24 = vmax.bf16 %v186_v27, %v134_v13  ;;  %v65_v26 = vmax.bf16 %v47_v21, %v29_v18  ;;  %v48_v30 = vld [vmem:[%s503_s1 + $0x5c] sm:$0xff]  ;;  %v49_v36 = vld [vmem:[%s503_s1 + $0x64] sm:$0xff] }
  0x13   :  { %168 = vst [vmem:[%s506_s4 + $0x30] sm:$0xff] %v150_v12  ;;  %v135_v25 = vmax.bf16 %v117_v14, %v63_v8  ;;  %v119_v28 = vmax.bf16 %v101_v23, %v83_v22  ;;  %v84_v31 = vld [vmem:[%s504_s2 + $0x5c] sm:$0xff]  ;;  %169 = vst [vmem:[%s506_s4 + $0x38] sm:$0xff] %v151_v19  ;;  %v136_v32 = vmax.bf16 %v118_v20, %v64_v15  ;;  %v85_v41 = vld [vmem:[%s504_s2 + $0x64] sm:$0xff] }
  0x14   :  { %v66_v33 = vmax.bf16 %v48_v30, %v30_v29  ;;  %v102_v34 = vld [vmem:[%s505_s3 + $0x5c] sm:$0xff]  ;;  %171 = vst.msk [vmem:[%s506_s4 + $0x40] sm:$0xf] %vm170_vm0, %v152_v24  ;;  %v67_v40 = vmax.bf16 %v49_v36, %v31_v35  ;;  %v103_v42 = vld [vmem:[%s505_s3 + $0x64] sm:$0xff]  ;;  %v32_v43 = vld [vmem:[%s502_s0 + $0x6c] sm:$0xff] }
  0x15   :  { %v153_v37 = vmax.bf16 %v186_v27, %v135_v25  ;;  %v137_v38 = vmax.bf16 %v119_v28, %v65_v26  ;;  %v120_v39 = vmax.bf16 %v102_v34, %v84_v31  ;;  %v154_v44 = vmax.bf16 %v186_v27, %v136_v32  ;;  %v50_v46 = vld [vmem:[%s503_s1 + $0x6c] sm:$0xff]  ;;  %v33_v53 = vld [vmem:[%s502_s0 + $0x74] sm:$0xff]  ;;  %v34_v59 = vld [vmem:[%s502_s0 + $0x7c] sm:$0xff] }
  0x16   :  { %v121_v45 = vmax.bf16 %v103_v42, %v85_v41  ;;  %v86_v47 = vld [vmem:[%s504_s2 + $0x6c] sm:$0xff]  ;;  %v68_v51 = vmax.bf16 %v50_v46, %v32_v43  ;;  %v51_v54 = vld [vmem:[%s503_s1 + $0x74] sm:$0xff]  ;;  %v52_v60 = vld [vmem:[%s503_s1 + $0x7c] sm:$0xff] }
  0x17   :  { %v104_v48 = vld [vmem:[%s505_s3 + $0x6c] sm:$0xff]  ;;  %172 = vst [vmem:[%s506_s4 + $0x44] sm:$0xff] %v153_v37  ;;  %v155_v49 = vmax.bf16 %v186_v27, %v137_v38  ;;  %v138_v50 = vmax.bf16 %v120_v39, %v66_v33  ;;  %v87_v55 = vld [vmem:[%s504_s2 + $0x74] sm:$0xff]  ;;  %173 = vst [vmem:[%s506_s4 + $0x4c] sm:$0xff] %v154_v44  ;;  %v69_v57 = vmax.bf16 %v51_v54, %v33_v53 }
  0x18   :  { %v122_v52 = vmax.bf16 %v104_v48, %v86_v47  ;;  %v139_v56 = vmax.bf16 %v121_v45, %v67_v40  ;;  %v105_v58 = vld [vmem:[%s505_s3 + $0x74] sm:$0xff]  ;;  %v70_v0 = vmax.bf16 %v52_v60, %v34_v59  ;;  %v88_v1 = vld [vmem:[%s504_s2 + $0x7c] sm:$0xff]  ;;  %v35_v3 = vld [vmem:[%s502_s0 + $0x84] sm:$0xf] }
  0x19   :  { %174 = vst [vmem:[%s506_s4 + $0x54] sm:$0xff] %v155_v49  ;;  %v156_v61 = vmax.bf16 %v186_v27, %v138_v50  ;;  %v123_v63 = vmax.bf16 %v105_v58, %v87_v55  ;;  %v106_v2 = vld [vmem:[%s505_s3 + $0x7c] sm:$0xff]  ;;  %v53_v6 = vld [vmem:[%s503_s1 + $0x84] sm:$0xf] }
  0x1a   :  { %v140_v62 = vmax.bf16 %v122_v52, %v68_v51  ;;  %v157_v4 = vmax.bf16 %v186_v27, %v139_v56  ;;  %v124_v5 = vmax.bf16 %v106_v2, %v88_v1  ;;  %v89_v7 = vld [vmem:[%s504_s2 + $0x84] sm:$0xf]  ;;  %v71_v11 = vmax.bf16 %v53_v6, %v35_v3 }
  0x1b   :  { %v107_v8 = vld [vmem:[%s505_s3 + $0x84] sm:$0xf]  ;;  %175 = vst [vmem:[%s506_s4 + $0x5c] sm:$0xff] %v156_v61  ;;  %v141_v10 = vmax.bf16 %v123_v63, %v69_v57 }
  0x1c   :  { %v158_v9 = vmax.bf16 %v186_v27, %v140_v62  ;;  %v125_v12 = vmax.bf16 %v107_v8, %v89_v7  ;;  %176 = vst [vmem:[%s506_s4 + $0x64] sm:$0xff] %v157_v4  ;;  %v142_v13 = vmax.bf16 %v124_v5, %v70_v0 }
  0x1d   :  { %v159_v14 = vmax.bf16 %v186_v27, %v141_v10 }
  0x1e   :  { %177 = vst [vmem:[%s506_s4 + $0x6c] sm:$0xff] %v158_v9  ;;  %v143_v15 = vmax.bf16 %v125_v12, %v71_v11  ;;  %v160_v16 = vmax.bf16 %v186_v27, %v142_v13 }
  0x1f   :  { %178 = vst [vmem:[%s506_s4 + $0x74] sm:$0xff] %v159_v14 }
  0x20   :  { %v161_v17 = vmax.bf16 %v186_v27, %v143_v15  ;;  %179 = vst [vmem:[%s506_s4 + $0x7c] sm:$0xff] %v160_v16 }
  0x22   :  { %180 = vst.msk [vmem:[%s506_s4 + $0x84] sm:$0xf] %vm170_vm0, %v161_v17 }

// kernel: convnet_model5_forward.7
= control target key start
LH: loop header
LB: loop body
LE: loop exit
PB: predicated region body
PF: predicated region fallthrough
CT: control target
= control target key end

     0   :  { %s2226_s12 = smov 0   ;;  %s2816_s0 = inlined_call_operand.vmem [shape: bf16[32,144], index: 0, kind: input, shape index: {}]   ;;  %s2817_s1 = inlined_call_operand.vmem [shape: bf16[144,2080], index: 1, kind: input, shape index: {}]   ;;  %s2818_s2 = inlined_call_operand.vmem [shape: f32[32,1], index: 2, kind: input, shape index: {}]   ;;  %s2819_s3 = inlined_call_operand.vmem [shape: bf16[32,2080], index: 3, kind: output, shape index: {}]  }
   0x1 LB: > { %s1743_s13 = sadd.s32 4294967295, %s2203_s12   ;;  %p1747_p0 = scmp.ge.s32.totalorder %s2203_s12, 1  ;;  %s2203_s12 = sphi %s2226_s12, %s13_s12  }
   0x2   : > { %p150_p1 = scmp.lt.s32.totalorder %s2203_s12, 3 }
   0x4   : > { %p151_p2 = pnand %p1747_p0, %p150_p1 }
   0x5   : > { %v1969_v0 = vld [vmem:[%s2817_s1 + $0x4] ss:$68 sps:$4 sm:$0xff] (!%p151_p2)   ;;  %s1748_s16 = sshll.u32 (!%p151_p2), %s1743_s13, 1  ;;  %v1972_v2 = vld [vmem:[%s2817_s1 + $0x8c] ss:$68 sps:$4 sm:$0xff] (!%p151_p2)   ;;  %v2205_v3 = vmov (!%p151_p2), 0  }
   0x6   : > { %154 = sbr.rel (%p151_p2) target bundleno = 405 (0x195), region = 32  ;;  %v1971_v1 = vld [vmem:[%s2817_s1] ss:$68 sps:$4 sm:$0xff] (!%p151_p2)   ;;  %p182_p3 = scmp.lt.s32.totalorder (!%p151_p2), %s1748_s16, 3  ;;  %1165 = vmatprep.subr.bf16.mxu0 (!%p151_p2), %v1969_v0  ;;  %1968 = vset.pattern.permute.xlu0 (!%p151_p2), %v2205_v3  ;;  %v1974_v4 = vld [vmem:[%s2817_s1 + $0x88] ss:$68 sps:$4 sm:$0xff] (!%p151_p2)  }
   0x7   : > { %1166 = vmatpush1.bf16.msra.mxu0 (!%p151_p2), %v1971_v1  ;;  %v1975_v5 = vld [vmem:[%s2817_s1 + $0x114] ss:$68 sps:$4 sm:$0xff] (!%p151_p2)   ;;  %v1978_v7 = vld [vmem:[%s2817_s1 + $0x19c] ss:$68 sps:$4 sm:$0xff] (!%p151_p2)   ;;  %v1993_v9 = vld [vmem:[%s2817_s1 + $0xc] ss:$68 sps:$4 sm:$0xff] (!%p151_p2)  }
   0x8   : > { %1167 = vmatprep.subr.bf16.mxu0 (!%p151_p2), %v1972_v2  ;;  %v1977_v6 = vld [vmem:[%s2817_s1 + $0x110] ss:$68 sps:$4 sm:$0xff] (!%p151_p2)   ;;  %v1980_v8 = vld [vmem:[%s2817_s1 + $0x198] ss:$68 sps:$4 sm:$0xff] (!%p151_p2)   ;;  %v1981_v10 = vld [vmem:[%s2817_s1 + $0x224] ss:$68 sps:$4 sm:$0xff] (!%p151_p2)   ;;  %1208 = vmatprep.subr.bf16.mxu1 (!%p151_p2), %v1993_v9 }
   0x9   : > { %v1997_v11 = vld [vmem:[%s2817_s1 + $0x8] ss:$68 sps:$4 sm:$0xff] (!%p151_p2)   ;;  %vm1161_vm0 = vcmask (!%p151_p2), 130048   ;;  %v1983_v13 = vld [vmem:[%s2817_s1 + $0x220] ss:$68 sps:$4 sm:$0xff] (!%p151_p2)   ;;  %vm1662_vm1 = vcmask (!%p151_p2), 257024  }
   0xa   : > { %1209 = vmatpush1.bf16.msra.mxu1 (!%p151_p2), %v1997_v11  ;;  %v2001_v14 = vld [vmem:[%s2817_s1 + $0x94] ss:$68 sps:$4 sm:$0xff] (!%p151_p2)   ;;  %v1984_v16 = vld [vmem:[%s2817_s1 + $0x2ac] ss:$68 sps:$4 sm:$0xff] (!%p151_p2)   ;;  %v2008_v17 = vld [vmem:[%s2817_s1 + $0x11c] ss:$68 sps:$4 sm:$0xff] (!%p151_p2)  }
   0xb   : > { %1168 = vmatpush1.bf16.msra.mxu0 (!%p151_p2), %v1974_v4  ;;  %v2004_v15 = vld [vmem:[%s2817_s1 + $0x90] ss:$68 sps:$4 sm:$0xff] (!%p151_p2)   ;;  %1210 = vmatprep.subr.bf16.mxu1 (!%p151_p2), %v2001_v14  ;;  %v2010_v18 = vld [vmem:[%s2817_s1 + $0x118] ss:$68 sps:$4 sm:$0xff] (!%p151_p2)   ;;  %v1986_v19 = vld [vmem:[%s2817_s1 + $0x2a8] ss:$68 sps:$4 sm:$0xff] (!%p151_p2)  }
   0xc   : > { %1169 = vmatprep.subr.bf16.mxu0 (!%p151_p2), %v1975_v5  ;;  %v1987_v20 = vld [vmem:[%s2817_s1 + $0x334] ss:$68 sps:$4 sm:$0xff] (!%p151_p2)   ;;  %v2014_v21 = vld [vmem:[%s2817_s1 + $0x1a4] ss:$68 sps:$4 sm:$0xff] (!%p151_p2)   ;;  %v2020_v24 = vld [vmem:[%s2817_s1 + $0x22c] ss:$68 sps:$4 sm:$0xff] (!%p151_p2)  }
   0xd   : > { %s2821_s16 = smov (!%p182_p3, %s1748_s16), 3  ;;  %v2016_v22 = vld [vmem:[%s2817_s1 + $0x1a0] ss:$68 sps:$4 sm:$0xff]   ;;  %v1989_v23 = vld [vmem:[%s2817_s1 + $0x330] ss:$68 sps:$4 sm:$0xff]  }
   0xe   : > { %s1939_s29 = sshll.u32 %s2821_s16, 3  ;;  %1211 = vmatpush1.bf16.msra.mxu1 %v2004_v15  ;;  %v1990_v25 = vld [vmem:[%s2817_s1 + $0x3bc] ss:$68 sps:$4 sm:$0xff]   ;;  %v2022_v26 = vld [vmem:[%s2817_s1 + $0x228] ss:$68 sps:$4 sm:$0xff]   ;;  %s1958_s7 = smul.u32 68, %s2821_s16 }
   0xf   : > { %1170 = vmatpush1.bf16.msra.mxu0 %v1977_v6  ;;  %s2270_s9 = scalar_lea.vmem %s2816_s0, %s1939_s29  ;;  %1212 = vmatprep.subr.bf16.mxu1 %v2008_v17  ;;  %v1992_v27 = vld [vmem:[%s2817_s1 + $0x3b8] ss:$68 sps:$4 sm:$0xff]   ;;  %v1995_v29 = vld [vmem:[%s2817_s1 + $0x444] ss:$68 sps:$4 sm:$0xff]   ;;  %v2028_v30 = vld [vmem:[%s2817_s1 + $0x2b0] ss:$68 sps:$4 sm:$0xff]   ;;  %s192_s10 = scalar_lea.vmem %s2818_s2, %s1939_s29 }
  0x10   : > { %1171 = vmatprep.subr.bf16.mxu0 %v1978_v7  ;;  %v2279_v12 = vld [vmem:[%s2270_s9 + $0x4] ss:$8 sps:$4 sm:$0xff]   ;;  %v2026_v28 = vld [vmem:[%s2817_s1 + $0x2b4] ss:$68 sps:$4 sm:$0xff]   ;;  %v2032_v32 = vld [vmem:[%s2817_s1 + $0x33c] ss:$68 sps:$4 sm:$0xff]   ;;  %s2761_s11 = scalar_lea.vmem %s2819_s3, %s1958_s7 }
  0x11   : > { %1910 = vmatprep.mubr.msk.bf16.mxu0 %vm1161_vm0, %v2279_v12  ;;  %1911 = vmatprep.mubr.msk.bf16.mxu1 %vm1161_vm0, %v2279_v12  ;;  %v1998_v31 = vld [vmem:[%s2817_s1 + $0x440] ss:$68 sps:$4 sm:$0xff]   ;;  %v2007_v33 = vld [vmem:[%s2817_s1 + $0x14] ss:$68 sps:$4 sm:$0xff]   ;;  %v2044_v41 = vld [vmem:[%s2817_s1 + $0x44c] ss:$68 sps:$4 sm:$0xff]  }
  0x12   : > { %1213 = vmatpush1.bf16.msra.mxu1 %v2010_v18  ;;  %v2349_v34 = vld [vmem:[%s2270_s9] ss:$8 sps:$4 sm:$0xff]   ;;  %v2034_v35 = vld [vmem:[%s2817_s1 + $0x338] ss:$68 sps:$4 sm:$0xff]   ;;  %v2005_v36 = vld [vmem:[%s2817_s1 + $0x10] ss:$68 sps:$4 sm:$0xff]  }
  0x13   : > { %1172 = vmatpush1.bf16.msra.mxu0 %v1980_v8  ;;  %1214 = vmatprep.subr.bf16.mxu1 %v2014_v21  ;;  %v2038_v37 = vld [vmem:[%s2817_s1 + $0x3c4] ss:$68 sps:$4 sm:$0xff]   ;;  %v2013_v38 = vld [vmem:[%s2817_s1 + $0x9c] ss:$68 sps:$4 sm:$0xff]   ;;  %v2025_v46 = vld [vmem:[%s2817_s1 + $0x1ac] ss:$68 sps:$4 sm:$0xff]  }
  0x14   : > { %1173 = vmatprep.subr.bf16.mxu0 %v1981_v10  ;;  %v2040_v39 = vld [vmem:[%s2817_s1 + $0x3c0] ss:$68 sps:$4 sm:$0xff]   ;;  %v2011_v40 = vld [vmem:[%s2817_s1 + $0x98] ss:$68 sps:$4 sm:$0xff]   ;;  %v2046_v43 = vld [vmem:[%s2817_s1 + $0x448] ss:$68 sps:$4 sm:$0xff]  }
  0x15   : > { %v2019_v42 = vld [vmem:[%s2817_s1 + $0x124] ss:$68 sps:$4 sm:$0xff]   ;;  %v2052_v45 = vld [vmem:[%s2817_s1 + $0x1c] ss:$68 sps:$4 sm:$0xff]   ;;  %v2031_v50 = vld [vmem:[%s2817_s1 + $0x234] ss:$68 sps:$4 sm:$0xff]  }
  0x16   : > { %1215 = vmatpush1.bf16.msra.mxu1 %v2016_v22  ;;  %v2017_v44 = vld [vmem:[%s2817_s1 + $0x120] ss:$68 sps:$4 sm:$0xff]   ;;  %v2050_v47 = vld [vmem:[%s2817_s1 + $0x18] ss:$68 sps:$4 sm:$0xff]   ;;  %v2023_v48 = vld [vmem:[%s2817_s1 + $0x1a8] ss:$68 sps:$4 sm:$0xff]  }
  0x17   : > { %1174 = vmatpush1.bf16.msra.mxu0 %v1983_v13  ;;  %1216 = vmatprep.subr.bf16.mxu1 %v2020_v24  ;;  %v2058_v49 = vld [vmem:[%s2817_s1 + $0xa4] ss:$68 sps:$4 sm:$0xff]   ;;  %v2029_v52 = vld [vmem:[%s2817_s1 + $0x230] ss:$68 sps:$4 sm:$0xff]   ;;  %v2037_v54 = vld [vmem:[%s2817_s1 + $0x2bc] ss:$68 sps:$4 sm:$0xff]  }
  0x18   : > { %1175 = vmatprep.subr.bf16.mxu0 %v1984_v16  ;;  %v2056_v51 = vld [vmem:[%s2817_s1 + $0xa0] ss:$68 sps:$4 sm:$0xff]   ;;  %v2064_v53 = vld [vmem:[%s2817_s1 + $0x12c] ss:$68 sps:$4 sm:$0xff]   ;;  %v2035_v56 = vld [vmem:[%s2817_s1 + $0x2b8] ss:$68 sps:$4 sm:$0xff]  }
  0x19   : > { %v2062_v55 = vld [vmem:[%s2817_s1 + $0x128] ss:$68 sps:$4 sm:$0xff]   ;;  %v2070_v57 = vld [vmem:[%s2817_s1 + $0x1b4] ss:$68 sps:$4 sm:$0xff]   ;;  %v2041_v60 = vld [vmem:[%s2817_s1 + $0x340] ss:$68 sps:$4 sm:$0xff]  }
  0x1a   : > { %1217 = vmatpush1.bf16.msra.mxu1 %v2022_v26  ;;  %v2043_v58 = vld [vmem:[%s2817_s1 + $0x344] ss:$68 sps:$4 sm:$0xff]   ;;  %v2068_v59 = vld [vmem:[%s2817_s1 + $0x1b0] ss:$68 sps:$4 sm:$0xff]   ;;  %v2076_v61 = vld [vmem:[%s2817_s1 + $0x23c] ss:$68 sps:$4 sm:$0xff]  }
  0x1b   : > { %1176 = vmatpush1.bf16.msra.mxu0 %v1986_v19  ;;  %1218 = vmatprep.subr.bf16.mxu1 %v2026_v28  ;;  %v2049_v62 = vld [vmem:[%s2817_s1 + $0x3cc] ss:$68 sps:$4 sm:$0xff]   ;;  %v2074_v63 = vld [vmem:[%s2817_s1 + $0x238] ss:$68 sps:$4 sm:$0xff]   ;;  %v2082_v1 = vld [vmem:[%s2817_s1 + $0x2c4] ss:$68 sps:$4 sm:$0xff]  }
  0x1c   : > { %1177 = vmatprep.subr.bf16.mxu0 %v1987_v20  ;;  %v2047_v0 = vld [vmem:[%s2817_s1 + $0x3c8] ss:$68 sps:$4 sm:$0xff]   ;;  %v2055_v2 = vld [vmem:[%s2817_s1 + $0x454] ss:$68 sps:$4 sm:$0xff]   ;;  %v2080_v4 = vld [vmem:[%s2817_s1 + $0x2c0] ss:$68 sps:$4 sm:$0xff]  }
  0x1d   : > { %v2053_v5 = vld [vmem:[%s2817_s1 + $0x450] ss:$68 sps:$4 sm:$0xff]   ;;  %v2061_v7 = vld [vmem:[%s2817_s1 + $0x24] ss:$68 sps:$4 sm:$0xff]   ;;  %v2100_v17 = vld [vmem:[%s2817_s1 + $0x45c] ss:$68 sps:$4 sm:$0xff]  }
  0x1e   : > { %1219 = vmatpush1.bf16.msra.mxu1 %v2028_v30  ;;  %v2088_v6 = vld [vmem:[%s2817_s1 + $0x34c] ss:$68 sps:$4 sm:$0xff]   ;;  %v2059_v8 = vld [vmem:[%s2817_s1 + $0x20] ss:$68 sps:$4 sm:$0xff]   ;;  %v2094_v11 = vld [vmem:[%s2817_s1 + $0x3d4] ss:$68 sps:$4 sm:$0xff]  }
  0x1f   : > { %1178 = vmatpush1.bf16.msra.mxu0 %v1989_v23  ;;  %1220 = vmatprep.subr.bf16.mxu1 %v2032_v32  ;;  %v2086_v9 = vld [vmem:[%s2817_s1 + $0x348] ss:$68 sps:$4 sm:$0xff]   ;;  %v366_v10 = vld [vmem:[%s192_s10] sm:$0xff]  ;;  %v2092_v15 = vld [vmem:[%s2817_s1 + $0x3d0] ss:$68 sps:$4 sm:$0xff]  }
  0x20   : > { %1179 = vmatprep.subr.bf16.mxu0 %v1990_v25  ;;  %v2067_v13 = vld [vmem:[%s2817_s1 + $0xac] ss:$68 sps:$4 sm:$0xff]   ;;  %370 = vperm.xlu0 %1968, %v366_v10   ;;  %v2073_v18 = vld [vmem:[%s2817_s1 + $0x134] ss:$68 sps:$4 sm:$0xff]   ;;  %v2079_v22 = vld [vmem:[%s2817_s1 + $0x1bc] ss:$68 sps:$4 sm:$0xff]  }
  0x21   : > { %v2065_v14 = vld [vmem:[%s2817_s1 + $0xa8] ss:$68 sps:$4 sm:$0xff]   ;;  %v2071_v19 = vld [vmem:[%s2817_s1 + $0x130] ss:$68 sps:$4 sm:$0xff]   ;;  %v2098_v20 = vld [vmem:[%s2817_s1 + $0x458] ss:$68 sps:$4 sm:$0xff]  }
  0x22   : > { %1221 = vmatpush1.bf16.msra.mxu1 %v2034_v35  ;;  %v367_v16 = vld [vmem:[%s192_s10 + $0x8] sm:$0xff]  ;;  %v2077_v23 = vld [vmem:[%s2817_s1 + $0x1b8] ss:$68 sps:$4 sm:$0xff]   ;;  %v2110_v28 = vld [vmem:[%s2817_s1 + $0xb0] ss:$68 sps:$4 sm:$0xff]  }
  0x23   : > { %1180 = vmatpush1.bf16.msra.mxu0 %v1992_v27  ;;  %1222 = vmatprep.subr.bf16.mxu1 %v2038_v37  ;;  %v2106_v21 = vld [vmem:[%s2817_s1 + $0x2c] ss:$68 sps:$4 sm:$0xff]   ;;  %v2112_v25 = vld [vmem:[%s2817_s1 + $0xb4] ss:$68 sps:$4 sm:$0xff]   ;;  %v2085_v26 = vld [vmem:[%s2817_s1 + $0x244] ss:$68 sps:$4 sm:$0xff]  }
  0x24   : > { %1181 = vmatprep.subr.bf16.mxu0 %v1995_v29  ;;  %375 = vperm.xlu0 %1968, %v367_v16   ;;  %v2104_v24 = vld [vmem:[%s2817_s1 + $0x28] ss:$68 sps:$4 sm:$0xff]   ;;  %v2083_v27 = vld [vmem:[%s2817_s1 + $0x240] ss:$68 sps:$4 sm:$0xff]   ;;  %v2116_v32 = vld [vmem:[%s2817_s1 + $0x138] ss:$68 sps:$4 sm:$0xff]  }
  0x25   : > { %v2118_v29 = vld [vmem:[%s2817_s1 + $0x13c] ss:$68 sps:$4 sm:$0xff]   ;;  %v2091_v30 = vld [vmem:[%s2817_s1 + $0x2cc] ss:$68 sps:$4 sm:$0xff]   ;;  %v2097_v35 = vld [vmem:[%s2817_s1 + $0x354] ss:$68 sps:$4 sm:$0xff]  }
  0x26   : > { %1223 = vmatpush1.bf16.msra.mxu1 %v2040_v39  ;;  %v2095_v37 = vld [vmem:[%s2817_s1 + $0x350] ss:$68 sps:$4 sm:$0xff]   ;;  %v2103_v39 = vld [vmem:[%s2817_s1 + $0x3dc] ss:$68 sps:$4 sm:$0xff]   ;;  %v2182_v16 = vld [vmem:[%s2817_s1 + $0x2e4] ss:$68 sps:$4 sm:$0xff]  }
  0x27   : > { %1182 = vmatpush1.bf16.msra.mxu0 %v1998_v31  ;;  %1224 = vmatprep.subr.bf16.mxu1 %v2044_v41  ;;  %v2089_v31 = vld [vmem:[%s2817_s1 + $0x2c8] ss:$68 sps:$4 sm:$0xff]   ;;  %v2149_v10 = vld [vmem:[%s2817_s1 + $0x360] ss:$68 sps:$4 sm:$0xff]  }
  0x28   : > { %1251 = vmatprep.subr.bf16.mxu0 %v2007_v33  ;;  %v2124_v33 = vld [vmem:[%s2817_s1 + $0x1c4] ss:$68 sps:$4 sm:$0xff]  }
  0x29   : > { %v2128_v41 = vld [vmem:[%s2817_s1 + $0x248] ss:$68 sps:$4 sm:$0xff]  }
  0x2a   : > { %1198 = vmatmul.mubr.bf16.vlgmr.msra.gmra.mrb[0].mxu0 %v2349_v34  ;;  %1225 = vmatpush1.bf16.msra.mxu1 %v2046_v43  ;;  %v2109_v43 = vld [vmem:[%s2817_s1 + $0x464] ss:$68 sps:$4 sm:$0xff]  }
  0x2b   : > { %1252 = vmatpush1.bf16.msra.mxu0 %v2005_v36  ;;  %1912 = vmatprep.mubr.msk.bf16.mxu0 %vm1161_vm0, %v2279_v12  ;;  %v2122_v36 = vld [vmem:[%s2817_s1 + $0x1c0] ss:$68 sps:$4 sm:$0xff]  }
  0x2c   : > { %1253 = vmatprep.subr.bf16.mxu0 %v2013_v38  ;;  %1294 = vmatprep.subr.bf16.mxu1 %v2052_v45  ;;  %v2130_v38 = vld [vmem:[%s2817_s1 + $0x24c] ss:$68 sps:$4 sm:$0xff]  }
  0x2d   : > { %1241 = vmatmul.mubr.bf16.vlgmr.msra.gmra.mrb[0].mxu1 %v2349_v34  ;;  %v2134_v45 = vld [vmem:[%s2817_s1 + $0x2d0] ss:$68 sps:$4 sm:$0xff]  }
  0x2e   : > { %1295 = vmatpush1.bf16.msra.mxu1 %v2050_v47  ;;  %1913 = vmatprep.mubr.msk.bf16.mxu1 %vm1161_vm0, %v2279_v12  ;;  %v2115_v47 = vld [vmem:[%s2817_s1 + $0x34] ss:$68 sps:$4 sm:$0xff]  }
  0x2f   : > { %1254 = vmatpush1.bf16.msra.mxu0 %v2011_v40  ;;  %1296 = vmatprep.subr.bf16.mxu1 %v2058_v49  ;;  %v2101_v40 = vld [vmem:[%s2817_s1 + $0x3d8] ss:$68 sps:$4 sm:$0xff]   ;;  %v2113_v49 = vld [vmem:[%s2817_s1 + $0x30] ss:$68 sps:$4 sm:$0xff]  }
  0x30   : > { %1255 = vmatprep.subr.bf16.mxu0 %v2019_v42  ;;  %v2136_v42 = vld [vmem:[%s2817_s1 + $0x2d4] ss:$68 sps:$4 sm:$0xff]  }
  0x32   : > { %1297 = vmatpush1.bf16.msra.mxu1 %v2056_v51  ;;  %v2121_v51 = vld [vmem:[%s2817_s1 + $0xbc] ss:$68 sps:$4 sm:$0xff]  }
  0x33   : > { %1256 = vmatpush1.bf16.msra.mxu0 %v2017_v44  ;;  %1298 = vmatprep.subr.bf16.mxu1 %v2064_v53  ;;  %v2107_v44 = vld [vmem:[%s2817_s1 + $0x460] ss:$68 sps:$4 sm:$0xff]   ;;  %v2119_v53 = vld [vmem:[%s2817_s1 + $0xb8] ss:$68 sps:$4 sm:$0xff]  }
  0x34   : > { %1257 = vmatprep.subr.bf16.mxu0 %v2025_v46  ;;  %v2142_v46 = vld [vmem:[%s2817_s1 + $0x35c] ss:$68 sps:$4 sm:$0xff]  }
  0x36   : > { %1299 = vmatpush1.bf16.msra.mxu1 %v2062_v55  ;;  %v2127_v55 = vld [vmem:[%s2817_s1 + $0x144] ss:$68 sps:$4 sm:$0xff]  }
  0x37   : > { %1258 = vmatpush1.bf16.msra.mxu0 %v2023_v48  ;;  %1300 = vmatprep.subr.bf16.mxu1 %v2070_v57  ;;  %v2140_v48 = vld [vmem:[%s2817_s1 + $0x358] ss:$68 sps:$4 sm:$0xff]   ;;  %v2125_v57 = vld [vmem:[%s2817_s1 + $0x140] ss:$68 sps:$4 sm:$0xff]  }
  0x38   : > { %1259 = vmatprep.subr.bf16.mxu0 %v2031_v50  ;;  %v2148_v50 = vld [vmem:[%s2817_s1 + $0x3e4] ss:$68 sps:$4 sm:$0xff]  }
  0x3a   : > { %1301 = vmatpush1.bf16.msra.mxu1 %v2068_v59  ;;  %v2133_v59 = vld [vmem:[%s2817_s1 + $0x1cc] ss:$68 sps:$4 sm:$0xff]  }
  0x3b   : > { %1260 = vmatpush1.bf16.msra.mxu0 %v2029_v52  ;;  %1302 = vmatprep.subr.bf16.mxu1 %v2076_v61  ;;  %v2146_v52 = vld [vmem:[%s2817_s1 + $0x3e0] ss:$68 sps:$4 sm:$0xff]   ;;  %v2131_v61 = vld [vmem:[%s2817_s1 + $0x1c8] ss:$68 sps:$4 sm:$0xff]  }
  0x3c   : > { %1261 = vmatprep.subr.bf16.mxu0 %v2037_v54  ;;  %v2154_v54 = vld [vmem:[%s2817_s1 + $0x46c] ss:$68 sps:$4 sm:$0xff]  }
  0x3e   : > { %1303 = vmatpush1.bf16.msra.mxu1 %v2074_v63  ;;  %v2139_v63 = vld [vmem:[%s2817_s1 + $0x254] ss:$68 sps:$4 sm:$0xff]  }
  0x3f   : > { %1262 = vmatpush1.bf16.msra.mxu0 %v2035_v56  ;;  %1304 = vmatprep.subr.bf16.mxu1 %v2082_v1  ;;  %v2152_v56 = vld [vmem:[%s2817_s1 + $0x468] ss:$68 sps:$4 sm:$0xff]   ;;  %v2137_v1 = vld [vmem:[%s2817_s1 + $0x250] ss:$68 sps:$4 sm:$0xff]  }
  0x40   : > { %1263 = vmatprep.subr.bf16.mxu0 %v2043_v58  ;;  %v2160_v58 = vld [vmem:[%s2817_s1 + $0x3c] ss:$68 sps:$4 sm:$0xff]  }
  0x42   : > { %1305 = vmatpush1.bf16.msra.mxu1 %v2080_v4  ;;  %v2145_v4 = vld [vmem:[%s2817_s1 + $0x2dc] ss:$68 sps:$4 sm:$0xff]  }
  0x43   : > { %1264 = vmatpush1.bf16.msra.mxu0 %v2041_v60  ;;  %1306 = vmatprep.subr.bf16.mxu1 %v2088_v6  ;;  %v2158_v60 = vld [vmem:[%s2817_s1 + $0x38] ss:$68 sps:$4 sm:$0xff]  }
  0x44   : > { %1265 = vmatprep.subr.bf16.mxu0 %v2049_v62  ;;  %v2166_v62 = vld [vmem:[%s2817_s1 + $0xc4] ss:$68 sps:$4 sm:$0xff]   ;;  %v2143_v6 = vld [vmem:[%s2817_s1 + $0x2d8] ss:$68 sps:$4 sm:$0xff]  }
  0x46   : > { %1307 = vmatpush1.bf16.msra.mxu1 %v2086_v9  ;;  %v2172_v9 = vld [vmem:[%s2817_s1 + $0x1d0] ss:$68 sps:$4 sm:$0xff]  }
  0x47   : > { %1266 = vmatpush1.bf16.msra.mxu0 %v2047_v0  ;;  %1308 = vmatprep.subr.bf16.mxu1 %v2094_v11  ;;  %v2164_v0 = vld [vmem:[%s2817_s1 + $0xc0] ss:$68 sps:$4 sm:$0xff]  }
  0x48   : > { %1267 = vmatprep.subr.bf16.mxu0 %v2055_v2  ;;  %v2170_v2 = vld [vmem:[%s2817_s1 + $0x14c] ss:$68 sps:$4 sm:$0xff]   ;;  %v2178_v11 = vld [vmem:[%s2817_s1 + $0x25c] ss:$68 sps:$4 sm:$0xff]  }
  0x4a   : > { %1309 = vmatpush1.bf16.msra.mxu1 %v2092_v15  ;;  %v2155_v15 = vld [vmem:[%s2817_s1 + $0x3e8] ss:$68 sps:$4 sm:$0xff]  }
  0x4b   : > { %1268 = vmatpush1.bf16.msra.mxu0 %v2053_v5  ;;  %1310 = vmatprep.subr.bf16.mxu1 %v2100_v17  ;;  %v2168_v5 = vld [vmem:[%s2817_s1 + $0x148] ss:$68 sps:$4 sm:$0xff]   ;;  %v2163_v17 = vld [vmem:[%s2817_s1 + $0x474] ss:$68 sps:$4 sm:$0xff]  }
  0x4c   : > { %1337 = vmatprep.subr.bf16.mxu0 %v2061_v7  ;;  %v2174_v7 = vld [vmem:[%s2817_s1 + $0x1d4] ss:$68 sps:$4 sm:$0xff]  }
  0x4e   : > { %1284 = vmatmul.mubr.bf16.vlgmr.msra.gmra.mrb[4].mxu0 %v2349_v34  ;;  %1311 = vmatpush1.bf16.msra.mxu1 %v2098_v20  ;;  %v2186_v20 = vld [vmem:[%s2817_s1 + $0x36c] ss:$68 sps:$4 sm:$0xff]  }
  0x4f   : > { %1338 = vmatpush1.bf16.msra.mxu0 %v2059_v8  ;;  %1914 = vmatprep.mubr.msk.bf16.mxu0 %vm1161_vm0, %v2279_v12  ;;  %v2151_v8 = vld [vmem:[%s2817_s1 + $0x364] ss:$68 sps:$4 sm:$0xff]  }
  0x50   : > { %1339 = vmatprep.subr.bf16.mxu0 %v2067_v13  ;;  %1380 = vmatprep.subr.bf16.mxu1 %v2106_v21  ;;  %v2157_v13 = vld [vmem:[%s2817_s1 + $0x3ec] ss:$68 sps:$4 sm:$0xff]  }
  0x51   : > { %1327 = vmatmul.mubr.bf16.vlgmr.msra.gmra.mrb[4].mxu1 %v2349_v34  ;;  %v2184_v21 = vld [vmem:[%s2817_s1 + $0x368] ss:$68 sps:$4 sm:$0xff]  }
  0x52   : > { %1381 = vmatpush1.bf16.msra.mxu1 %v2104_v24  ;;  %1915 = vmatprep.mubr.msk.bf16.mxu1 %vm1161_vm0, %v2279_v12  ;;  %v2188_v24 = vld [vmem:[%s2817_s1 + $0x3f0] ss:$68 sps:$4 sm:$0xff]  }
  0x53   : > { %1340 = vmatpush1.bf16.msra.mxu0 %v2065_v14  ;;  %1382 = vmatprep.subr.bf16.mxu1 %v2112_v25  ;;  %v2176_v14 = vld [vmem:[%s2817_s1 + $0x258] ss:$68 sps:$4 sm:$0xff]   ;;  %v2171_v25 = vld [vmem:[%s2817_s1 + $0xc8] ss:$68 sps:$4 sm:$0xff]  }
  0x54   : > { %1341 = vmatprep.subr.bf16.mxu0 %v2073_v18  ;;  %v2180_v18 = vld [vmem:[%s2817_s1 + $0x2e0] ss:$68 sps:$4 sm:$0xff]  }
  0x56   : > { %1383 = vmatpush1.bf16.msra.mxu1 %v2110_v28  ;;  %v2175_v28 = vld [vmem:[%s2817_s1 + $0x150] ss:$68 sps:$4 sm:$0xff]  }
  0x57   : > { %1342 = vmatpush1.bf16.msra.mxu0 %v2071_v19  ;;  %1384 = vmatprep.subr.bf16.mxu1 %v2118_v29  ;;  %v2161_v19 = vld [vmem:[%s2817_s1 + $0x470] ss:$68 sps:$4 sm:$0xff]   ;;  %v2179_v29 = vld [vmem:[%s2817_s1 + $0x1d8] ss:$68 sps:$4 sm:$0xff]  }
  0x58   : > { %1343 = vmatprep.subr.bf16.mxu0 %v2079_v22  ;;  %v2167_v22 = vld [vmem:[%s2817_s1 + $0x40] ss:$68 sps:$4 sm:$0xff]  }
  0x5a   : > { %1385 = vmatpush1.bf16.msra.mxu1 %v2116_v32  ;;  %v2195_v32 = vld [vmem:[%s2817_s1 + $0x3f8] ss:$68 sps:$4 sm:$0xff]  }
  0x5b   : > { %1344 = vmatpush1.bf16.msra.mxu0 %v2077_v23  ;;  %1386 = vmatprep.subr.bf16.mxu1 %v2124_v33  ;;  %v2190_v23 = vld [vmem:[%s2817_s1 + $0x3f4] ss:$68 sps:$4 sm:$0xff]   ;;  %v2196_v33 = vld [vmem:[%s2817_s1 + $0x480] ss:$68 sps:$4 sm:$0xff]  }
  0x5c   : > { %1345 = vmatprep.subr.bf16.mxu0 %v2085_v26  ;;  %v2194_v26 = vld [vmem:[%s2817_s1 + $0x47c] ss:$68 sps:$4 sm:$0xff]  }
  0x5e   : > { %1387 = vmatpush1.bf16.msra.mxu1 %v2122_v36 }
  0x5f   : > { %1346 = vmatpush1.bf16.msra.mxu0 %v2083_v27  ;;  %1388 = vmatprep.subr.bf16.mxu1 %v2130_v38  ;;  %v2192_v27 = vld [vmem:[%s2817_s1 + $0x478] ss:$68 sps:$4 sm:$0xff]  }
  0x60   : > { %1347 = vmatprep.subr.bf16.mxu0 %v2091_v30  ;;  %v2187_v30 = vld [vmem:[%s2817_s1 + $0x2e8] ss:$68 sps:$4 sm:$0xff]  }
  0x62   : > { %1389 = vmatpush1.bf16.msra.mxu1 %v2128_v41 }
  0x63   : > { %1348 = vmatpush1.bf16.msra.mxu0 %v2089_v31  ;;  %1390 = vmatprep.subr.bf16.mxu1 %v2136_v42  ;;  %v2191_v31 = vld [vmem:[%s2817_s1 + $0x370] ss:$68 sps:$4 sm:$0xff]  }
  0x64   : > { %1349 = vmatprep.subr.bf16.mxu0 %v2097_v35 }
  0x66   : > { %1391 = vmatpush1.bf16.msra.mxu1 %v2134_v45 }
  0x67   : > { %1350 = vmatpush1.bf16.msra.mxu0 %v2095_v37  ;;  %1392 = vmatprep.subr.bf16.mxu1 %v2142_v46 }
  0x68   : > { %1351 = vmatprep.subr.bf16.mxu0 %v2103_v39 }
  0x6a   : > { %1393 = vmatpush1.bf16.msra.mxu1 %v2140_v48 }
  0x6b   : > { %1352 = vmatpush1.bf16.msra.mxu0 %v2101_v40  ;;  %1394 = vmatprep.subr.bf16.mxu1 %v2148_v50 }
  0x6c   : > { %1353 = vmatprep.subr.bf16.mxu0 %v2109_v43 }
  0x6e   : > { %1395 = vmatpush1.bf16.msra.mxu1 %v2146_v52 }
  0x6f   : > { %1354 = vmatpush1.bf16.msra.mxu0 %v2107_v44  ;;  %1396 = vmatprep.subr.bf16.mxu1 %v2154_v54 }
  0x70   : > { %1423 = vmatprep.subr.bf16.mxu0 %v2115_v47 }
  0x72   : > { %1370 = vmatmul.mubr.bf16.vlgmr.msra.gmra.mrb[8].mxu0 %v2349_v34  ;;  %1397 = vmatpush1.bf16.msra.mxu1 %v2152_v56 }
  0x73   : > { %1424 = vmatpush1.bf16.msra.mxu0 %v2113_v49  ;;  %1916 = vmatprep.mubr.msk.bf16.mxu0 %vm1161_vm0, %v2279_v12 }
  0x74   : > { %1425 = vmatprep.subr.bf16.mxu0 %v2121_v51  ;;  %1466 = vmatprep.subr.bf16.mxu1 %v2160_v58 }
  0x75   : > { %1413 = vmatmul.mubr.bf16.vlgmr.msra.gmra.mrb[8].mxu1 %v2349_v34 }
  0x76   : > { %1467 = vmatpush1.bf16.msra.mxu1 %v2158_v60  ;;  %1917 = vmatprep.mubr.msk.bf16.mxu1 %vm1161_vm0, %v2279_v12 }
  0x77   : > { %1426 = vmatpush1.bf16.msra.mxu0 %v2119_v53  ;;  %1468 = vmatprep.subr.bf16.mxu1 %v2166_v62 }
  0x78   : > { %1427 = vmatprep.subr.bf16.mxu0 %v2127_v55 }
  0x7a   : > { %1469 = vmatpush1.bf16.msra.mxu1 %v2164_v0 }
  0x7b   : > { %1428 = vmatpush1.bf16.msra.mxu0 %v2125_v57  ;;  %1470 = vmatprep.subr.bf16.mxu1 %v2170_v2 }
  0x7c   : > { %1429 = vmatprep.subr.bf16.mxu0 %v2133_v59 }
  0x7e   : > { %1471 = vmatpush1.bf16.msra.mxu1 %v2168_v5 }
  0x7f   : > { %1430 = vmatpush1.bf16.msra.mxu0 %v2131_v61  ;;  %1472 = vmatprep.subr.bf16.mxu1 %v2174_v7 }
  0x80   : > { %1431 = vmatprep.subr.bf16.mxu0 %v2139_v63 }
  0x82   : > { %1473 = vmatpush1.bf16.msra.mxu1 %v2172_v9 }
  0x83   : > { %1432 = vmatpush1.bf16.msra.mxu0 %v2137_v1  ;;  %1474 = vmatprep.subr.bf16.mxu1 %v2178_v11 }
  0x84   : > { %1433 = vmatprep.subr.bf16.mxu0 %v2145_v4 }
  0x86   : > { %1475 = vmatpush1.bf16.msra.mxu1 %v2176_v14 }
  0x87   : > { %1434 = vmatpush1.bf16.msra.mxu0 %v2143_v6  ;;  %1476 = vmatprep.subr.bf16.mxu1 %v2182_v16 }
  0x88   : > { %1435 = vmatprep.subr.bf16.mxu0 %v2151_v8 }
  0x8a   : > { %1477 = vmatpush1.bf16.msra.mxu1 %v2180_v18 }
  0x8b   : > { %1436 = vmatpush1.bf16.msra.mxu0 %v2149_v10  ;;  %1478 = vmatprep.subr.bf16.mxu1 %v2186_v20 }
  0x8c   : > { %1437 = vmatprep.subr.bf16.mxu0 %v2157_v13 }
  0x8e   : > { %1479 = vmatpush1.bf16.msra.mxu1 %v2184_v21 }
  0x8f   : > { %1438 = vmatpush1.bf16.msra.mxu0 %v2155_v15  ;;  %1480 = vmatprep.subr.bf16.mxu1 %v2190_v23 }
  0x90   : > { %1439 = vmatprep.subr.bf16.mxu0 %v2163_v17 }
  0x92   : > { %1481 = vmatpush1.bf16.msra.mxu1 %v2188_v24 }
  0x93   : > { %1440 = vmatpush1.bf16.msra.mxu0 %v2161_v19  ;;  %1482 = vmatprep.subr.bf16.mxu1 %v2194_v26 }
  0x94   : > { %1509 = vmatprep.subr.bf16.mxu0 %v2205_v3 }
  0x96   : > { %1456 = vmatmul.mubr.bf16.vlgmr.msra.gmra.mrb[12].mxu0 %v2349_v34  ;;  %1483 = vmatpush1.bf16.msra.mxu1 %v2192_v27 }
  0x97   : > { %1510 = vmatpush1.bf16.msra.mxu0 %v2167_v22  ;;  %1918 = vmatprep.mubr.msk.bf16.mxu0 %vm1161_vm0, %v2279_v12  ;;  %v2183_v12 = vld [vmem:[%s2817_s1 + $0x260] ss:$68 sps:$4 sm:$0xff]  }
  0x98   : > { %1511 = vmatprep.subr.bf16.mxu0 %v2205_v3 }
  0x99   : > { %1499 = vmatmul.mubr.bf16.vlgmr.msra.gmra.mrb[12].mxu1 %v2349_v34 }
  0x9b   : > { %1512 = vmatpush1.bf16.msra.mxu0 %v2171_v25 }
  0x9c   : > { %1513 = vmatprep.subr.bf16.mxu0 %v2205_v3 }
  0x9f   : > { %1514 = vmatpush1.bf16.msra.mxu0 %v2175_v28  ;;  %v2751_v35 = vpop.permute.xlu0 %370 }
  0xa0   : > { %1515 = vmatprep.subr.bf16.mxu0 %v2205_v3 }
  0xa3   : > { %1516 = vmatpush1.bf16.msra.mxu0 %v2179_v29  ;;  %v2754_v37 = vpop.permute.xlu0 %375 }
  0xa4   : > { %1517 = vmatprep.subr.bf16.mxu0 %v2205_v3 }
  0xa7   : > { %1518 = vmatpush1.bf16.msra.mxu0 %v2183_v12 }
  0xa8   : > { %1519 = vmatprep.subr.bf16.mxu0 %v2205_v3 }
  0xab   : > { %1520 = vmatpush1.bf16.msra.mxu0 %v2187_v30 }
  0xac   : > { %1521 = vmatprep.subr.bf16.mxu0 %v2205_v3 }
  0xaf   : > { %1522 = vmatpush1.bf16.msra.mxu0 %v2191_v31 }
  0xb0   : > { %1523 = vmatprep.subr.bf16.mxu0 %v2205_v3 }
  0xb3   : > { %1524 = vmatpush1.bf16.msra.mxu0 %v2195_v32 }
  0xb4   : > { %1525 = vmatprep.subr.bf16.mxu0 %v2205_v3 }
  0xb7   : > { %1526 = vmatpush1.bf16.msra.mxu0 %v2196_v33 }
  0xba   : > { %1542 = vmatmul.mubr.bf16.vlgmr.msra.gmra.mrb[16].mxu0 %v2349_v34 }
  0xfd   : > { %v1199_v36 = vpop.f32.mrb[0].mxu0 }
  0xfe   : > { %v1200_v38 = vadd.f32 %v1199_v36, %v2751_v35  ;;  %v1201_v39 = vpop.f32.mrb[1].mxu0 }
  0xff   : > { %v1202_v40 = vadd.f32 %v1201_v39, %v2751_v35  ;;  %v1203_v41 = vpop.f32.mrb[2].mxu0 }
 0x100   : > { %v1204_v3 = vadd.f32 %v1203_v41, %v2754_v37  ;;  %v1205_v34 = vpop.f32.mrb[3].mxu0  ;;  %v1242_v45 = vpop.f32.mrb[0].mxu1 }
 0x101   : > { %v1940_v42 = vpack.c.bf16 %v1202_v40, %v1200_v38  ;;  %v1206_v43 = vadd.f32 %v1205_v34, %v2754_v37  ;;  %v1243_v46 = vadd.f32 %v1242_v45, %v2751_v35  ;;  %v1244_v47 = vpop.f32.mrb[1].mxu1 }
 0x102   : > { %v1245_v48 = vadd.f32 %v1244_v47, %v2751_v35  ;;  %v1246_v49 = vpop.f32.mrb[2].mxu1 }
 0x103   : > { %1654 = vst [vmem:[%s2761_s11] sm:$0xff] %v1940_v42  ;;  %v1949_v44 = vpack.c.bf16 %v1206_v43, %v1204_v3  ;;  %v1247_v50 = vadd.f32 %v1246_v49, %v2754_v37  ;;  %v1248_v51 = vpop.f32.mrb[3].mxu1 }
 0x104   : > { %v1941_v52 = vpack.c.bf16 %v1245_v48, %v1243_v46  ;;  %v1249_v53 = vadd.f32 %v1248_v51, %v2754_v37 }
 0x105   : > { %1664 = vst [vmem:[%s2761_s11 + $0x44] sm:$0xff] %v1949_v44 }
 0x106   : > { %1655 = vst [vmem:[%s2761_s11 + $0x8] sm:$0xff] %v1941_v52  ;;  %v1950_v54 = vpack.c.bf16 %v1249_v53, %v1247_v50 }
 0x108   : > { %1665 = vst [vmem:[%s2761_s11 + $0x4c] sm:$0xff] %v1950_v54 }
 0x121   : > { %v1285_v55 = vpop.f32.mrb[4].mxu0 }
 0x122   : > { %v1286_v56 = vadd.f32 %v1285_v55, %v2751_v35  ;;  %v1287_v57 = vpop.f32.mrb[5].mxu0 }
 0x123   : > { %v1288_v58 = vadd.f32 %v1287_v57, %v2751_v35  ;;  %v1289_v59 = vpop.f32.mrb[6].mxu0 }
 0x124   : > { %v1290_v60 = vadd.f32 %v1289_v59, %v2754_v37  ;;  %v1291_v61 = vpop.f32.mrb[7].mxu0  ;;  %v1328_v1 = vpop.f32.mrb[4].mxu1 }
 0x125   : > { %v1942_v62 = vpack.c.bf16 %v1288_v58, %v1286_v56  ;;  %v1292_v63 = vadd.f32 %v1291_v61, %v2754_v37  ;;  %v1329_v2 = vadd.f32 %v1328_v1, %v2751_v35  ;;  %v1330_v4 = vpop.f32.mrb[5].mxu1 }
 0x126   : > { %v1331_v5 = vadd.f32 %v1330_v4, %v2751_v35  ;;  %v1332_v6 = vpop.f32.mrb[6].mxu1 }
 0x127   : > { %1656 = vst [vmem:[%s2761_s11 + $0x10] sm:$0xff] %v1942_v62  ;;  %v1951_v0 = vpack.c.bf16 %v1292_v63, %v1290_v60  ;;  %v1333_v7 = vadd.f32 %v1332_v6, %v2754_v37  ;;  %v1334_v8 = vpop.f32.mrb[7].mxu1 }
 0x128   : > { %v1943_v9 = vpack.c.bf16 %v1331_v5, %v1329_v2  ;;  %v1335_v10 = vadd.f32 %v1334_v8, %v2754_v37 }
 0x129   : > { %1666 = vst [vmem:[%s2761_s11 + $0x54] sm:$0xff] %v1951_v0 }
 0x12a   : > { %1657 = vst [vmem:[%s2761_s11 + $0x18] sm:$0xff] %v1943_v9  ;;  %v1952_v11 = vpack.c.bf16 %v1335_v10, %v1333_v7 }
 0x12c   : > { %1667 = vst [vmem:[%s2761_s11 + $0x5c] sm:$0xff] %v1952_v11 }
 0x145   : > { %v1371_v13 = vpop.f32.mrb[8].mxu0 }
 0x146   : > { %v1372_v14 = vadd.f32 %v1371_v13, %v2751_v35  ;;  %v1373_v15 = vpop.f32.mrb[9].mxu0 }
 0x147   : > { %v1374_v16 = vadd.f32 %v1373_v15, %v2751_v35  ;;  %v1375_v17 = vpop.f32.mrb[10].mxu0 }
 0x148   : > { %v1376_v18 = vadd.f32 %v1375_v17, %v2754_v37  ;;  %v1377_v19 = vpop.f32.mrb[11].mxu0  ;;  %v1414_v23 = vpop.f32.mrb[8].mxu1 }
 0x149   : > { %v1944_v20 = vpack.c.bf16 %v1374_v16, %v1372_v14  ;;  %v1378_v21 = vadd.f32 %v1377_v19, %v2754_v37  ;;  %v1415_v24 = vadd.f32 %v1414_v23, %v2751_v35  ;;  %v1416_v25 = vpop.f32.mrb[9].mxu1 }
 0x14a   : > { %v1417_v26 = vadd.f32 %v1416_v25, %v2751_v35  ;;  %v1418_v27 = vpop.f32.mrb[10].mxu1 }
 0x14b   : > { %1658 = vst [vmem:[%s2761_s11 + $0x20] sm:$0xff] %v1944_v20  ;;  %v1953_v22 = vpack.c.bf16 %v1378_v21, %v1376_v18  ;;  %v1419_v28 = vadd.f32 %v1418_v27, %v2754_v37  ;;  %v1420_v29 = vpop.f32.mrb[11].mxu1 }
 0x14c   : > { %v1945_v12 = vpack.c.bf16 %v1417_v26, %v1415_v24  ;;  %v1421_v30 = vadd.f32 %v1420_v29, %v2754_v37 }
 0x14d   : > { %1668 = vst [vmem:[%s2761_s11 + $0x64] sm:$0xff] %v1953_v22 }
 0x14e   : > { %1659 = vst [vmem:[%s2761_s11 + $0x28] sm:$0xff] %v1945_v12  ;;  %v1954_v31 = vpack.c.bf16 %v1421_v30, %v1419_v28 }
 0x150   : > { %1669 = vst [vmem:[%s2761_s11 + $0x6c] sm:$0xff] %v1954_v31 }
 0x169   : > { %v1457_v32 = vpop.f32.mrb[12].mxu0 }
 0x16a   : > { %v1458_v33 = vadd.f32 %v1457_v32, %v2751_v35  ;;  %v1459_v36 = vpop.f32.mrb[13].mxu0 }
 0x16b   : > { %v1460_v38 = vadd.f32 %v1459_v36, %v2751_v35  ;;  %v1461_v39 = vpop.f32.mrb[14].mxu0 }
 0x16c   : > { %v1462_v40 = vadd.f32 %v1461_v39, %v2754_v37  ;;  %v1463_v41 = vpop.f32.mrb[15].mxu0  ;;  %v1500_v43 = vpop.f32.mrb[12].mxu1 }
 0x16d   : > { %v1946_v3 = vpack.c.bf16 %v1460_v38, %v1458_v33  ;;  %v1464_v34 = vadd.f32 %v1463_v41, %v2754_v37  ;;  %v1501_v44 = vadd.f32 %v1500_v43, %v2751_v35  ;;  %v1502_v45 = vpop.f32.mrb[13].mxu1 }
 0x16e   : > { %v1503_v46 = vadd.f32 %v1502_v45, %v2751_v35  ;;  %v1504_v47 = vpop.f32.mrb[14].mxu1 }
 0x16f   : > { %1660 = vst [vmem:[%s2761_s11 + $0x30] sm:$0xff] %v1946_v3  ;;  %v1955_v42 = vpack.c.bf16 %v1464_v34, %v1462_v40  ;;  %v1505_v48 = vadd.f32 %v1504_v47, %v2754_v37  ;;  %v1506_v49 = vpop.f32.mrb[15].mxu1 }
 0x170   : > { %v1947_v50 = vpack.c.bf16 %v1503_v46, %v1501_v44  ;;  %v1507_v51 = vadd.f32 %v1506_v49, %v2754_v37 }
 0x171   : > { %1670 = vst [vmem:[%s2761_s11 + $0x74] sm:$0xff] %v1955_v42 }
 0x172   : > { %1661 = vst [vmem:[%s2761_s11 + $0x38] sm:$0xff] %v1947_v50  ;;  %v1956_v52 = vpack.c.bf16 %v1507_v51, %v1505_v48 }
 0x174   : > { %1671 = vst [vmem:[%s2761_s11 + $0x7c] sm:$0xff] %v1956_v52 }
 0x18d   : > { %v1543_v53 = vpop.f32.mrb[16].mxu0 }
 0x18e   : > { %v1544_v54 = vadd.f32 %v1543_v53, %v2751_v35  ;;  %v1545_v55 = vpop.f32.mrb[17].mxu0 }
 0x18f   : > { %v1546_v56 = vpop.f32.mrb[18].mxu0 }
 0x190   : > { %v1948_v57 = vpack.c.bf16 %v1544_v54, %v1544_v54  ;;  %v1547_v58 = vadd.f32 %v1546_v56, %v2754_v37  ;;  %v1548_v59 = vpop.f32.mrb[19].mxu0 }
 0x192   : > { %1663 = vst.msk [vmem:[%s2761_s11 + $0x40] sm:$0xf] %vm1662_vm1, %v1948_v57  ;;  %v1957_v60 = vpack.c.bf16 %v1547_v58, %v1547_v58 }
 0x194   : > { %1672 = vst.msk [vmem:[%s2761_s11 + $0x84] sm:$0xf] %vm1662_vm1, %v1957_v60 }
 0x195 PF: > { %s13_s12 = sadd.s32 1, %s2203_s12  }
 0x196   : > { %p10_p4 = scmp.ge.s32.totalorder %s13_s12, 4  }
 0x198   :  { %12 = sbr.rel (!%p10_p4) target bundleno = 1 (0x1), region = 65 }

// kernel: convnet_model5_forward.8
= control target key start
LH: loop header
LB: loop body
LE: loop exit
PB: predicated region body
PF: predicated region fallthrough
CT: control target
= control target key end

     0   :  { %vm116_vm0 = vcmask 60416   ;;  %v132_v27 = vmov 0   ;;  %s354_s0 = inlined_call_operand.vmem [shape: bf16[32,520], index: 0, kind: input, shape index: {}]   ;;  %s355_s1 = inlined_call_operand.vmem [shape: bf16[32,520], index: 1, kind: input, shape index: {}]   ;;  %s356_s2 = inlined_call_operand.vmem [shape: bf16[32,520], index: 2, kind: input, shape index: {}]   ;;  %s357_s3 = inlined_call_operand.vmem [shape: bf16[32,520], index: 3, kind: input, shape index: {}]   ;;  %s358_s4 = inlined_call_operand.vmem [shape: bf16[32,520], index: 4, kind: output, shape index: {}]  }
   0x1   :  { %v18_v0 = vld [vmem:[%s354_s0] sm:$0xff]  ;;  %v19_v5 = vld [vmem:[%s354_s0 + $0x8] sm:$0xff]  ;;  %v20_v11 = vld [vmem:[%s354_s0 + $0x10] sm:$0xf] }
   0x2   :  { %v30_v1 = vld [vmem:[%s355_s1] sm:$0xff]  ;;  %v31_v6 = vld [vmem:[%s355_s1 + $0x8] sm:$0xff]  ;;  %v32_v13 = vld [vmem:[%s355_s1 + $0x10] sm:$0xf] }
   0x3   :  { %v54_v2 = vld [vmem:[%s356_s2] sm:$0xff]  ;;  %v42_v3 = vmax.bf16 %v30_v1, %v18_v0  ;;  %v43_v8 = vmax.bf16 %v31_v6, %v19_v5  ;;  %v55_v9 = vld [vmem:[%s356_s2 + $0x8] sm:$0xff]  ;;  %v56_v14 = vld [vmem:[%s356_s2 + $0x10] sm:$0xf]  ;;  %v44_v17 = vmax.bf16 %v32_v13, %v20_v11 }
   0x4   :  { %v66_v4 = vld [vmem:[%s357_s3] sm:$0xff]  ;;  %v67_v10 = vld [vmem:[%s357_s3 + $0x8] sm:$0xff]  ;;  %v68_v15 = vld [vmem:[%s357_s3 + $0x10] sm:$0xf] }
   0x5   :  { %v78_v7 = vmax.bf16 %v66_v4, %v54_v2  ;;  %v79_v12 = vmax.bf16 %v67_v10, %v55_v9  ;;  %v80_v18 = vmax.bf16 %v68_v15, %v56_v14  ;;  %v21_v19 = vld [vmem:[%s354_s0 + $0x14] sm:$0xff]  ;;  %v22_v25 = vld [vmem:[%s354_s0 + $0x1c] sm:$0xff]  ;;  %v23_v34 = vld [vmem:[%s354_s0 + $0x24] sm:$0xf] }
   0x6   :  { %v33_v20 = vld [vmem:[%s355_s1 + $0x14] sm:$0xff]  ;;  %v34_v26 = vld [vmem:[%s355_s1 + $0x1c] sm:$0xff]  ;;  %v35_v37 = vld [vmem:[%s355_s1 + $0x24] sm:$0xf] }
   0x7   :  { %v90_v16 = vmax.bf16 %v78_v7, %v42_v3  ;;  %v57_v21 = vld [vmem:[%s356_s2 + $0x14] sm:$0xff]  ;;  %v91_v22 = vmax.bf16 %v79_v12, %v43_v8  ;;  %v45_v23 = vmax.bf16 %v33_v20, %v21_v19  ;;  %v92_v29 = vmax.bf16 %v80_v18, %v44_v17  ;;  %v58_v32 = vld [vmem:[%s356_s2 + $0x1c] sm:$0xff]  ;;  %v59_v38 = vld [vmem:[%s356_s2 + $0x24] sm:$0xf] }
   0x8   :  { %v69_v24 = vld [vmem:[%s357_s3 + $0x14] sm:$0xff]  ;;  %v46_v31 = vmax.bf16 %v34_v26, %v22_v25  ;;  %v70_v33 = vld [vmem:[%s357_s3 + $0x1c] sm:$0xff]  ;;  %v71_v39 = vld [vmem:[%s357_s3 + $0x24] sm:$0xf]  ;;  %v47_v42 = vmax.bf16 %v35_v37, %v23_v34 }
   0x9   :  { %v102_v28 = vmax.bf16 %v132_v27, %v90_v16  ;;  %v81_v30 = vmax.bf16 %v69_v24, %v57_v21  ;;  %v103_v35 = vmax.bf16 %v132_v27, %v91_v22  ;;  %v82_v36 = vmax.bf16 %v70_v33, %v58_v32  ;;  %v24_v44 = vld [vmem:[%s354_s0 + $0x28] sm:$0xff]  ;;  %v25_v50 = vld [vmem:[%s354_s0 + $0x30] sm:$0xff]  ;;  %v26_v58 = vld [vmem:[%s354_s0 + $0x38] sm:$0xf] }
   0xa   :  { %v104_v40 = vmax.bf16 %v132_v27, %v92_v29  ;;  %v83_v43 = vmax.bf16 %v71_v39, %v59_v38  ;;  %v36_v45 = vld [vmem:[%s355_s1 + $0x28] sm:$0xff]  ;;  %v37_v51 = vld [vmem:[%s355_s1 + $0x30] sm:$0xff]  ;;  %v38_v61 = vld [vmem:[%s355_s1 + $0x38] sm:$0xf] }
   0xb   :  { %114 = vst [vmem:[%s358_s4] sm:$0xff] %v102_v28  ;;  %v93_v41 = vmax.bf16 %v81_v30, %v45_v23  ;;  %v60_v46 = vld [vmem:[%s356_s2 + $0x28] sm:$0xff]  ;;  %115 = vst [vmem:[%s358_s4 + $0x8] sm:$0xff] %v103_v35  ;;  %v94_v47 = vmax.bf16 %v82_v36, %v46_v31  ;;  %v48_v48 = vmax.bf16 %v36_v45, %v24_v44  ;;  %v61_v56 = vld [vmem:[%s356_s2 + $0x30] sm:$0xff] }
   0xc   :  { %v72_v49 = vld [vmem:[%s357_s3 + $0x28] sm:$0xff]  ;;  %117 = vst.msk [vmem:[%s358_s4 + $0x10] sm:$0xf] %vm116_vm0, %v104_v40  ;;  %v95_v53 = vmax.bf16 %v83_v43, %v47_v42  ;;  %v49_v55 = vmax.bf16 %v37_v51, %v25_v50  ;;  %v73_v57 = vld [vmem:[%s357_s3 + $0x30] sm:$0xff]  ;;  %v62_v62 = vld [vmem:[%s356_s2 + $0x38] sm:$0xf]  ;;  %v50_v2 = vmax.bf16 %v38_v61, %v26_v58 }
   0xd   :  { %v105_v52 = vmax.bf16 %v132_v27, %v93_v41  ;;  %v84_v54 = vmax.bf16 %v72_v49, %v60_v46  ;;  %v106_v59 = vmax.bf16 %v132_v27, %v94_v47  ;;  %v85_v60 = vmax.bf16 %v73_v57, %v61_v56  ;;  %v74_v63 = vld [vmem:[%s357_s3 + $0x38] sm:$0xf]  ;;  %v27_v4 = vld [vmem:[%s354_s0 + $0x3c] sm:$0xff]  ;;  %v28_v10 = vld [vmem:[%s354_s0 + $0x44] sm:$0xff] }
   0xe   :  { %v107_v0 = vmax.bf16 %v132_v27, %v95_v53  ;;  %v86_v3 = vmax.bf16 %v74_v63, %v62_v62  ;;  %v39_v5 = vld [vmem:[%s355_s1 + $0x3c] sm:$0xff]  ;;  %v40_v11 = vld [vmem:[%s355_s1 + $0x44] sm:$0xff]  ;;  %v29_v18 = vld [vmem:[%s354_s0 + $0x4c] sm:$0xf] }
   0xf   :  { %118 = vst [vmem:[%s358_s4 + $0x14] sm:$0xff] %v105_v52  ;;  %v96_v1 = vmax.bf16 %v84_v54, %v48_v48  ;;  %v63_v6 = vld [vmem:[%s356_s2 + $0x3c] sm:$0xff]  ;;  %119 = vst [vmem:[%s358_s4 + $0x1c] sm:$0xff] %v106_v59  ;;  %v97_v7 = vmax.bf16 %v85_v60, %v49_v55  ;;  %v51_v8 = vmax.bf16 %v39_v5, %v27_v4  ;;  %v64_v16 = vld [vmem:[%s356_s2 + $0x44] sm:$0xff] }
  0x10   :  { %v75_v9 = vld [vmem:[%s357_s3 + $0x3c] sm:$0xff]  ;;  %120 = vst.msk [vmem:[%s358_s4 + $0x24] sm:$0xf] %vm116_vm0, %v107_v0  ;;  %v98_v13 = vmax.bf16 %v86_v3, %v50_v2  ;;  %v52_v15 = vmax.bf16 %v40_v11, %v28_v10  ;;  %v76_v17 = vld [vmem:[%s357_s3 + $0x44] sm:$0xff]  ;;  %v41_v21 = vld [vmem:[%s355_s1 + $0x4c] sm:$0xf] }
  0x11   :  { %v108_v12 = vmax.bf16 %v132_v27, %v96_v1  ;;  %v87_v14 = vmax.bf16 %v75_v9, %v63_v6  ;;  %v109_v19 = vmax.bf16 %v132_v27, %v97_v7  ;;  %v88_v20 = vmax.bf16 %v76_v17, %v64_v16  ;;  %v65_v22 = vld [vmem:[%s356_s2 + $0x4c] sm:$0xf] }
  0x12   :  { %v77_v23 = vld [vmem:[%s357_s3 + $0x4c] sm:$0xf]  ;;  %v110_v24 = vmax.bf16 %v132_v27, %v98_v13  ;;  %v53_v26 = vmax.bf16 %v41_v21, %v29_v18 }
  0x13   :  { %121 = vst [vmem:[%s358_s4 + $0x28] sm:$0xff] %v108_v12  ;;  %v99_v25 = vmax.bf16 %v87_v14, %v51_v8  ;;  %v89_v28 = vmax.bf16 %v77_v23, %v65_v22  ;;  %122 = vst [vmem:[%s358_s4 + $0x30] sm:$0xff] %v109_v19  ;;  %v100_v29 = vmax.bf16 %v88_v20, %v52_v15 }
  0x14   :  { %123 = vst.msk [vmem:[%s358_s4 + $0x38] sm:$0xf] %vm116_vm0, %v110_v24 }
  0x15   :  { %v111_v30 = vmax.bf16 %v132_v27, %v99_v25  ;;  %v101_v31 = vmax.bf16 %v89_v28, %v53_v26  ;;  %v112_v32 = vmax.bf16 %v132_v27, %v100_v29 }
  0x17   :  { %124 = vst [vmem:[%s358_s4 + $0x3c] sm:$0xff] %v111_v30  ;;  %v113_v33 = vmax.bf16 %v132_v27, %v101_v31  ;;  %125 = vst [vmem:[%s358_s4 + $0x44] sm:$0xff] %v112_v32 }
  0x19   :  { %126 = vst.msk [vmem:[%s358_s4 + $0x4c] sm:$0xf] %vm116_vm0, %v113_v33 }

// kernel: convnet_model5_forward.9
= control target key start
LH: loop header
LB: loop body
LE: loop exit
PB: predicated region body
PF: predicated region fallthrough
CT: control target
= control target key end

     0   :  { %v1091_v27 = vlaneseq  ;;  %v7937_v35 = vmov 1966171168   ;;  %vm7939_vm0 = vmmov 0   ;;  %s9717_s0 = inlined_call_operand.vmem [shape: bf16[2,8320], index: 0, kind: input, shape index: {}]   ;;  %s9718_s1 = inlined_call_operand.vmem [shape: bf16[8320,64], index: 1, kind: input, shape index: {}]   ;;  %s9719_s2 = inlined_call_operand.vmem [shape: f32[1,64], index: 2, kind: input, shape index: {}]   ;;  %s9720_s3 = inlined_call_operand.vmem [shape: bf16[64,10], index: 3, kind: input, shape index: {}]   ;;  %s9721_s4 = inlined_call_operand.vmem [shape: f32[1,10], index: 4, kind: input, shape index: {}]   ;;  %s9722_s5 = inlined_call_operand.hbm [shape: f32[2,10], index: 5, kind: output, shape index: {}]  }
   0x1   :  { %v7381_v0 = vld [vmem:[%s9718_s1 + $0x40] sm:$0xff]   ;;  %v7385_v4 = vld [vmem:[%s9718_s1 + $0x48] sm:$0xff]   ;;  %v7389_v8 = vld [vmem:[%s9718_s1 + $0x50] sm:$0xff]   ;;  %v1089_v36 = vunpack.c.l.s4 %v7937_v35 }
   0x2   :  { %v7382_v1 = vld [vmem:[%s9718_s1] sm:$0xff]   ;;  %6627 = vmatprep.subr.bf16.mxu0 %v7381_v0  ;;  %v7386_v5 = vld [vmem:[%s9718_s1 + $0x8] sm:$0xff]   ;;  %v7390_v9 = vld [vmem:[%s9718_s1 + $0x10] sm:$0xff]   ;;  %v1092_v32 = vshrl.u32 %v1091_v27, 7 }
   0x3   :  { %v7383_v2 = vld [vmem:[%s9718_s1 + $0xc0] sm:$0xff]   ;;  %6628 = vmatpush3.bf16.msra.mxu0 %v7382_v1  ;;  %v7387_v6 = vld [vmem:[%s9718_s1 + $0xc8] sm:$0xff]   ;;  %v7391_v10 = vld [vmem:[%s9718_s1 + $0xd0] sm:$0xff]   ;;  %v1090_v39 = vunpack.c.0.s8 %v1089_v36 }
   0x4   :  { %v7384_v3 = vld [vmem:[%s9718_s1 + $0x80] sm:$0xff]   ;;  %6649 = vmatprep.subr.bf16.mxu1 %v7383_v2  ;;  %6629 = vmatprep.subr.bf16.mxu0 %v7385_v4  ;;  %v7388_v7 = vld [vmem:[%s9718_s1 + $0x88] sm:$0xff]   ;;  %v7392_v11 = vld [vmem:[%s9718_s1 + $0x90] sm:$0xff]  }
   0x5   :  { %6650 = vmatpush3.bf16.msra.mxu1 %v7384_v3  ;;  %v7393_v12 = vld [vmem:[%s9718_s1 + $0x58] sm:$0xff]   ;;  %v7397_v16 = vld [vmem:[%s9718_s1 + $0x60] sm:$0xff]   ;;  %v7401_v20 = vld [vmem:[%s9718_s1 + $0x68] sm:$0xff]   ;;  %v8076_v41 = vsub.s32 %v1090_v39, %v1092_v32 }
   0x6   :  { %6651 = vmatprep.subr.bf16.mxu1 %v7387_v6  ;;  %v7394_v13 = vld [vmem:[%s9718_s1 + $0x18] sm:$0xff]   ;;  %v7398_v17 = vld [vmem:[%s9718_s1 + $0x20] sm:$0xff]   ;;  %v7402_v21 = vld [vmem:[%s9718_s1 + $0x28] sm:$0xff]  }
   0x7   :  { %6630 = vmatpush3.bf16.msra.mxu0 %v7386_v5  ;;  %v7395_v14 = vld [vmem:[%s9718_s1 + $0xd8] sm:$0xff]   ;;  %v7399_v18 = vld [vmem:[%s9718_s1 + $0xe0] sm:$0xff]   ;;  %v7403_v22 = vld [vmem:[%s9718_s1 + $0xe8] sm:$0xff]  }
   0x8   :  { %6631 = vmatprep.subr.bf16.mxu0 %v7389_v8  ;;  %v7396_v15 = vld [vmem:[%s9718_s1 + $0x98] sm:$0xff]   ;;  %v7400_v19 = vld [vmem:[%s9718_s1 + $0xa0] sm:$0xff]   ;;  %v7404_v23 = vld [vmem:[%s9718_s1 + $0xa8] sm:$0xff]  }
   0x9   :  { %6652 = vmatpush3.bf16.msra.mxu1 %v7388_v7  ;;  %v7405_v24 = vld [vmem:[%s9718_s1 + $0x70] sm:$0xff]   ;;  %v7409_v29 = vld [vmem:[%s9718_s1 + $0x78] sm:$0xff]   ;;  %v22_v33 = vld [vmem:[%s9717_s0] sm:$0xff] }
   0xa   :  { %6653 = vmatprep.subr.bf16.mxu1 %v7391_v10  ;;  %v7406_v25 = vld [vmem:[%s9718_s1 + $0x30] sm:$0xff]   ;;  %v7410_v30 = vld [vmem:[%s9718_s1 + $0x38] sm:$0xff]   ;;  %v7414_v37 = vld [vmem:[%s9718_s1 + $0x140] sm:$0xff]   ;;  %v1087_v38 = vcombine.high %v22_v33, %v22_v33  ;;  %v1094_v42 = vrot.slane %v22_v33, %v8076_v41 }
   0xb   :  { %6632 = vmatpush3.bf16.msra.mxu0 %v7390_v9  ;;  %v7407_v26 = vld [vmem:[%s9718_s1 + $0xf0] sm:$0xff]   ;;  %v7411_v31 = vld [vmem:[%s9718_s1 + $0xf8] sm:$0xff]   ;;  %v7416_v40 = vld [vmem:[%s9718_s1 + $0x1c0] sm:$0xff]  }
   0xc   :  { %6633 = vmatprep.subr.bf16.mxu0 %v7393_v12  ;;  %v7408_v28 = vld [vmem:[%s9718_s1 + $0xb0] sm:$0xff]   ;;  %v7413_v34 = vld [vmem:[%s9718_s1 + $0xb8] sm:$0xff]   ;;  %v8080_v43 = vrot.slane %v1087_v38, %v8076_v41  ;;  %v1102_v44 = vcombine.high %v1094_v42, %v1094_v42  ;;  %v1110_v45 = vrot.slane %v1094_v42, %v8076_v41  ;;  %v7415_v47 = vld [vmem:[%s9718_s1 + $0x100] sm:$0xff]  }
   0xd   :  { %6654 = vmatpush3.bf16.msra.mxu1 %v7392_v11  ;;  %v7417_v49 = vld [vmem:[%s9718_s1 + $0x180] sm:$0xff]   ;;  %v7418_v52 = vld [vmem:[%s9718_s1 + $0x148] sm:$0xff]   ;;  %v7422_v58 = vld [vmem:[%s9718_s1 + $0x150] sm:$0xff]  }
   0xe   :  { %6655 = vmatprep.subr.bf16.mxu1 %v7395_v14  ;;  %v1103_v46 = vcombine.high %v8080_v43, %v8080_v43  ;;  %v1124_v48 = vrot.slane %v1102_v44, %v8076_v41  ;;  %v1132_v51 = vcombine.high %v1110_v45, %v1110_v45  ;;  %v7419_v54 = vld [vmem:[%s9718_s1 + $0x108] sm:$0xff]   ;;  %v7423_v59 = vld [vmem:[%s9718_s1 + $0x110] sm:$0xff]   ;;  %v7426_v62 = vld [vmem:[%s9718_s1 + $0x158] sm:$0xff]  }
   0xf   :  { %6634 = vmatpush3.bf16.msra.mxu0 %v7394_v13  ;;  %v7420_v55 = vld [vmem:[%s9718_s1 + $0x1c8] sm:$0xff]   ;;  %v7424_v60 = vld [vmem:[%s9718_s1 + $0x1d0] sm:$0xff]   ;;  %v7427_v63 = vld [vmem:[%s9718_s1 + $0x118] sm:$0xff]  }
  0x10   :  { %6635 = vmatprep.subr.bf16.mxu0 %v7397_v16  ;;  %v1131_v50 = vrot.slane %v1103_v46, %v8076_v41  ;;  %4710 = vmatprep.mubr.bf16.mxu0 %v1124_v48  ;;  %v1134_v53 = vcombine.high %v1124_v48, %v1124_v48  ;;  %v7421_v57 = vld [vmem:[%s9718_s1 + $0x188] sm:$0xff]   ;;  %v7425_v61 = vld [vmem:[%s9718_s1 + $0x190] sm:$0xff]   ;;  %v7428_v0 = vld [vmem:[%s9718_s1 + $0x1d8] sm:$0xff]  }
  0x11   :  { %6656 = vmatpush3.bf16.msra.mxu1 %v7396_v15  ;;  %v7429_v1 = vld [vmem:[%s9718_s1 + $0x198] sm:$0xff]   ;;  %v7430_v2 = vld [vmem:[%s9718_s1 + $0x160] sm:$0xff]   ;;  %v7434_v6 = vld [vmem:[%s9718_s1 + $0x168] sm:$0xff]  }
  0x12   :  { %6657 = vmatprep.subr.bf16.mxu1 %v7399_v18  ;;  %v1135_v56 = vcombine.high %v1131_v50, %v1131_v50  ;;  %4750 = vmatprep.mubr.bf16.mxu1 %v1134_v53  ;;  %v7431_v3 = vld [vmem:[%s9718_s1 + $0x120] sm:$0xff]   ;;  %v7435_v7 = vld [vmem:[%s9718_s1 + $0x128] sm:$0xff]   ;;  %v7438_v10 = vld [vmem:[%s9718_s1 + $0x170] sm:$0xff]   ;;  %v1117_v18 = vrot.slane %v8080_v43, %v8076_v41 }
  0x13   :  { %6636 = vmatpush3.bf16.msra.mxu0 %v7398_v17  ;;  %v7432_v4 = vld [vmem:[%s9718_s1 + $0x1e0] sm:$0xff]   ;;  %v7436_v8 = vld [vmem:[%s9718_s1 + $0x1e8] sm:$0xff]   ;;  %v7439_v11 = vld [vmem:[%s9718_s1 + $0x130] sm:$0xff]  }
  0x14   :  { %6637 = vmatprep.subr.bf16.mxu0 %v7401_v20  ;;  %v7433_v5 = vld [vmem:[%s9718_s1 + $0x1a0] sm:$0xff]   ;;  %v7437_v9 = vld [vmem:[%s9718_s1 + $0x1a8] sm:$0xff]   ;;  %v7440_v12 = vld [vmem:[%s9718_s1 + $0x1f0] sm:$0xff]  }
  0x15   :  { %6658 = vmatpush3.bf16.msra.mxu1 %v7400_v19  ;;  %v7441_v13 = vld [vmem:[%s9718_s1 + $0x1b0] sm:$0xff]   ;;  %v7442_v14 = vld [vmem:[%s9718_s1 + $0x178] sm:$0xff]   ;;  %v7446_v19 = vld [vmem:[%s9718_s1 + $0x240] sm:$0xff]  }
  0x16   :  { %6659 = vmatprep.subr.bf16.mxu1 %v7403_v22  ;;  %v7443_v15 = vld [vmem:[%s9718_s1 + $0x138] sm:$0xff]   ;;  %v7447_v20 = vld [vmem:[%s9718_s1 + $0x200] sm:$0xff]   ;;  %v7453_v27 = vld [vmem:[%s9718_s1 + $0x288] sm:$0xff]  }
  0x17   :  { %6638 = vmatpush3.bf16.msra.mxu0 %v7402_v21  ;;  %v7444_v16 = vld [vmem:[%s9718_s1 + $0x1f8] sm:$0xff]   ;;  %v7448_v21 = vld [vmem:[%s9718_s1 + $0x2c0] sm:$0xff]   ;;  %v7467_v42 = vld [vmem:[%s9718_s1 + $0x228] sm:$0xff]  }
  0x18   :  { %6639 = vmatprep.subr.bf16.mxu0 %v7405_v24  ;;  %v7445_v17 = vld [vmem:[%s9718_s1 + $0x1b8] sm:$0xff]   ;;  %v7449_v22 = vld [vmem:[%s9718_s1 + $0x280] sm:$0xff]   ;;  %v7450_v24 = vld [vmem:[%s9718_s1 + $0x248] sm:$0xff]  }
  0x19   :  { %6660 = vmatpush3.bf16.msra.mxu1 %v7404_v23  ;;  %v1133_v23 = vcombine.high %v1117_v18, %v1117_v18  ;;  %v7458_v32 = vld [vmem:[%s9718_s1 + $0x258] sm:$0xff]   ;;  %v7462_v36 = vld [vmem:[%s9718_s1 + $0x260] sm:$0xff]   ;;  %v7468_v43 = vld [vmem:[%s9718_s1 + $0x2e8] sm:$0xff]  }
  0x1a   :  { %6661 = vmatprep.subr.bf16.mxu1 %v7407_v26  ;;  %v7452_v26 = vld [vmem:[%s9718_s1 + $0x2c8] sm:$0xff]   ;;  %v7459_v33 = vld [vmem:[%s9718_s1 + $0x218] sm:$0xff]   ;;  %v7464_v38 = vld [vmem:[%s9718_s1 + $0x2e0] sm:$0xff]  }
  0x1b   :  { %6640 = vmatpush3.bf16.msra.mxu0 %v7406_v25  ;;  %v7451_v25 = vld [vmem:[%s9718_s1 + $0x208] sm:$0xff]   ;;  %v7461_v35 = vld [vmem:[%s9718_s1 + $0x298] sm:$0xff]   ;;  %v7465_v39 = vld [vmem:[%s9718_s1 + $0x2a0] sm:$0xff]  }
  0x1c   :  { %6641 = vmatprep.subr.bf16.mxu0 %v7409_v29  ;;  %v7455_v29 = vld [vmem:[%s9718_s1 + $0x210] sm:$0xff]   ;;  %v7469_v44 = vld [vmem:[%s9718_s1 + $0x2a8] sm:$0xff]  }
  0x1d   :  { %6662 = vmatpush3.bf16.msra.mxu1 %v7408_v28  ;;  %v7454_v28 = vld [vmem:[%s9718_s1 + $0x250] sm:$0xff]   ;;  %v23_v46 = vld [vmem:[%s9717_s0 + $0x8] sm:$0xff] }
  0x1e   :  { %6663 = vmatprep.subr.bf16.mxu1 %v7411_v31  ;;  %v7457_v31 = vld [vmem:[%s9718_s1 + $0x290] sm:$0xff]   ;;  %v1143_v48 = vrot.slane %v23_v46, %v8076_v41 }
  0x1f   :  { %6642 = vmatpush3.bf16.msra.mxu0 %v7410_v30  ;;  %v7456_v30 = vld [vmem:[%s9718_s1 + $0x2d0] sm:$0xff]  }
  0x20   :  { %6671 = vmatprep.subr.bf16.mxu0 %v7414_v37  ;;  %v7463_v37 = vld [vmem:[%s9718_s1 + $0x220] sm:$0xff]  }
  0x21   :  { %6664 = vmatpush3.bf16.msra.mxu1 %v7413_v34  ;;  %v7460_v34 = vld [vmem:[%s9718_s1 + $0x2d8] sm:$0xff]  }
  0x22   :  { %6693 = vmatprep.subr.bf16.mxu1 %v7416_v40  ;;  %4711 = vmatmul.mubr.bf16.vlgmr.msra.gmra.mrb[0].mxu0 %v1110_v45  ;;  %v7466_v40 = vld [vmem:[%s9718_s1 + $0x268] sm:$0xff]   ;;  %v7470_v45 = vld [vmem:[%s9718_s1 + $0x270] sm:$0xff]  }
  0x23   :  { %6672 = vmatpush3.bf16.msra.mxu0 %v7415_v47  ;;  %4790 = vmatprep.mubr.bf16.mxu0 %v1131_v50  ;;  %v7471_v47 = vld [vmem:[%s9718_s1 + $0x230] sm:$0xff]  }
  0x24   :  { %4751 = vmatmul.mubr.bf16.vlgmr.msra.gmra.mrb[0].mxu1 %v1132_v51  ;;  %6673 = vmatprep.subr.bf16.mxu0 %v7418_v52  ;;  %v7472_v50 = vld [vmem:[%s9718_s1 + $0x2f0] sm:$0xff]   ;;  %v1151_v52 = vcombine.high %v1143_v48, %v1143_v48 }
  0x25   :  { %6694 = vmatpush3.bf16.msra.mxu1 %v7417_v49  ;;  %4830 = vmatprep.mubr.bf16.mxu1 %v1135_v56  ;;  %v1136_v49 = vcombine.high %v23_v46, %v23_v46  ;;  %v7473_v51 = vld [vmem:[%s9718_s1 + $0x2b0] sm:$0xff]  }
  0x26   :  { %6695 = vmatprep.subr.bf16.mxu1 %v7420_v55  ;;  %v7475_v55 = vld [vmem:[%s9718_s1 + $0x238] sm:$0xff]   ;;  %v1173_v56 = vrot.slane %v1151_v52, %v8076_v41  ;;  %v7521_v46 = vld [vmem:[%s9718_s1 + $0x4d0] sm:$0xff]   ;;  %v7527_v52 = vld [vmem:[%s9718_s1 + $0x460] sm:$0xff]  }
  0x27   :  { %6674 = vmatpush3.bf16.msra.mxu0 %v7419_v54  ;;  %v8268_v53 = vrot.slane %v1136_v49, %v8076_v41  ;;  %v7474_v54 = vld [vmem:[%s9718_s1 + $0x278] sm:$0xff]  }
  0x28   :  { %6675 = vmatprep.subr.bf16.mxu0 %v7422_v58  ;;  %v7476_v58 = vld [vmem:[%s9718_s1 + $0x2f8] sm:$0xff]  }
  0x29   :  { %6696 = vmatpush3.bf16.msra.mxu1 %v7421_v57  ;;  %v1152_v57 = vcombine.high %v8268_v53, %v8268_v53  ;;  %v7524_v49 = vld [vmem:[%s9718_s1 + $0x418] sm:$0xff]  }
  0x2a   :  { %6697 = vmatprep.subr.bf16.mxu1 %v7424_v60  ;;  %v1183_v60 = vcombine.high %v1173_v56, %v1173_v56 }
  0x2b   :  { %6676 = vmatpush3.bf16.msra.mxu0 %v7423_v59  ;;  %v7477_v59 = vld [vmem:[%s9718_s1 + $0x2b8] sm:$0xff]  }
  0x2c   :  { %6677 = vmatprep.subr.bf16.mxu0 %v7426_v62  ;;  %v7478_v62 = vld [vmem:[%s9718_s1 + $0x340] sm:$0xff]  }
  0x2d   :  { %6698 = vmatpush3.bf16.msra.mxu1 %v7425_v61  ;;  %v1159_v61 = vrot.slane %v1143_v48, %v8076_v41  ;;  %v7523_v48 = vld [vmem:[%s9718_s1 + $0x458] sm:$0xff]  }
  0x2e   :  { %6699 = vmatprep.subr.bf16.mxu1 %v7428_v0  ;;  %v1180_v0 = vrot.slane %v1152_v57, %v8076_v41  ;;  %v7532_v57 = vld [vmem:[%s9718_s1 + $0x428] sm:$0xff]  }
  0x2f   :  { %6678 = vmatpush3.bf16.msra.mxu0 %v7427_v63  ;;  %v7479_v63 = vld [vmem:[%s9718_s1 + $0x300] sm:$0xff]  }
  0x30   :  { %6679 = vmatprep.subr.bf16.mxu0 %v7430_v2  ;;  %v7481_v2 = vld [vmem:[%s9718_s1 + $0x380] sm:$0xff]  }
  0x31   :  { %6700 = vmatpush3.bf16.msra.mxu1 %v7429_v1  ;;  %v7480_v1 = vld [vmem:[%s9718_s1 + $0x3c0] sm:$0xff]  }
  0x32   :  { %6701 = vmatprep.subr.bf16.mxu1 %v7432_v4  ;;  %v7482_v4 = vld [vmem:[%s9718_s1 + $0x348] sm:$0xff]  }
  0x33   :  { %6680 = vmatpush3.bf16.msra.mxu0 %v7431_v3  ;;  %v1181_v3 = vcombine.high %v1159_v61, %v1159_v61 }
  0x34   :  { %6681 = vmatprep.subr.bf16.mxu0 %v7434_v6  ;;  %v1184_v6 = vcombine.high %v1180_v0, %v1180_v0 }
  0x35   :  { %6702 = vmatpush3.bf16.msra.mxu1 %v7433_v5  ;;  %v7483_v5 = vld [vmem:[%s9718_s1 + $0x308] sm:$0xff]  }
  0x36   :  { %6703 = vmatprep.subr.bf16.mxu1 %v7436_v8  ;;  %v7485_v8 = vld [vmem:[%s9718_s1 + $0x388] sm:$0xff]  }
  0x37   :  { %6682 = vmatpush3.bf16.msra.mxu0 %v7435_v7  ;;  %v7484_v7 = vld [vmem:[%s9718_s1 + $0x3c8] sm:$0xff]  }
  0x38   :  { %6683 = vmatprep.subr.bf16.mxu0 %v7438_v10  ;;  %v7487_v10 = vld [vmem:[%s9718_s1 + $0x310] sm:$0xff]  }
  0x39   :  { %6704 = vmatpush3.bf16.msra.mxu1 %v7437_v9  ;;  %v7486_v9 = vld [vmem:[%s9718_s1 + $0x350] sm:$0xff]  }
  0x3a   :  { %6705 = vmatprep.subr.bf16.mxu1 %v7440_v12  ;;  %v7489_v12 = vld [vmem:[%s9718_s1 + $0x390] sm:$0xff]  }
  0x3b   :  { %6684 = vmatpush3.bf16.msra.mxu0 %v7439_v11  ;;  %v7488_v11 = vld [vmem:[%s9718_s1 + $0x3d0] sm:$0xff]  }
  0x3c   :  { %6685 = vmatprep.subr.bf16.mxu0 %v7442_v14  ;;  %v7491_v14 = vld [vmem:[%s9718_s1 + $0x318] sm:$0xff]  }
  0x3d   :  { %6706 = vmatpush3.bf16.msra.mxu1 %v7441_v13  ;;  %v7490_v13 = vld [vmem:[%s9718_s1 + $0x358] sm:$0xff]  }
  0x3e   :  { %6707 = vmatprep.subr.bf16.mxu1 %v7444_v16  ;;  %v7493_v16 = vld [vmem:[%s9718_s1 + $0x398] sm:$0xff]  }
  0x3f   :  { %6686 = vmatpush3.bf16.msra.mxu0 %v7443_v15  ;;  %v7492_v15 = vld [vmem:[%s9718_s1 + $0x3d8] sm:$0xff]  }
  0x40   :  { %6715 = vmatprep.subr.bf16.mxu0 %v7446_v19  ;;  %v7496_v19 = vld [vmem:[%s9718_s1 + $0x3e0] sm:$0xff]  }
  0x41   :  { %6708 = vmatpush3.bf16.msra.mxu1 %v7445_v17  ;;  %v7494_v17 = vld [vmem:[%s9718_s1 + $0x360] sm:$0xff]  }
  0x42   :  { %4791 = vmatmul.mubr.bf16.vlgmr.msra.gmra.mrb[4].mxu0 %v1117_v18  ;;  %6737 = vmatprep.subr.bf16.mxu1 %v7448_v21  ;;  %v7495_v18 = vld [vmem:[%s9718_s1 + $0x320] sm:$0xff]   ;;  %v7498_v21 = vld [vmem:[%s9718_s1 + $0x368] sm:$0xff]  }
  0x43   :  { %6716 = vmatpush3.bf16.msra.mxu0 %v7447_v20  ;;  %4870 = vmatprep.mubr.bf16.mxu0 %v1173_v56  ;;  %v7497_v20 = vld [vmem:[%s9718_s1 + $0x3a0] sm:$0xff]   ;;  %v7531_v56 = vld [vmem:[%s9718_s1 + $0x468] sm:$0xff]  }
  0x44   :  { %4831 = vmatmul.mubr.bf16.vlgmr.msra.gmra.mrb[4].mxu1 %v1133_v23  ;;  %6717 = vmatprep.subr.bf16.mxu0 %v7450_v24  ;;  %v7500_v23 = vld [vmem:[%s9718_s1 + $0x3e8] sm:$0xff]  }
  0x45   :  { %6738 = vmatpush3.bf16.msra.mxu1 %v7449_v22  ;;  %4910 = vmatprep.mubr.bf16.mxu1 %v1183_v60  ;;  %v7499_v22 = vld [vmem:[%s9718_s1 + $0x328] sm:$0xff]   ;;  %v7535_v60 = vld [vmem:[%s9718_s1 + $0x470] sm:$0xff]  }
  0x46   :  { %6739 = vmatprep.subr.bf16.mxu1 %v7452_v26  ;;  %v7501_v24 = vld [vmem:[%s9718_s1 + $0x3a8] sm:$0xff]   ;;  %v7503_v26 = vld [vmem:[%s9718_s1 + $0x330] sm:$0xff]  }
  0x47   :  { %6718 = vmatpush3.bf16.msra.mxu0 %v7451_v25  ;;  %v7502_v25 = vld [vmem:[%s9718_s1 + $0x370] sm:$0xff]  }
  0x48   :  { %6719 = vmatprep.subr.bf16.mxu0 %v7454_v28  ;;  %v7505_v28 = vld [vmem:[%s9718_s1 + $0x3b0] sm:$0xff]  }
  0x49   :  { %6740 = vmatpush3.bf16.msra.mxu1 %v7453_v27  ;;  %v7504_v27 = vld [vmem:[%s9718_s1 + $0x3f0] sm:$0xff]  }
  0x4a   :  { %6741 = vmatprep.subr.bf16.mxu1 %v7456_v30  ;;  %v7507_v30 = vld [vmem:[%s9718_s1 + $0x338] sm:$0xff]  }
  0x4b   :  { %6720 = vmatpush3.bf16.msra.mxu0 %v7455_v29  ;;  %v7506_v29 = vld [vmem:[%s9718_s1 + $0x378] sm:$0xff]  }
  0x4c   :  { %6721 = vmatprep.subr.bf16.mxu0 %v7458_v32  ;;  %v7510_v32 = vld [vmem:[%s9718_s1 + $0x3b8] sm:$0xff]  }
  0x4d   :  { %6742 = vmatpush3.bf16.msra.mxu1 %v7457_v31  ;;  %v7508_v31 = vld [vmem:[%s9718_s1 + $0x3f8] sm:$0xff]  }
  0x4e   :  { %6743 = vmatprep.subr.bf16.mxu1 %v7460_v34  ;;  %v7511_v34 = vld [vmem:[%s9718_s1 + $0x440] sm:$0xff]  }
  0x4f   :  { %6722 = vmatpush3.bf16.msra.mxu0 %v7459_v33  ;;  %v1166_v33 = vrot.slane %v8268_v53, %v8076_v41  ;;  %v7528_v53 = vld [vmem:[%s9718_s1 + $0x420] sm:$0xff]  }
  0x50   :  { %6723 = vmatprep.subr.bf16.mxu0 %v7462_v36  ;;  %v7513_v36 = vld [vmem:[%s9718_s1 + $0x4c0] sm:$0xff]  }
  0x51   :  { %6744 = vmatpush3.bf16.msra.mxu1 %v7461_v35  ;;  %v7512_v35 = vld [vmem:[%s9718_s1 + $0x400] sm:$0xff]  }
  0x52   :  { %6745 = vmatprep.subr.bf16.mxu1 %v7464_v38  ;;  %v1182_v38 = vcombine.high %v1166_v33, %v1166_v33 }
  0x53   :  { %6724 = vmatpush3.bf16.msra.mxu0 %v7463_v37  ;;  %v7514_v37 = vld [vmem:[%s9718_s1 + $0x480] sm:$0xff]  }
  0x54   :  { %6725 = vmatprep.subr.bf16.mxu0 %v7466_v40  ;;  %v7516_v40 = vld [vmem:[%s9718_s1 + $0x408] sm:$0xff]  }
  0x55   :  { %6746 = vmatpush3.bf16.msra.mxu1 %v7465_v39  ;;  %v7515_v39 = vld [vmem:[%s9718_s1 + $0x448] sm:$0xff]  }
  0x56   :  { %6747 = vmatprep.subr.bf16.mxu1 %v7468_v43  ;;  %v7518_v43 = vld [vmem:[%s9718_s1 + $0x488] sm:$0xff]  }
  0x57   :  { %6726 = vmatpush3.bf16.msra.mxu0 %v7467_v42  ;;  %v7517_v42 = vld [vmem:[%s9718_s1 + $0x4c8] sm:$0xff]  }
  0x58   :  { %6727 = vmatprep.subr.bf16.mxu0 %v7470_v45  ;;  %v7520_v45 = vld [vmem:[%s9718_s1 + $0x410] sm:$0xff]  }
  0x59   :  { %6748 = vmatpush3.bf16.msra.mxu1 %v7469_v44  ;;  %v7519_v44 = vld [vmem:[%s9718_s1 + $0x450] sm:$0xff]  }
  0x5a   :  { %6749 = vmatprep.subr.bf16.mxu1 %v7472_v50  ;;  %v7525_v50 = vld [vmem:[%s9718_s1 + $0x4d8] sm:$0xff]  }
  0x5b   :  { %6728 = vmatpush3.bf16.msra.mxu0 %v7471_v47  ;;  %v7522_v47 = vld [vmem:[%s9718_s1 + $0x490] sm:$0xff]  }
  0x5c   :  { %6729 = vmatprep.subr.bf16.mxu0 %v7474_v54  ;;  %v7529_v54 = vld [vmem:[%s9718_s1 + $0x4e0] sm:$0xff]  }
  0x5d   :  { %6750 = vmatpush3.bf16.msra.mxu1 %v7473_v51  ;;  %v7526_v51 = vld [vmem:[%s9718_s1 + $0x498] sm:$0xff]  }
  0x5e   :  { %6751 = vmatprep.subr.bf16.mxu1 %v7476_v58  ;;  %v7533_v58 = vld [vmem:[%s9718_s1 + $0x4e8] sm:$0xff]  }
  0x5f   :  { %6730 = vmatpush3.bf16.msra.mxu0 %v7475_v55  ;;  %v7530_v55 = vld [vmem:[%s9718_s1 + $0x4a0] sm:$0xff]  }
  0x60   :  { %6759 = vmatprep.subr.bf16.mxu0 %v7478_v62  ;;  %v7536_v62 = vld [vmem:[%s9718_s1 + $0x430] sm:$0xff]  }
  0x61   :  { %6752 = vmatpush3.bf16.msra.mxu1 %v7477_v59  ;;  %v7534_v59 = vld [vmem:[%s9718_s1 + $0x4a8] sm:$0xff]  }
  0x62   :  { %4871 = vmatmul.mubr.bf16.vlgmr.msra.gmra.mrb[8].mxu0 %v1159_v61  ;;  %6781 = vmatprep.subr.bf16.mxu1 %v7480_v1  ;;  %v24_v61 = vld [vmem:[%s9717_s0 + $0x10] sm:$0xff] }
  0x63   :  { %6760 = vmatpush3.bf16.msra.mxu0 %v7479_v63  ;;  %4950 = vmatprep.mubr.bf16.mxu0 %v1180_v0  ;;  %v1192_v63 = vrot.slane %v24_v61, %v8076_v41  ;;  %v1185_v0 = vcombine.high %v24_v61, %v24_v61  ;;  %v7537_v1 = vld [vmem:[%s9718_s1 + $0x4f0] sm:$0xff]  }
  0x64   :  { %4911 = vmatmul.mubr.bf16.vlgmr.msra.gmra.mrb[8].mxu1 %v1181_v3  ;;  %6761 = vmatprep.subr.bf16.mxu0 %v7482_v4  ;;  %v7586_v61 = vld [vmem:[%s9718_s1 + $0x6d0] sm:$0xff]  }
  0x65   :  { %6782 = vmatpush3.bf16.msra.mxu1 %v7481_v2  ;;  %4990 = vmatprep.mubr.bf16.mxu1 %v1184_v6  ;;  %v7538_v2 = vld [vmem:[%s9718_s1 + $0x4b0] sm:$0xff]   ;;  %v1200_v3 = vcombine.high %v1192_v63, %v1192_v63  ;;  %v8474_v4 = vrot.slane %v1185_v0, %v8076_v41  ;;  %v7540_v6 = vld [vmem:[%s9718_s1 + $0x438] sm:$0xff]  }
  0x66   :  { %6783 = vmatprep.subr.bf16.mxu1 %v7484_v7  ;;  %v7589_v0 = vld [vmem:[%s9718_s1 + $0x618] sm:$0xff]  }
  0x67   :  { %6762 = vmatpush3.bf16.msra.mxu0 %v7483_v5  ;;  %v7539_v5 = vld [vmem:[%s9718_s1 + $0x478] sm:$0xff]   ;;  %v1222_v7 = vrot.slane %v1200_v3, %v8076_v41  ;;  %v7592_v3 = vld [vmem:[%s9718_s1 + $0x660] sm:$0xff]  }
  0x68   :  { %6763 = vmatprep.subr.bf16.mxu0 %v7486_v9  ;;  %v7541_v9 = vld [vmem:[%s9718_s1 + $0x4f8] sm:$0xff]  }
  0x69   :  { %6784 = vmatpush3.bf16.msra.mxu1 %v7485_v8  ;;  %v1201_v8 = vcombine.high %v8474_v4, %v8474_v4 }
  0x6a   :  { %6785 = vmatprep.subr.bf16.mxu1 %v7488_v11  ;;  %v1232_v11 = vcombine.high %v1222_v7, %v1222_v7 }
  0x6b   :  { %6764 = vmatpush3.bf16.msra.mxu0 %v7487_v10  ;;  %v7542_v10 = vld [vmem:[%s9718_s1 + $0x4b8] sm:$0xff]  }
  0x6c   :  { %6765 = vmatprep.subr.bf16.mxu0 %v7490_v13  ;;  %v7543_v13 = vld [vmem:[%s9718_s1 + $0x540] sm:$0xff]  }
  0x6d   :  { %6786 = vmatpush3.bf16.msra.mxu1 %v7489_v12  ;;  %v1208_v12 = vrot.slane %v1192_v63, %v8076_v41  ;;  %v7588_v63 = vld [vmem:[%s9718_s1 + $0x658] sm:$0xff]  }
  0x6e   :  { %6787 = vmatprep.subr.bf16.mxu1 %v7492_v15  ;;  %v1229_v15 = vrot.slane %v1201_v8, %v8076_v41  ;;  %v7597_v8 = vld [vmem:[%s9718_s1 + $0x628] sm:$0xff]  }
  0x6f   :  { %6766 = vmatpush3.bf16.msra.mxu0 %v7491_v14  ;;  %v7544_v14 = vld [vmem:[%s9718_s1 + $0x500] sm:$0xff]  }
  0x70   :  { %6767 = vmatprep.subr.bf16.mxu0 %v7494_v17  ;;  %v7546_v17 = vld [vmem:[%s9718_s1 + $0x580] sm:$0xff]  }
  0x71   :  { %6788 = vmatpush3.bf16.msra.mxu1 %v7493_v16  ;;  %v7545_v16 = vld [vmem:[%s9718_s1 + $0x5c0] sm:$0xff]  }
  0x72   :  { %6789 = vmatprep.subr.bf16.mxu1 %v7496_v19  ;;  %v7547_v19 = vld [vmem:[%s9718_s1 + $0x548] sm:$0xff]  }
  0x73   :  { %6768 = vmatpush3.bf16.msra.mxu0 %v7495_v18  ;;  %v1230_v18 = vcombine.high %v1208_v12, %v1208_v12 }
  0x74   :  { %6769 = vmatprep.subr.bf16.mxu0 %v7498_v21  ;;  %v1233_v21 = vcombine.high %v1229_v15, %v1229_v15 }
  0x75   :  { %6790 = vmatpush3.bf16.msra.mxu1 %v7497_v20  ;;  %v7548_v20 = vld [vmem:[%s9718_s1 + $0x508] sm:$0xff]  }
  0x76   :  { %6791 = vmatprep.subr.bf16.mxu1 %v7500_v23  ;;  %v7550_v23 = vld [vmem:[%s9718_s1 + $0x588] sm:$0xff]  }
  0x77   :  { %6770 = vmatpush3.bf16.msra.mxu0 %v7499_v22  ;;  %v7549_v22 = vld [vmem:[%s9718_s1 + $0x5c8] sm:$0xff]  }
  0x78   :  { %6771 = vmatprep.subr.bf16.mxu0 %v7502_v25  ;;  %v7552_v25 = vld [vmem:[%s9718_s1 + $0x510] sm:$0xff]  }
  0x79   :  { %6792 = vmatpush3.bf16.msra.mxu1 %v7501_v24  ;;  %v7551_v24 = vld [vmem:[%s9718_s1 + $0x550] sm:$0xff]  }
  0x7a   :  { %6793 = vmatprep.subr.bf16.mxu1 %v7504_v27  ;;  %v7554_v27 = vld [vmem:[%s9718_s1 + $0x590] sm:$0xff]  }
  0x7b   :  { %6772 = vmatpush3.bf16.msra.mxu0 %v7503_v26  ;;  %v7553_v26 = vld [vmem:[%s9718_s1 + $0x5d0] sm:$0xff]  }
  0x7c   :  { %6773 = vmatprep.subr.bf16.mxu0 %v7506_v29  ;;  %v7556_v29 = vld [vmem:[%s9718_s1 + $0x518] sm:$0xff]  }
  0x7d   :  { %6794 = vmatpush3.bf16.msra.mxu1 %v7505_v28  ;;  %v7555_v28 = vld [vmem:[%s9718_s1 + $0x558] sm:$0xff]  }
  0x7e   :  { %6795 = vmatprep.subr.bf16.mxu1 %v7508_v31  ;;  %v7558_v31 = vld [vmem:[%s9718_s1 + $0x598] sm:$0xff]  }
  0x7f   :  { %6774 = vmatpush3.bf16.msra.mxu0 %v7507_v30  ;;  %v7557_v30 = vld [vmem:[%s9718_s1 + $0x5d8] sm:$0xff]  }
  0x80   :  { %6803 = vmatprep.subr.bf16.mxu0 %v7511_v34  ;;  %v7561_v34 = vld [vmem:[%s9718_s1 + $0x5e0] sm:$0xff]  }
  0x81   :  { %6796 = vmatpush3.bf16.msra.mxu1 %v7510_v32  ;;  %v7559_v32 = vld [vmem:[%s9718_s1 + $0x560] sm:$0xff]  }
  0x82   :  { %4951 = vmatmul.mubr.bf16.vlgmr.msra.gmra.mrb[12].mxu0 %v1166_v33  ;;  %6825 = vmatprep.subr.bf16.mxu1 %v7513_v36  ;;  %v7560_v33 = vld [vmem:[%s9718_s1 + $0x520] sm:$0xff]   ;;  %v7563_v36 = vld [vmem:[%s9718_s1 + $0x568] sm:$0xff]  }
  0x83   :  { %6804 = vmatpush3.bf16.msra.mxu0 %v7512_v35  ;;  %5030 = vmatprep.mubr.bf16.mxu0 %v1222_v7  ;;  %v7562_v35 = vld [vmem:[%s9718_s1 + $0x5a0] sm:$0xff]   ;;  %v7596_v7 = vld [vmem:[%s9718_s1 + $0x668] sm:$0xff]  }
  0x84   :  { %4991 = vmatmul.mubr.bf16.vlgmr.msra.gmra.mrb[12].mxu1 %v1182_v38  ;;  %6805 = vmatprep.subr.bf16.mxu0 %v7515_v39  ;;  %v7565_v38 = vld [vmem:[%s9718_s1 + $0x5e8] sm:$0xff]  }
  0x85   :  { %6826 = vmatpush3.bf16.msra.mxu1 %v7514_v37  ;;  %5070 = vmatprep.mubr.bf16.mxu1 %v1232_v11  ;;  %v7564_v37 = vld [vmem:[%s9718_s1 + $0x528] sm:$0xff]   ;;  %v7600_v11 = vld [vmem:[%s9718_s1 + $0x670] sm:$0xff]  }
  0x86   :  { %6827 = vmatprep.subr.bf16.mxu1 %v7517_v42  ;;  %v7566_v39 = vld [vmem:[%s9718_s1 + $0x5a8] sm:$0xff]   ;;  %v7568_v42 = vld [vmem:[%s9718_s1 + $0x530] sm:$0xff]  }
  0x87   :  { %6806 = vmatpush3.bf16.msra.mxu0 %v7516_v40  ;;  %v7567_v40 = vld [vmem:[%s9718_s1 + $0x570] sm:$0xff]  }
  0x88   :  { %6807 = vmatprep.subr.bf16.mxu0 %v7519_v44  ;;  %v7570_v44 = vld [vmem:[%s9718_s1 + $0x5b0] sm:$0xff]  }
  0x89   :  { %6828 = vmatpush3.bf16.msra.mxu1 %v7518_v43  ;;  %v7569_v43 = vld [vmem:[%s9718_s1 + $0x5f0] sm:$0xff]  }
  0x8a   :  { %6829 = vmatprep.subr.bf16.mxu1 %v7521_v46  ;;  %v7572_v46 = vld [vmem:[%s9718_s1 + $0x538] sm:$0xff]  }
  0x8b   :  { %6808 = vmatpush3.bf16.msra.mxu0 %v7520_v45  ;;  %v7571_v45 = vld [vmem:[%s9718_s1 + $0x578] sm:$0xff]  }
  0x8c   :  { %6809 = vmatprep.subr.bf16.mxu0 %v7523_v48  ;;  %v7575_v48 = vld [vmem:[%s9718_s1 + $0x5b8] sm:$0xff]  }
  0x8d   :  { %6830 = vmatpush3.bf16.msra.mxu1 %v7522_v47  ;;  %v7573_v47 = vld [vmem:[%s9718_s1 + $0x5f8] sm:$0xff]  }
  0x8e   :  { %6831 = vmatprep.subr.bf16.mxu1 %v7525_v50  ;;  %v7576_v50 = vld [vmem:[%s9718_s1 + $0x640] sm:$0xff]  }
  0x8f   :  { %6810 = vmatpush3.bf16.msra.mxu0 %v7524_v49  ;;  %v1215_v49 = vrot.slane %v8474_v4, %v8076_v41  ;;  %v7593_v4 = vld [vmem:[%s9718_s1 + $0x620] sm:$0xff]  }
  0x90   :  { %6811 = vmatprep.subr.bf16.mxu0 %v7527_v52  ;;  %v7578_v52 = vld [vmem:[%s9718_s1 + $0x6c0] sm:$0xff]  }
  0x91   :  { %6832 = vmatpush3.bf16.msra.mxu1 %v7526_v51  ;;  %v7577_v51 = vld [vmem:[%s9718_s1 + $0x600] sm:$0xff]  }
  0x92   :  { %6833 = vmatprep.subr.bf16.mxu1 %v7529_v54  ;;  %v1231_v54 = vcombine.high %v1215_v49, %v1215_v49 }
  0x93   :  { %6812 = vmatpush3.bf16.msra.mxu0 %v7528_v53  ;;  %v7579_v53 = vld [vmem:[%s9718_s1 + $0x680] sm:$0xff]  }
  0x94   :  { %6813 = vmatprep.subr.bf16.mxu0 %v7531_v56  ;;  %v7581_v56 = vld [vmem:[%s9718_s1 + $0x608] sm:$0xff]  }
  0x95   :  { %6834 = vmatpush3.bf16.msra.mxu1 %v7530_v55  ;;  %v7580_v55 = vld [vmem:[%s9718_s1 + $0x648] sm:$0xff]  }
  0x96   :  { %6835 = vmatprep.subr.bf16.mxu1 %v7533_v58  ;;  %v7583_v58 = vld [vmem:[%s9718_s1 + $0x688] sm:$0xff]  }
  0x97   :  { %6814 = vmatpush3.bf16.msra.mxu0 %v7532_v57  ;;  %v7582_v57 = vld [vmem:[%s9718_s1 + $0x6c8] sm:$0xff]  }
  0x98   :  { %6815 = vmatprep.subr.bf16.mxu0 %v7535_v60  ;;  %v7585_v60 = vld [vmem:[%s9718_s1 + $0x610] sm:$0xff]  }
  0x99   :  { %6836 = vmatpush3.bf16.msra.mxu1 %v7534_v59  ;;  %v7584_v59 = vld [vmem:[%s9718_s1 + $0x650] sm:$0xff]  }
  0x9a   :  { %6837 = vmatprep.subr.bf16.mxu1 %v7537_v1  ;;  %v7590_v1 = vld [vmem:[%s9718_s1 + $0x6d8] sm:$0xff]  }
  0x9b   :  { %6816 = vmatpush3.bf16.msra.mxu0 %v7536_v62  ;;  %v7587_v62 = vld [vmem:[%s9718_s1 + $0x690] sm:$0xff]  }
  0x9c   :  { %6817 = vmatprep.subr.bf16.mxu0 %v7539_v5  ;;  %v7594_v5 = vld [vmem:[%s9718_s1 + $0x6e0] sm:$0xff]  }
  0x9d   :  { %6838 = vmatpush3.bf16.msra.mxu1 %v7538_v2  ;;  %v7591_v2 = vld [vmem:[%s9718_s1 + $0x698] sm:$0xff]  }
  0x9e   :  { %6839 = vmatprep.subr.bf16.mxu1 %v7541_v9  ;;  %v7598_v9 = vld [vmem:[%s9718_s1 + $0x6e8] sm:$0xff]  }
  0x9f   :  { %6818 = vmatpush3.bf16.msra.mxu0 %v7540_v6  ;;  %v7595_v6 = vld [vmem:[%s9718_s1 + $0x6a0] sm:$0xff]  }
  0xa0   :  { %6847 = vmatprep.subr.bf16.mxu0 %v7543_v13  ;;  %v7602_v13 = vld [vmem:[%s9718_s1 + $0x6f0] sm:$0xff]  }
  0xa1   :  { %6840 = vmatpush3.bf16.msra.mxu1 %v7542_v10  ;;  %v7599_v10 = vld [vmem:[%s9718_s1 + $0x6a8] sm:$0xff]  }
  0xa2   :  { %5031 = vmatmul.mubr.bf16.vlgmr.msra.gmra.mrb[16].mxu0 %v1208_v12  ;;  %6869 = vmatprep.subr.bf16.mxu1 %v7545_v16  ;;  %v25_v12 = vld [vmem:[%s9717_s0 + $0x18] sm:$0xff]  ;;  %v7601_v16 = vld [vmem:[%s9718_s1 + $0x630] sm:$0xff]  }
  0xa3   :  { %6848 = vmatpush3.bf16.msra.mxu0 %v7544_v14  ;;  %5110 = vmatprep.mubr.bf16.mxu0 %v1229_v15  ;;  %v1241_v14 = vrot.slane %v25_v12, %v8076_v41  ;;  %v1234_v15 = vcombine.high %v25_v12, %v25_v12  ;;  %v7640_v12 = vld [vmem:[%s9718_s1 + $0x7b8] sm:$0xff]  }
  0xa4   :  { %5071 = vmatmul.mubr.bf16.vlgmr.msra.gmra.mrb[16].mxu1 %v1230_v18  ;;  %6849 = vmatprep.subr.bf16.mxu0 %v7547_v19 }
  0xa5   :  { %6870 = vmatpush3.bf16.msra.mxu1 %v7546_v17  ;;  %5150 = vmatprep.mubr.bf16.mxu1 %v1233_v21  ;;  %v7604_v17 = vld [vmem:[%s9718_s1 + $0x678] sm:$0xff]   ;;  %v1249_v18 = vcombine.high %v1241_v14, %v1241_v14  ;;  %v8680_v19 = vrot.slane %v1234_v15, %v8076_v41  ;;  %v7642_v15 = vld [vmem:[%s9718_s1 + $0x800] sm:$0xff]  }
  0xa6   :  { %6871 = vmatprep.subr.bf16.mxu1 %v7549_v22  ;;  %v7606_v21 = vld [vmem:[%s9718_s1 + $0x6f8] sm:$0xff]  }
  0xa7   :  { %6850 = vmatpush3.bf16.msra.mxu0 %v7548_v20  ;;  %v7603_v20 = vld [vmem:[%s9718_s1 + $0x6b0] sm:$0xff]   ;;  %v1271_v22 = vrot.slane %v1249_v18, %v8076_v41 }
  0xa8   :  { %6851 = vmatprep.subr.bf16.mxu0 %v7551_v24  ;;  %v7605_v24 = vld [vmem:[%s9718_s1 + $0x638] sm:$0xff]  }
  0xa9   :  { %6872 = vmatpush3.bf16.msra.mxu1 %v7550_v23  ;;  %v1250_v23 = vcombine.high %v8680_v19, %v8680_v19 }
  0xaa   :  { %6873 = vmatprep.subr.bf16.mxu1 %v7553_v26  ;;  %v7608_v26 = vld [vmem:[%s9718_s1 + $0x740] sm:$0xff]  }
  0xab   :  { %6852 = vmatpush3.bf16.msra.mxu0 %v7552_v25  ;;  %v1257_v25 = vrot.slane %v1241_v14, %v8076_v41  ;;  %v7641_v14 = vld [vmem:[%s9718_s1 + $0x840] sm:$0xff]  }
  0xac   :  { %6853 = vmatprep.subr.bf16.mxu0 %v7555_v28  ;;  %v7607_v28 = vld [vmem:[%s9718_s1 + $0x6b8] sm:$0xff]  }
  0xad   :  { %6874 = vmatpush3.bf16.msra.mxu1 %v7554_v27  ;;  %v1281_v27 = vcombine.high %v1271_v22, %v1271_v22 }
  0xae   :  { %6875 = vmatprep.subr.bf16.mxu1 %v7557_v30  ;;  %v7610_v30 = vld [vmem:[%s9718_s1 + $0x7c0] sm:$0xff]  }
  0xaf   :  { %6854 = vmatpush3.bf16.msra.mxu0 %v7556_v29  ;;  %v1278_v29 = vrot.slane %v1250_v23, %v8076_v41  ;;  %v7649_v23 = vld [vmem:[%s9718_s1 + $0x850] sm:$0xff]  }
  0xb0   :  { %6855 = vmatprep.subr.bf16.mxu0 %v7559_v32  ;;  %v1279_v32 = vcombine.high %v1257_v25, %v1257_v25 }
  0xb1   :  { %6876 = vmatpush3.bf16.msra.mxu1 %v7558_v31  ;;  %v7609_v31 = vld [vmem:[%s9718_s1 + $0x700] sm:$0xff]  }
  0xb2   :  { %6877 = vmatprep.subr.bf16.mxu1 %v7561_v34  ;;  %v7611_v34 = vld [vmem:[%s9718_s1 + $0x780] sm:$0xff]  }
  0xb3   :  { %6856 = vmatpush3.bf16.msra.mxu0 %v7560_v33  ;;  %v7612_v33 = vld [vmem:[%s9718_s1 + $0x748] sm:$0xff]  }
  0xb4   :  { %6857 = vmatprep.subr.bf16.mxu0 %v7563_v36  ;;  %v7614_v36 = vld [vmem:[%s9718_s1 + $0x7c8] sm:$0xff]  }
  0xb5   :  { %6878 = vmatpush3.bf16.msra.mxu1 %v7562_v35  ;;  %v1282_v35 = vcombine.high %v1278_v29, %v1278_v29 }
  0xb6   :  { %6879 = vmatprep.subr.bf16.mxu1 %v7565_v38  ;;  %v7616_v38 = vld [vmem:[%s9718_s1 + $0x750] sm:$0xff]  }
  0xb7   :  { %6858 = vmatpush3.bf16.msra.mxu0 %v7564_v37  ;;  %v7613_v37 = vld [vmem:[%s9718_s1 + $0x708] sm:$0xff]  }
  0xb8   :  { %6859 = vmatprep.subr.bf16.mxu0 %v7567_v40  ;;  %v7618_v40 = vld [vmem:[%s9718_s1 + $0x7d0] sm:$0xff]  }
  0xb9   :  { %6880 = vmatpush3.bf16.msra.mxu1 %v7566_v39  ;;  %v7615_v39 = vld [vmem:[%s9718_s1 + $0x788] sm:$0xff]  }
  0xba   :  { %6881 = vmatprep.subr.bf16.mxu1 %v7569_v43  ;;  %v7620_v43 = vld [vmem:[%s9718_s1 + $0x758] sm:$0xff]  }
  0xbb   :  { %6860 = vmatpush3.bf16.msra.mxu0 %v7568_v42  ;;  %v7617_v42 = vld [vmem:[%s9718_s1 + $0x710] sm:$0xff]  }
  0xbc   :  { %6861 = vmatprep.subr.bf16.mxu0 %v7571_v45  ;;  %v7621_v45 = vld [vmem:[%s9718_s1 + $0x718] sm:$0xff]  }
  0xbd   :  { %6882 = vmatpush3.bf16.msra.mxu1 %v7570_v44  ;;  %v7619_v44 = vld [vmem:[%s9718_s1 + $0x790] sm:$0xff]  }
  0xbe   :  { %6883 = vmatprep.subr.bf16.mxu1 %v7573_v47  ;;  %v7623_v47 = vld [vmem:[%s9718_s1 + $0x798] sm:$0xff]  }
  0xbf   :  { %6862 = vmatpush3.bf16.msra.mxu0 %v7572_v46  ;;  %v7622_v46 = vld [vmem:[%s9718_s1 + $0x7d8] sm:$0xff]  }
  0xc0   :  { %6891 = vmatprep.subr.bf16.mxu0 %v7576_v50  ;;  %v7626_v50 = vld [vmem:[%s9718_s1 + $0x7e0] sm:$0xff]  }
  0xc1   :  { %6884 = vmatpush3.bf16.msra.mxu1 %v7575_v48  ;;  %v7624_v48 = vld [vmem:[%s9718_s1 + $0x760] sm:$0xff]  }
  0xc2   :  { %5111 = vmatmul.mubr.bf16.vlgmr.msra.gmra.mrb[20].mxu0 %v1215_v49  ;;  %6913 = vmatprep.subr.bf16.mxu1 %v7578_v52  ;;  %v7625_v49 = vld [vmem:[%s9718_s1 + $0x720] sm:$0xff]   ;;  %v7628_v52 = vld [vmem:[%s9718_s1 + $0x768] sm:$0xff]  }
  0xc3   :  { %6892 = vmatpush3.bf16.msra.mxu0 %v7577_v51  ;;  %5190 = vmatprep.mubr.bf16.mxu0 %v1271_v22  ;;  %v7627_v51 = vld [vmem:[%s9718_s1 + $0x7a0] sm:$0xff]   ;;  %v7648_v22 = vld [vmem:[%s9718_s1 + $0x888] sm:$0xff]  }
  0xc4   :  { %5151 = vmatmul.mubr.bf16.vlgmr.msra.gmra.mrb[20].mxu1 %v1231_v54  ;;  %6893 = vmatprep.subr.bf16.mxu0 %v7580_v55  ;;  %v7630_v54 = vld [vmem:[%s9718_s1 + $0x7e8] sm:$0xff]  }
  0xc5   :  { %6914 = vmatpush3.bf16.msra.mxu1 %v7579_v53  ;;  %5230 = vmatprep.mubr.bf16.mxu1 %v1281_v27  ;;  %v7629_v53 = vld [vmem:[%s9718_s1 + $0x728] sm:$0xff]   ;;  %v7653_v27 = vld [vmem:[%s9718_s1 + $0x858] sm:$0xff]  }
  0xc6   :  { %6915 = vmatprep.subr.bf16.mxu1 %v7582_v57  ;;  %v7631_v55 = vld [vmem:[%s9718_s1 + $0x7a8] sm:$0xff]   ;;  %v7632_v57 = vld [vmem:[%s9718_s1 + $0x770] sm:$0xff]  }
  0xc7   :  { %6894 = vmatpush3.bf16.msra.mxu0 %v7581_v56  ;;  %v6099_v56 = vld [vmem:[%s9719_s2] ss:$0 sm:$0xff] }
  0xc8   :  { %6895 = vmatprep.subr.bf16.mxu0 %v7584_v59  ;;  %v7633_v59 = vld [vmem:[%s9718_s1 + $0x730] sm:$0xff]  }
  0xc9   :  { %6916 = vmatpush3.bf16.msra.mxu1 %v7583_v58 }
  0xca   :  { %6917 = vmatprep.subr.bf16.mxu1 %v7586_v61  ;;  %v7634_v61 = vld [vmem:[%s9718_s1 + $0x7f0] sm:$0xff]  }
  0xcb   :  { %6896 = vmatpush3.bf16.msra.mxu0 %v7585_v60 }
  0xcc   :  { %6897 = vmatprep.subr.bf16.mxu0 %v7588_v63 }
  0xcd   :  { %6918 = vmatpush3.bf16.msra.mxu1 %v7587_v62 }
  0xce   :  { %6919 = vmatprep.subr.bf16.mxu1 %v7590_v1  ;;  %v7635_v1 = vld [vmem:[%s9718_s1 + $0x7b0] sm:$0xff]  }
  0xcf   :  { %6898 = vmatpush3.bf16.msra.mxu0 %v7589_v0 }
  0xd0   :  { %6899 = vmatprep.subr.bf16.mxu0 %v7592_v3 }
  0xd1   :  { %6920 = vmatpush3.bf16.msra.mxu1 %v7591_v2  ;;  %v7636_v2 = vld [vmem:[%s9718_s1 + $0x778] sm:$0xff]  }
  0xd2   :  { %6921 = vmatprep.subr.bf16.mxu1 %v7594_v5 }
  0xd3   :  { %6900 = vmatpush3.bf16.msra.mxu0 %v7593_v4 }
  0xd4   :  { %6901 = vmatprep.subr.bf16.mxu0 %v7596_v7  ;;  %v7637_v7 = vld [vmem:[%s9718_s1 + $0x738] sm:$0xff]  }
  0xd5   :  { %6922 = vmatpush3.bf16.msra.mxu1 %v7595_v6 }
  0xd6   :  { %6923 = vmatprep.subr.bf16.mxu1 %v7598_v9  ;;  %v7638_v9 = vld [vmem:[%s9718_s1 + $0x7f8] sm:$0xff]  }
  0xd7   :  { %6902 = vmatpush3.bf16.msra.mxu0 %v7597_v8 }
  0xd8   :  { %6903 = vmatprep.subr.bf16.mxu0 %v7600_v11 }
  0xd9   :  { %6924 = vmatpush3.bf16.msra.mxu1 %v7599_v10 }
  0xda   :  { %6925 = vmatprep.subr.bf16.mxu1 %v7602_v13  ;;  %v1264_v13 = vrot.slane %v8680_v19, %v8076_v41  ;;  %v7645_v19 = vld [vmem:[%s9718_s1 + $0x848] sm:$0xff]  }
  0xdb   :  { %6904 = vmatpush3.bf16.msra.mxu0 %v7601_v16  ;;  %v7643_v16 = vld [vmem:[%s9718_s1 + $0x8c0] sm:$0xff]  }
  0xdc   :  { %6905 = vmatprep.subr.bf16.mxu0 %v7604_v17  ;;  %v7644_v17 = vld [vmem:[%s9718_s1 + $0x880] sm:$0xff]   ;;  %v1280_v18 = vcombine.high %v1264_v13, %v1264_v13 }
  0xdd   :  { %6926 = vmatpush3.bf16.msra.mxu1 %v7603_v20  ;;  %v7646_v20 = vld [vmem:[%s9718_s1 + $0x808] sm:$0xff]  }
  0xde   :  { %6927 = vmatprep.subr.bf16.mxu1 %v7606_v21  ;;  %v7647_v21 = vld [vmem:[%s9718_s1 + $0x8c8] sm:$0xff]  }
  0xdf   :  { %6906 = vmatpush3.bf16.msra.mxu0 %v7605_v24  ;;  %v7650_v24 = vld [vmem:[%s9718_s1 + $0x810] sm:$0xff]  }
  0xe0   :  { %6935 = vmatprep.subr.bf16.mxu0 %v7608_v26  ;;  %v7652_v26 = vld [vmem:[%s9718_s1 + $0x890] sm:$0xff]  }
  0xe1   :  { %6928 = vmatpush3.bf16.msra.mxu1 %v7607_v28  ;;  %v7654_v28 = vld [vmem:[%s9718_s1 + $0x818] sm:$0xff]  }
  0xe2   :  { %5191 = vmatmul.mubr.bf16.vlgmr.msra.gmra.mrb[24].mxu0 %v1257_v25  ;;  %6957 = vmatprep.subr.bf16.mxu1 %v7610_v30  ;;  %v7651_v25 = vld [vmem:[%s9718_s1 + $0x8d0] sm:$0xff]   ;;  %v7656_v30 = vld [vmem:[%s9718_s1 + $0x898] sm:$0xff]  }
  0xe3   :  { %6936 = vmatpush3.bf16.msra.mxu0 %v7609_v31  ;;  %5270 = vmatprep.mubr.bf16.mxu0 %v1278_v29  ;;  %v7655_v29 = vld [vmem:[%s9718_s1 + $0x8d8] sm:$0xff]   ;;  %v7657_v31 = vld [vmem:[%s9718_s1 + $0x860] sm:$0xff]  }
  0xe4   :  { %5231 = vmatmul.mubr.bf16.vlgmr.msra.gmra.mrb[24].mxu1 %v1279_v32  ;;  %6937 = vmatprep.subr.bf16.mxu0 %v7612_v33  ;;  %v7658_v32 = vld [vmem:[%s9718_s1 + $0x820] sm:$0xff]  }
  0xe5   :  { %6958 = vmatpush3.bf16.msra.mxu1 %v7611_v34  ;;  %5310 = vmatprep.mubr.bf16.mxu1 %v1282_v35  ;;  %v7659_v33 = vld [vmem:[%s9718_s1 + $0x8e0] sm:$0xff]   ;;  %v7661_v35 = vld [vmem:[%s9718_s1 + $0x868] sm:$0xff]  }
  0xe6   :  { %6959 = vmatprep.subr.bf16.mxu1 %v7614_v36  ;;  %v7660_v34 = vld [vmem:[%s9718_s1 + $0x8a0] sm:$0xff]   ;;  %v7662_v36 = vld [vmem:[%s9718_s1 + $0x828] sm:$0xff]  }
  0xe7   :  { %6938 = vmatpush3.bf16.msra.mxu0 %v7613_v37  ;;  %v7663_v37 = vld [vmem:[%s9718_s1 + $0x8e8] sm:$0xff]  }
  0xe8   :  { %6939 = vmatprep.subr.bf16.mxu0 %v7616_v38  ;;  %v7664_v38 = vld [vmem:[%s9718_s1 + $0x8a8] sm:$0xff]  }
  0xe9   :  { %6960 = vmatpush3.bf16.msra.mxu1 %v7615_v39  ;;  %v7665_v39 = vld [vmem:[%s9718_s1 + $0x870] sm:$0xff]  }
  0xea   :  { %6961 = vmatprep.subr.bf16.mxu1 %v7618_v40 }
  0xeb   :  { %6940 = vmatpush3.bf16.msra.mxu0 %v7617_v42  ;;  %v7666_v42 = vld [vmem:[%s9718_s1 + $0x830] sm:$0xff]  }
  0xec   :  { %6941 = vmatprep.subr.bf16.mxu0 %v7620_v43  ;;  %v7667_v43 = vld [vmem:[%s9718_s1 + $0x8f0] sm:$0xff]  }
  0xed   :  { %6962 = vmatpush3.bf16.msra.mxu1 %v7619_v44 }
  0xee   :  { %6963 = vmatprep.subr.bf16.mxu1 %v7622_v46 }
  0xef   :  { %6942 = vmatpush3.bf16.msra.mxu0 %v7621_v45  ;;  %v26_v45 = vld [vmem:[%s9717_s0 + $0x20] sm:$0xff] }
  0xf0   :  { %6943 = vmatprep.subr.bf16.mxu0 %v7624_v48 }
  0xf1   :  { %6964 = vmatpush3.bf16.msra.mxu1 %v7623_v47 }
  0xf2   :  { %6965 = vmatprep.subr.bf16.mxu1 %v7626_v50  ;;  %v7669_v50 = vld [vmem:[%s9718_s1 + $0x878] sm:$0xff]  }
  0xf3   :  { %6944 = vmatpush3.bf16.msra.mxu0 %v7625_v49  ;;  %v7668_v49 = vld [vmem:[%s9718_s1 + $0x8b0] sm:$0xff]  }
  0xf4   :  { %6945 = vmatprep.subr.bf16.mxu0 %v7628_v52  ;;  %v1283_v52 = vcombine.high %v26_v45, %v26_v45 }
  0xf5   :  { %v6643_v58 = vpop.f32.mrb[0].mxu0  ;;  %6966 = vmatpush3.bf16.msra.mxu1 %v7627_v51  ;;  %v1290_v51 = vrot.slane %v26_v45, %v8076_v41 }
  0xf6   :  { %v6644_v60 = vpop.f32.mrb[1].mxu0  ;;  %6967 = vmatprep.subr.bf16.mxu1 %v7630_v54 }
  0xf7   :  { %v6645_v62 = vadd.f32 %v6644_v60, %v6643_v58  ;;  %v6646_v63 = vpop.f32.mrb[2].mxu0  ;;  %v6665_v0 = vpop.f32.mrb[0].mxu1  ;;  %6946 = vmatpush3.bf16.msra.mxu0 %v7629_v53  ;;  %v1298_v58 = vcombine.high %v1290_v51, %v1290_v51  ;;  %v7671_v60 = vld [vmem:[%s9718_s1 + $0x8f8] sm:$0xff]  }
  0xf8   :  { %v6647_v3 = vpop.f32.mrb[3].mxu0  ;;  %v6666_v4 = vpop.f32.mrb[1].mxu1  ;;  %6947 = vmatprep.subr.bf16.mxu0 %v7632_v57  ;;  %v7670_v57 = vld [vmem:[%s9718_s1 + $0x838] sm:$0xff]  }
  0xf9   :  { %v4713_v5 = vadd.f32 %v6645_v62, %v6099_v56  ;;  %v6667_v6 = vadd.f32 %v6666_v4, %v6665_v0  ;;  %6968 = vmatpush3.bf16.msra.mxu1 %v7631_v55  ;;  %v6668_v8 = vpop.f32.mrb[2].mxu1  ;;  %v8901_v62 = vrot.slane %v1283_v52, %v8076_v41  ;;  %v1320_v0 = vrot.slane %v1298_v58, %v8076_v41  ;;  %v7673_v3 = vld [vmem:[%s9718_s1 + $0x940] sm:$0xff]   ;;  %v7705_v52 = vld [vmem:[%s9718_s1 + $0x9b8] sm:$0xff]  }
  0xfa   :  { %6969 = vmatprep.subr.bf16.mxu1 %v7634_v61  ;;  %v6669_v10 = vpop.f32.mrb[3].mxu1 }
  0xfb   :  { %v8795_v11 = vadd.f32 %v6667_v6, %v4713_v5  ;;  %6948 = vmatpush3.bf16.msra.mxu0 %v7633_v59  ;;  %v1299_v4 = vcombine.high %v8901_v62, %v8901_v62  ;;  %v1330_v5 = vcombine.high %v1320_v0, %v1320_v0  ;;  %v7674_v6 = vld [vmem:[%s9718_s1 + $0x900] sm:$0xff]  }
  0xfc   :  { %6949 = vmatprep.subr.bf16.mxu0 %v7636_v2  ;;  %v1306_v2 = vrot.slane %v1290_v51, %v8076_v41 }
  0xfd   :  { %6970 = vmatpush3.bf16.msra.mxu1 %v7635_v1  ;;  %v7672_v1 = vld [vmem:[%s9718_s1 + $0x8b8] sm:$0xff]   ;;  %v1327_v8 = vrot.slane %v1299_v4, %v8076_v41 }
  0xfe   :  { %6971 = vmatprep.subr.bf16.mxu1 %v7638_v9  ;;  %v7676_v9 = vld [vmem:[%s9718_s1 + $0x980] sm:$0xff]   ;;  %v1328_v10 = vcombine.high %v1306_v2, %v1306_v2  ;;  %v7719_v4 = vld [vmem:[%s9718_s1 + $0xa18] sm:$0xff]  }
  0xff   :  { %6950 = vmatpush3.bf16.msra.mxu0 %v7637_v7  ;;  %v7675_v7 = vld [vmem:[%s9718_s1 + $0x9c0] sm:$0xff]  }
 0x100   :  { %6979 = vmatprep.subr.bf16.mxu0 %v7641_v14  ;;  %v7679_v14 = vld [vmem:[%s9718_s1 + $0x9c8] sm:$0xff]  }
 0x101   :  { %6972 = vmatpush3.bf16.msra.mxu1 %v7640_v12  ;;  %v7678_v12 = vld [vmem:[%s9718_s1 + $0x908] sm:$0xff]  }
 0x102   :  { %5271 = vmatmul.mubr.bf16.vlgmr.msra.gmra.mrb[28].mxu0 %v1264_v13  ;;  %7001 = vmatprep.subr.bf16.mxu1 %v7643_v16  ;;  %v1331_v13 = vcombine.high %v1327_v8, %v1327_v8  ;;  %v7681_v16 = vld [vmem:[%s9718_s1 + $0x950] sm:$0xff]  }
 0x103   :  { %6980 = vmatpush3.bf16.msra.mxu0 %v7642_v15  ;;  %5350 = vmatprep.mubr.bf16.mxu0 %v1320_v0  ;;  %v7680_v15 = vld [vmem:[%s9718_s1 + $0x988] sm:$0xff]   ;;  %v7715_v0 = vld [vmem:[%s9718_s1 + $0xa10] sm:$0xff]  }
 0x104   :  { %5311 = vmatmul.mubr.bf16.vlgmr.msra.gmra.mrb[28].mxu1 %v1280_v18  ;;  %6981 = vmatprep.subr.bf16.mxu0 %v7645_v19  ;;  %v7683_v18 = vld [vmem:[%s9718_s1 + $0x9d0] sm:$0xff]  }
 0x105   :  { %7002 = vmatpush3.bf16.msra.mxu1 %v7644_v17  ;;  %5390 = vmatprep.mubr.bf16.mxu1 %v1330_v5  ;;  %v7682_v17 = vld [vmem:[%s9718_s1 + $0x910] sm:$0xff]   ;;  %v7720_v5 = vld [vmem:[%s9718_s1 + $0xad8] sm:$0xff]  }
 0x106   :  { %7003 = vmatprep.subr.bf16.mxu1 %v7647_v21  ;;  %v7684_v19 = vld [vmem:[%s9718_s1 + $0x990] sm:$0xff]   ;;  %v7686_v21 = vld [vmem:[%s9718_s1 + $0x918] sm:$0xff]  }
 0x107   :  { %6982 = vmatpush3.bf16.msra.mxu0 %v7646_v20  ;;  %v7685_v20 = vld [vmem:[%s9718_s1 + $0x958] sm:$0xff]  }
 0x108   :  { %6983 = vmatprep.subr.bf16.mxu0 %v7649_v23  ;;  %v7688_v23 = vld [vmem:[%s9718_s1 + $0x998] sm:$0xff]  }
 0x109   :  { %7004 = vmatpush3.bf16.msra.mxu1 %v7648_v22  ;;  %v7687_v22 = vld [vmem:[%s9718_s1 + $0x9d8] sm:$0xff]  }
 0x10a   :  { %7005 = vmatprep.subr.bf16.mxu1 %v7651_v25  ;;  %v7690_v25 = vld [vmem:[%s9718_s1 + $0x920] sm:$0xff]  }
 0x10b   :  { %6984 = vmatpush3.bf16.msra.mxu0 %v7650_v24  ;;  %v7689_v24 = vld [vmem:[%s9718_s1 + $0x960] sm:$0xff]  }
 0x10c   :  { %6985 = vmatprep.subr.bf16.mxu0 %v7653_v27  ;;  %v7692_v27 = vld [vmem:[%s9718_s1 + $0x9a0] sm:$0xff]  }
 0x10d   :  { %7006 = vmatpush3.bf16.msra.mxu1 %v7652_v26  ;;  %v7691_v26 = vld [vmem:[%s9718_s1 + $0x9e0] sm:$0xff]  }
 0x10e   :  { %7007 = vmatprep.subr.bf16.mxu1 %v7655_v29  ;;  %v7694_v29 = vld [vmem:[%s9718_s1 + $0x928] sm:$0xff]  }
 0x10f   :  { %6986 = vmatpush3.bf16.msra.mxu0 %v7654_v28  ;;  %v7693_v28 = vld [vmem:[%s9718_s1 + $0x968] sm:$0xff]  }
 0x110   :  { %6987 = vmatprep.subr.bf16.mxu0 %v7657_v31  ;;  %v7696_v31 = vld [vmem:[%s9718_s1 + $0x9a8] sm:$0xff]  }
 0x111   :  { %7008 = vmatpush3.bf16.msra.mxu1 %v7656_v30  ;;  %v7695_v30 = vld [vmem:[%s9718_s1 + $0x9e8] sm:$0xff]  }
 0x112   :  { %7009 = vmatprep.subr.bf16.mxu1 %v7659_v33 }
 0x113   :  { %6988 = vmatpush3.bf16.msra.mxu0 %v7658_v32  ;;  %v7697_v32 = vld [vmem:[%s9718_s1 + $0x970] sm:$0xff]  }
 0x114   :  { %6989 = vmatprep.subr.bf16.mxu0 %v7661_v35 }
 0x115   :  { %v6687_v40 = vpop.f32.mrb[4].mxu0  ;;  %7010 = vmatpush3.bf16.msra.mxu1 %v7660_v34  ;;  %v7698_v34 = vld [vmem:[%s9718_s1 + $0x930] sm:$0xff]  }
 0x116   :  { %v6688_v44 = vpop.f32.mrb[5].mxu0  ;;  %7011 = vmatprep.subr.bf16.mxu1 %v7663_v37 }
 0x117   :  { %v6689_v46 = vadd.f32 %v6688_v44, %v6687_v40  ;;  %v6690_v47 = vpop.f32.mrb[6].mxu0  ;;  %v6709_v48 = vpop.f32.mrb[4].mxu1  ;;  %6990 = vmatpush3.bf16.msra.mxu0 %v7662_v36  ;;  %v7699_v36 = vld [vmem:[%s9718_s1 + $0x9f0] sm:$0xff]  }
 0x118   :  { %v6691_v53 = vpop.f32.mrb[7].mxu0  ;;  %v6710_v54 = vpop.f32.mrb[5].mxu1  ;;  %6991 = vmatprep.subr.bf16.mxu0 %v7665_v39  ;;  %v7700_v40 = vld [vmem:[%s9718_s1 + $0x9b0] sm:$0xff]   ;;  %v7702_v47 = vld [vmem:[%s9718_s1 + $0x938] sm:$0xff]  }
 0x119   :  { %v4793_v55 = vadd.f32 %v6689_v46, %v8795_v11  ;;  %v6711_v56 = vadd.f32 %v6710_v54, %v6709_v48  ;;  %7012 = vmatpush3.bf16.msra.mxu1 %v7664_v38  ;;  %v6712_v59 = vpop.f32.mrb[6].mxu1  ;;  %v7677_v11 = vld [vmem:[%s9718_s1 + $0x948] sm:$0xff]   ;;  %v1313_v53 = vrot.slane %v8901_v62, %v8076_v41  ;;  %v7706_v54 = vld [vmem:[%s9718_s1 + $0xa40] sm:$0xff]  }
 0x11a   :  { %7013 = vmatprep.subr.bf16.mxu1 %v7667_v43  ;;  %v6713_v61 = vpop.f32.mrb[7].mxu1  ;;  %v7710_v59 = vld [vmem:[%s9718_s1 + $0xa48] sm:$0xff]  }
 0x11b   :  { %v8903_v63 = vadd.f32 %v6711_v56, %v4793_v55  ;;  %6992 = vmatpush3.bf16.msra.mxu0 %v7666_v42  ;;  %v7701_v42 = vld [vmem:[%s9718_s1 + $0x978] sm:$0xff]   ;;  %v7707_v55 = vld [vmem:[%s9718_s1 + $0xa00] sm:$0xff]   ;;  %v1329_v58 = vcombine.high %v1313_v53, %v1313_v53  ;;  %v7712_v61 = vld [vmem:[%s9718_s1 + $0xac8] sm:$0xff]  }
 0x11c   :  { %6993 = vmatprep.subr.bf16.mxu0 %v7669_v50  ;;  %v7708_v56 = vld [vmem:[%s9718_s1 + $0xac0] sm:$0xff]   ;;  %v7713_v62 = vld [vmem:[%s9718_s1 + $0xa88] sm:$0xff]  }
 0x11d   :  { %7014 = vmatpush3.bf16.msra.mxu1 %v7668_v49  ;;  %v7703_v49 = vld [vmem:[%s9718_s1 + $0x9f8] sm:$0xff]  }
 0x11e   :  { %7015 = vmatprep.subr.bf16.mxu1 %v7671_v60  ;;  %v7711_v60 = vld [vmem:[%s9718_s1 + $0xa08] sm:$0xff]  }
 0x11f   :  { %6994 = vmatpush3.bf16.msra.mxu0 %v7670_v57  ;;  %v7709_v57 = vld [vmem:[%s9718_s1 + $0xa80] sm:$0xff]  }
 0x120   :  { %7023 = vmatprep.subr.bf16.mxu0 %v7673_v3  ;;  %v7718_v3 = vld [vmem:[%s9718_s1 + $0xa58] sm:$0xff]  }
 0x121   :  { %7016 = vmatpush3.bf16.msra.mxu1 %v7672_v1  ;;  %v7716_v1 = vld [vmem:[%s9718_s1 + $0xad0] sm:$0xff]  }
 0x122   :  { %5351 = vmatmul.mubr.bf16.vlgmr.msra.gmra.mrb[32].mxu0 %v1306_v2  ;;  %7045 = vmatprep.subr.bf16.mxu1 %v7675_v7  ;;  %v7717_v2 = vld [vmem:[%s9718_s1 + $0xa90] sm:$0xff]   ;;  %v7722_v7 = vld [vmem:[%s9718_s1 + $0xa60] sm:$0xff]  }
 0x123   :  { %7024 = vmatpush3.bf16.msra.mxu0 %v7674_v6  ;;  %5430 = vmatprep.mubr.bf16.mxu0 %v1327_v8  ;;  %v7721_v6 = vld [vmem:[%s9718_s1 + $0xa98] sm:$0xff]   ;;  %v7723_v8 = vld [vmem:[%s9718_s1 + $0xa20] sm:$0xff]  }
 0x124   :  { %5391 = vmatmul.mubr.bf16.vlgmr.msra.gmra.mrb[32].mxu1 %v1328_v10  ;;  %7025 = vmatprep.subr.bf16.mxu0 %v7677_v11  ;;  %v7725_v10 = vld [vmem:[%s9718_s1 + $0xaa0] sm:$0xff]   ;;  %v7726_v11 = vld [vmem:[%s9718_s1 + $0xa68] sm:$0xff]  }
 0x125   :  { %7046 = vmatpush3.bf16.msra.mxu1 %v7676_v9  ;;  %5470 = vmatprep.mubr.bf16.mxu1 %v1331_v13  ;;  %v7724_v9 = vld [vmem:[%s9718_s1 + $0xae0] sm:$0xff]   ;;  %v7728_v13 = vld [vmem:[%s9718_s1 + $0xae8] sm:$0xff]  }
 0x126   :  { %7047 = vmatprep.subr.bf16.mxu1 %v7679_v14  ;;  %v7729_v14 = vld [vmem:[%s9718_s1 + $0xaa8] sm:$0xff]  }
 0x127   :  { %7026 = vmatpush3.bf16.msra.mxu0 %v7678_v12  ;;  %v7727_v12 = vld [vmem:[%s9718_s1 + $0xa28] sm:$0xff]  }
 0x128   :  { %7027 = vmatprep.subr.bf16.mxu0 %v7681_v16 }
 0x129   :  { %7048 = vmatpush3.bf16.msra.mxu1 %v7680_v15  ;;  %v7730_v15 = vld [vmem:[%s9718_s1 + $0xa70] sm:$0xff]  }
 0x12a   :  { %7049 = vmatprep.subr.bf16.mxu1 %v7683_v18 }
 0x12b   :  { %7028 = vmatpush3.bf16.msra.mxu0 %v7682_v17  ;;  %v7731_v17 = vld [vmem:[%s9718_s1 + $0xa30] sm:$0xff]  }
 0x12c   :  { %7029 = vmatprep.subr.bf16.mxu0 %v7685_v20 }
 0x12d   :  { %7050 = vmatpush3.bf16.msra.mxu1 %v7684_v19  ;;  %v7732_v19 = vld [vmem:[%s9718_s1 + $0xaf0] sm:$0xff]  }
 0x12e   :  { %7051 = vmatprep.subr.bf16.mxu1 %v7687_v22 }
 0x12f   :  { %7030 = vmatpush3.bf16.msra.mxu0 %v7686_v21 }
 0x130   :  { %7031 = vmatprep.subr.bf16.mxu0 %v7689_v24  ;;  %v7734_v24 = vld [vmem:[%s9718_s1 + $0xa78] sm:$0xff]  }
 0x131   :  { %7052 = vmatpush3.bf16.msra.mxu1 %v7688_v23  ;;  %v7733_v23 = vld [vmem:[%s9718_s1 + $0xab0] sm:$0xff]  }
 0x132   :  { %7053 = vmatprep.subr.bf16.mxu1 %v7691_v26 }
 0x133   :  { %7032 = vmatpush3.bf16.msra.mxu0 %v7690_v25  ;;  %v27_v25 = vld [vmem:[%s9717_s0 + $0x28] sm:$0xff] }
 0x134   :  { %7033 = vmatprep.subr.bf16.mxu0 %v7693_v28  ;;  %v1339_v28 = vrot.slane %v27_v25, %v8076_v41 }
 0x135   :  { %v6731_v33 = vpop.f32.mrb[8].mxu0  ;;  %7054 = vmatpush3.bf16.msra.mxu1 %v7692_v27 }
 0x136   :  { %v6732_v35 = vpop.f32.mrb[9].mxu0  ;;  %7055 = vmatprep.subr.bf16.mxu1 %v7695_v30 }
 0x137   :  { %v6733_v37 = vadd.f32 %v6732_v35, %v6731_v33  ;;  %v6734_v38 = vpop.f32.mrb[10].mxu0  ;;  %v6753_v39 = vpop.f32.mrb[8].mxu1  ;;  %7034 = vmatpush3.bf16.msra.mxu0 %v7694_v29  ;;  %v1332_v29 = vcombine.high %v27_v25, %v27_v25  ;;  %v1347_v35 = vcombine.high %v1339_v28, %v1339_v28 }
 0x138   :  { %v6735_v43 = vpop.f32.mrb[11].mxu0  ;;  %v6754_v44 = vpop.f32.mrb[9].mxu1  ;;  %7035 = vmatprep.subr.bf16.mxu0 %v7697_v32  ;;  %v7735_v32 = vld [vmem:[%s9718_s1 + $0xa38] sm:$0xff]  }
 0x139   :  { %v4873_v45 = vadd.f32 %v6733_v37, %v8903_v63  ;;  %v6755_v46 = vadd.f32 %v6754_v44, %v6753_v39  ;;  %7056 = vmatpush3.bf16.msra.mxu1 %v7696_v31  ;;  %v6756_v48 = vpop.f32.mrb[10].mxu1  ;;  %v7714_v63 = vld [vmem:[%s9718_s1 + $0xa50] sm:$0xff]   ;;  %v9113_v37 = vrot.slane %v1332_v29, %v8076_v41  ;;  %v7737_v39 = vld [vmem:[%s9718_s1 + $0xab8] sm:$0xff]   ;;  %v7738_v43 = vld [vmem:[%s9718_s1 + $0xb40] sm:$0xff]  }
 0x13a   :  { %7057 = vmatprep.subr.bf16.mxu1 %v7699_v36  ;;  %v6757_v50 = vpop.f32.mrb[11].mxu1  ;;  %v7771_v29 = vld [vmem:[%s9718_s1 + $0xc40] sm:$0xff]  }
 0x13b   :  { %v9007_v51 = vadd.f32 %v6755_v46, %v4873_v45  ;;  %7036 = vmatpush3.bf16.msra.mxu0 %v7698_v34  ;;  %v7736_v34 = vld [vmem:[%s9718_s1 + $0xaf8] sm:$0xff]   ;;  %v1348_v44 = vcombine.high %v9113_v37, %v9113_v37  ;;  %v7739_v45 = vld [vmem:[%s9718_s1 + $0xb00] sm:$0xff]  }
 0x13c   :  { %7037 = vmatprep.subr.bf16.mxu0 %v7701_v42  ;;  %v1355_v42 = vrot.slane %v1339_v28, %v8076_v41  ;;  %v1362_v28 = vrot.slane %v9113_v37, %v8076_v41  ;;  %v7778_v37 = vld [vmem:[%s9718_s1 + $0xc88] sm:$0xff]  }
 0x13d   :  { %7058 = vmatpush3.bf16.msra.mxu1 %v7700_v40  ;;  %v1369_v40 = vrot.slane %v1347_v35, %v8076_v41  ;;  %v1376_v48 = vrot.slane %v1348_v44, %v8076_v41  ;;  %v7776_v35 = vld [vmem:[%s9718_s1 + $0xc08] sm:$0xff]   ;;  %v7784_v44 = vld [vmem:[%s9718_s1 + $0xc18] sm:$0xff]  }
 0x13e   :  { %7059 = vmatprep.subr.bf16.mxu1 %v7703_v49  ;;  %v7741_v49 = vld [vmem:[%s9718_s1 + $0xb80] sm:$0xff]   ;;  %v1377_v50 = vcombine.high %v1355_v42, %v1355_v42 }
 0x13f   :  { %7038 = vmatpush3.bf16.msra.mxu0 %v7702_v47  ;;  %v1379_v46 = vcombine.high %v1369_v40, %v1369_v40  ;;  %v7740_v47 = vld [vmem:[%s9718_s1 + $0xbc0] sm:$0xff]  }
 0x140   :  { %7067 = vmatprep.subr.bf16.mxu0 %v7706_v54  ;;  %v7744_v54 = vld [vmem:[%s9718_s1 + $0xbc8] sm:$0xff]  }
 0x141   :  { %7060 = vmatpush3.bf16.msra.mxu1 %v7705_v52  ;;  %v7743_v52 = vld [vmem:[%s9718_s1 + $0xb08] sm:$0xff]  }
 0x142   :  { %5431 = vmatmul.mubr.bf16.vlgmr.msra.gmra.mrb[36].mxu0 %v1313_v53  ;;  %7089 = vmatprep.subr.bf16.mxu1 %v7708_v56  ;;  %v1380_v53 = vcombine.high %v1376_v48, %v1376_v48  ;;  %v7746_v56 = vld [vmem:[%s9718_s1 + $0xb50] sm:$0xff]  }
 0x143   :  { %7068 = vmatpush3.bf16.msra.mxu0 %v7707_v55  ;;  %5510 = vmatprep.mubr.bf16.mxu0 %v1369_v40  ;;  %v7745_v55 = vld [vmem:[%s9718_s1 + $0xb88] sm:$0xff]   ;;  %v7781_v40 = vld [vmem:[%s9718_s1 + $0xcd0] sm:$0xff]  }
 0x144   :  { %5471 = vmatmul.mubr.bf16.vlgmr.msra.gmra.mrb[36].mxu1 %v1329_v58  ;;  %7069 = vmatprep.subr.bf16.mxu0 %v7710_v59  ;;  %v7748_v58 = vld [vmem:[%s9718_s1 + $0xbd0] sm:$0xff]  }
 0x145   :  { %7090 = vmatpush3.bf16.msra.mxu1 %v7709_v57  ;;  %5550 = vmatprep.mubr.bf16.mxu1 %v1379_v46  ;;  %v7747_v57 = vld [vmem:[%s9718_s1 + $0xb10] sm:$0xff]   ;;  %v7786_v46 = vld [vmem:[%s9718_s1 + $0xc98] sm:$0xff]  }
 0x146   :  { %7091 = vmatprep.subr.bf16.mxu1 %v7712_v61  ;;  %v7749_v59 = vld [vmem:[%s9718_s1 + $0xb90] sm:$0xff]   ;;  %v7751_v61 = vld [vmem:[%s9718_s1 + $0xb18] sm:$0xff]  }
 0x147   :  { %7070 = vmatpush3.bf16.msra.mxu0 %v7711_v60  ;;  %v7750_v60 = vld [vmem:[%s9718_s1 + $0xb58] sm:$0xff]  }
 0x148   :  { %7071 = vmatprep.subr.bf16.mxu0 %v7714_v63  ;;  %v7753_v63 = vld [vmem:[%s9718_s1 + $0xb98] sm:$0xff]  }
 0x149   :  { %7092 = vmatpush3.bf16.msra.mxu1 %v7713_v62  ;;  %v7752_v62 = vld [vmem:[%s9718_s1 + $0xbd8] sm:$0xff]  }
 0x14a   :  { %7093 = vmatprep.subr.bf16.mxu1 %v7716_v1  ;;  %v7755_v1 = vld [vmem:[%s9718_s1 + $0xb20] sm:$0xff]  }
 0x14b   :  { %7072 = vmatpush3.bf16.msra.mxu0 %v7715_v0  ;;  %v7754_v0 = vld [vmem:[%s9718_s1 + $0xb60] sm:$0xff]  }
 0x14c   :  { %7073 = vmatprep.subr.bf16.mxu0 %v7718_v3  ;;  %v7757_v3 = vld [vmem:[%s9718_s1 + $0xba0] sm:$0xff]  }
 0x14d   :  { %7094 = vmatpush3.bf16.msra.mxu1 %v7717_v2  ;;  %v7756_v2 = vld [vmem:[%s9718_s1 + $0xbe0] sm:$0xff]  }
 0x14e   :  { %7095 = vmatprep.subr.bf16.mxu1 %v7720_v5  ;;  %v7759_v5 = vld [vmem:[%s9718_s1 + $0xb28] sm:$0xff]  }
 0x14f   :  { %7074 = vmatpush3.bf16.msra.mxu0 %v7719_v4  ;;  %v7758_v4 = vld [vmem:[%s9718_s1 + $0xb68] sm:$0xff]  }
 0x150   :  { %7075 = vmatprep.subr.bf16.mxu0 %v7722_v7  ;;  %v7761_v7 = vld [vmem:[%s9718_s1 + $0xba8] sm:$0xff]  }
 0x151   :  { %7096 = vmatpush3.bf16.msra.mxu1 %v7721_v6  ;;  %v7760_v6 = vld [vmem:[%s9718_s1 + $0xbe8] sm:$0xff]  }
 0x152   :  { %7097 = vmatprep.subr.bf16.mxu1 %v7724_v9 }
 0x153   :  { %7076 = vmatpush3.bf16.msra.mxu0 %v7723_v8  ;;  %v7762_v8 = vld [vmem:[%s9718_s1 + $0xb70] sm:$0xff]  }
 0x154   :  { %7077 = vmatprep.subr.bf16.mxu0 %v7726_v11 }
 0x155   :  { %v6775_v16 = vpop.f32.mrb[12].mxu0  ;;  %7098 = vmatpush3.bf16.msra.mxu1 %v7725_v10  ;;  %v7763_v10 = vld [vmem:[%s9718_s1 + $0xb30] sm:$0xff]  }
 0x156   :  { %v6776_v18 = vpop.f32.mrb[13].mxu0  ;;  %7099 = vmatprep.subr.bf16.mxu1 %v7728_v13 }
 0x157   :  { %v6777_v20 = vadd.f32 %v6776_v18, %v6775_v16  ;;  %v6778_v21 = vpop.f32.mrb[14].mxu0  ;;  %v6797_v22 = vpop.f32.mrb[12].mxu1  ;;  %7078 = vmatpush3.bf16.msra.mxu0 %v7727_v12  ;;  %v7764_v12 = vld [vmem:[%s9718_s1 + $0xbf0] sm:$0xff]  }
 0x158   :  { %v6779_v26 = vpop.f32.mrb[15].mxu0  ;;  %v6798_v27 = vpop.f32.mrb[13].mxu1  ;;  %7079 = vmatprep.subr.bf16.mxu0 %v7730_v15  ;;  %v7765_v16 = vld [vmem:[%s9718_s1 + $0xbb0] sm:$0xff]  }
 0x159   :  { %v4953_v30 = vadd.f32 %v6777_v20, %v9007_v51  ;;  %v6799_v31 = vadd.f32 %v6798_v27, %v6797_v22  ;;  %7100 = vmatpush3.bf16.msra.mxu1 %v7729_v14  ;;  %v6800_v33 = vpop.f32.mrb[14].mxu1  ;;  %v7742_v51 = vld [vmem:[%s9718_s1 + $0xb48] sm:$0xff]   ;;  %v7767_v22 = vld [vmem:[%s9718_s1 + $0xb38] sm:$0xff]  }
 0x15a   :  { %7101 = vmatprep.subr.bf16.mxu1 %v7732_v19  ;;  %v6801_v36 = vpop.f32.mrb[15].mxu1  ;;  %v7770_v27 = vld [vmem:[%s9718_s1 + $0xbb8] sm:$0xff]   ;;  %v1378_v33 = vcombine.high %v1362_v28, %v1362_v28 }
 0x15b   :  { %v9115_v38 = vadd.f32 %v6799_v31, %v4953_v30  ;;  %7080 = vmatpush3.bf16.msra.mxu0 %v7731_v17  ;;  %v7766_v17 = vld [vmem:[%s9718_s1 + $0xb78] sm:$0xff]   ;;  %v7772_v30 = vld [vmem:[%s9718_s1 + $0xc00] sm:$0xff]   ;;  %v7777_v36 = vld [vmem:[%s9718_s1 + $0xcc8] sm:$0xff]  }
 0x15c   :  { %7081 = vmatprep.subr.bf16.mxu0 %v7734_v24  ;;  %v7768_v24 = vld [vmem:[%s9718_s1 + $0xbf8] sm:$0xff]   ;;  %v7773_v31 = vld [vmem:[%s9718_s1 + $0xcc0] sm:$0xff]  }
 0x15d   :  { %7102 = vmatpush3.bf16.msra.mxu1 %v7733_v23 }
 0x15e   :  { %7103 = vmatprep.subr.bf16.mxu1 %v7736_v34  ;;  %v7775_v34 = vld [vmem:[%s9718_s1 + $0xc48] sm:$0xff]  }
 0x15f   :  { %7082 = vmatpush3.bf16.msra.mxu0 %v7735_v32  ;;  %v7774_v32 = vld [vmem:[%s9718_s1 + $0xc80] sm:$0xff]  }
 0x160   :  { %7111 = vmatprep.subr.bf16.mxu0 %v7738_v43  ;;  %v7783_v43 = vld [vmem:[%s9718_s1 + $0xc58] sm:$0xff]  }
 0x161   :  { %7104 = vmatpush3.bf16.msra.mxu1 %v7737_v39  ;;  %v7780_v39 = vld [vmem:[%s9718_s1 + $0xc10] sm:$0xff]  }
 0x162   :  { %5511 = vmatmul.mubr.bf16.vlgmr.msra.gmra.mrb[40].mxu0 %v1355_v42  ;;  %7133 = vmatprep.subr.bf16.mxu1 %v7740_v47  ;;  %v7782_v42 = vld [vmem:[%s9718_s1 + $0xc90] sm:$0xff]   ;;  %v7787_v47 = vld [vmem:[%s9718_s1 + $0xc60] sm:$0xff]  }
 0x163   :  { %7112 = vmatpush3.bf16.msra.mxu0 %v7739_v45  ;;  %5590 = vmatprep.mubr.bf16.mxu0 %v1376_v48  ;;  %v7785_v45 = vld [vmem:[%s9718_s1 + $0xcd8] sm:$0xff]   ;;  %v7788_v48 = vld [vmem:[%s9718_s1 + $0xc20] sm:$0xff]  }
 0x164   :  { %5551 = vmatmul.mubr.bf16.vlgmr.msra.gmra.mrb[40].mxu1 %v1377_v50  ;;  %7113 = vmatprep.subr.bf16.mxu0 %v7742_v51  ;;  %v7790_v50 = vld [vmem:[%s9718_s1 + $0xca0] sm:$0xff]   ;;  %v7791_v51 = vld [vmem:[%s9718_s1 + $0xc68] sm:$0xff]  }
 0x165   :  { %7134 = vmatpush3.bf16.msra.mxu1 %v7741_v49  ;;  %5630 = vmatprep.mubr.bf16.mxu1 %v1380_v53  ;;  %v7789_v49 = vld [vmem:[%s9718_s1 + $0xce0] sm:$0xff]   ;;  %v7793_v53 = vld [vmem:[%s9718_s1 + $0xce8] sm:$0xff]  }
 0x166   :  { %7135 = vmatprep.subr.bf16.mxu1 %v7744_v54  ;;  %v7794_v54 = vld [vmem:[%s9718_s1 + $0xca8] sm:$0xff]  }
 0x167   :  { %7114 = vmatpush3.bf16.msra.mxu0 %v7743_v52  ;;  %v7792_v52 = vld [vmem:[%s9718_s1 + $0xc28] sm:$0xff]  }
 0x168   :  { %7115 = vmatprep.subr.bf16.mxu0 %v7746_v56 }
 0x169   :  { %7136 = vmatpush3.bf16.msra.mxu1 %v7745_v55  ;;  %v7795_v55 = vld [vmem:[%s9718_s1 + $0xc70] sm:$0xff]  }
 0x16a   :  { %7137 = vmatprep.subr.bf16.mxu1 %v7748_v58 }
 0x16b   :  { %7116 = vmatpush3.bf16.msra.mxu0 %v7747_v57  ;;  %v7796_v57 = vld [vmem:[%s9718_s1 + $0xc30] sm:$0xff]  }
 0x16c   :  { %7117 = vmatprep.subr.bf16.mxu0 %v7750_v60 }
 0x16d   :  { %7138 = vmatpush3.bf16.msra.mxu1 %v7749_v59  ;;  %v7797_v59 = vld [vmem:[%s9718_s1 + $0xcf0] sm:$0xff]  }
 0x16e   :  { %7139 = vmatprep.subr.bf16.mxu1 %v7752_v62 }
 0x16f   :  { %7118 = vmatpush3.bf16.msra.mxu0 %v7751_v61 }
 0x170   :  { %7119 = vmatprep.subr.bf16.mxu0 %v7754_v0 }
 0x171   :  { %7140 = vmatpush3.bf16.msra.mxu1 %v7753_v63  ;;  %v7798_v63 = vld [vmem:[%s9718_s1 + $0xcb0] sm:$0xff]  }
 0x172   :  { %7141 = vmatprep.subr.bf16.mxu1 %v7756_v2  ;;  %v7799_v2 = vld [vmem:[%s9718_s1 + $0xc78] sm:$0xff]  }
 0x173   :  { %7120 = vmatpush3.bf16.msra.mxu0 %v7755_v1 }
 0x174   :  { %7121 = vmatprep.subr.bf16.mxu0 %v7758_v4 }
 0x175   :  { %v6819_v9 = vpop.f32.mrb[16].mxu0  ;;  %7142 = vmatpush3.bf16.msra.mxu1 %v7757_v3  ;;  %v28_v3 = vld [vmem:[%s9717_s0 + $0x30] sm:$0xff] }
 0x176   :  { %v6820_v11 = vpop.f32.mrb[17].mxu0  ;;  %7143 = vmatprep.subr.bf16.mxu1 %v7760_v6  ;;  %v7800_v6 = vld [vmem:[%s9718_s1 + $0xc38] sm:$0xff]  }
 0x177   :  { %v6821_v13 = vadd.f32 %v6820_v11, %v6819_v9  ;;  %v6822_v14 = vpop.f32.mrb[18].mxu0  ;;  %v6841_v15 = vpop.f32.mrb[16].mxu1  ;;  %7122 = vmatpush3.bf16.msra.mxu0 %v7759_v5  ;;  %v1381_v9 = vcombine.high %v28_v3, %v28_v3 }
 0x178   :  { %v6823_v18 = vpop.f32.mrb[19].mxu0  ;;  %v6842_v19 = vpop.f32.mrb[17].mxu1  ;;  %7123 = vmatprep.subr.bf16.mxu0 %v7762_v8  ;;  %v7802_v14 = vld [vmem:[%s9718_s1 + $0xcb8] sm:$0xff]  }
 0x179   :  { %v5033_v20 = vadd.f32 %v6821_v13, %v9115_v38  ;;  %v6843_v21 = vadd.f32 %v6842_v19, %v6841_v15  ;;  %7144 = vmatpush3.bf16.msra.mxu1 %v7761_v7  ;;  %v6844_v23 = vpop.f32.mrb[18].mxu1  ;;  %v7779_v38 = vld [vmem:[%s9718_s1 + $0xc50] sm:$0xff]   ;;  %v1388_v7 = vrot.slane %v28_v3, %v8076_v41  ;;  %v9330_v15 = vrot.slane %v1381_v9, %v8076_v41  ;;  %v7804_v19 = vld [vmem:[%s9718_s1 + $0xd00] sm:$0xff]   ;;  %v7835_v3 = vld [vmem:[%s9718_s1 + $0xdb8] sm:$0xff]  }
 0x17a   :  { %7145 = vmatprep.subr.bf16.mxu1 %v7764_v12  ;;  %v6845_v25 = vpop.f32.mrb[19].mxu1  ;;  %v7806_v23 = vld [vmem:[%s9718_s1 + $0xd80] sm:$0xff]  }
 0x17b   :  { %v9219_v26 = vadd.f32 %v6843_v21, %v5033_v20  ;;  %7124 = vmatpush3.bf16.msra.mxu0 %v7763_v10  ;;  %v7801_v10 = vld [vmem:[%s9718_s1 + $0xcf8] sm:$0xff]   ;;  %v1396_v13 = vcombine.high %v1388_v7, %v1388_v7  ;;  %v1397_v20 = vcombine.high %v9330_v15, %v9330_v15  ;;  %v7805_v21 = vld [vmem:[%s9718_s1 + $0xdc0] sm:$0xff]  }
 0x17c   :  { %7125 = vmatprep.subr.bf16.mxu0 %v7766_v17  ;;  %v7803_v17 = vld [vmem:[%s9718_s1 + $0xd40] sm:$0xff]  }
 0x17d   :  { %7146 = vmatpush3.bf16.msra.mxu1 %v7765_v16  ;;  %v1404_v16 = vrot.slane %v1388_v7, %v8076_v41  ;;  %v1418_v18 = vrot.slane %v1396_v13, %v8076_v41  ;;  %v7838_v7 = vld [vmem:[%s9718_s1 + $0xec0] sm:$0xff]   ;;  %v7843_v13 = vld [vmem:[%s9718_s1 + $0xe88] sm:$0xff]  }
 0x17e   :  { %7147 = vmatprep.subr.bf16.mxu1 %v7768_v24  ;;  %v1425_v24 = vrot.slane %v1397_v20, %v8076_v41  ;;  %v7850_v20 = vld [vmem:[%s9718_s1 + $0xed8] sm:$0xff]  }
 0x17f   :  { %7126 = vmatpush3.bf16.msra.mxu0 %v7767_v22  ;;  %v1428_v22 = vcombine.high %v1418_v18, %v1418_v18  ;;  %v1426_v25 = vcombine.high %v1404_v16, %v1404_v16 }
 0x180   :  { %7155 = vmatprep.subr.bf16.mxu0 %v7771_v29  ;;  %v7809_v29 = vld [vmem:[%s9718_s1 + $0xdc8] sm:$0xff]  }
 0x181   :  { %7148 = vmatpush3.bf16.msra.mxu1 %v7770_v27  ;;  %v7808_v27 = vld [vmem:[%s9718_s1 + $0xd08] sm:$0xff]  }
 0x182   :  { %5591 = vmatmul.mubr.bf16.vlgmr.msra.gmra.mrb[44].mxu0 %v1362_v28  ;;  %7177 = vmatprep.subr.bf16.mxu1 %v7773_v31  ;;  %v1429_v28 = vcombine.high %v1425_v24, %v1425_v24  ;;  %v7811_v31 = vld [vmem:[%s9718_s1 + $0xd50] sm:$0xff]  }
 0x183   :  { %7156 = vmatpush3.bf16.msra.mxu0 %v7772_v30  ;;  %5670 = vmatprep.mubr.bf16.mxu0 %v1418_v18  ;;  %v7810_v30 = vld [vmem:[%s9718_s1 + $0xd88] sm:$0xff]   ;;  %v7848_v18 = vld [vmem:[%s9718_s1 + $0xe58] sm:$0xff]  }
 0x184   :  { %5631 = vmatmul.mubr.bf16.vlgmr.msra.gmra.mrb[44].mxu1 %v1378_v33  ;;  %7157 = vmatprep.subr.bf16.mxu0 %v7775_v34  ;;  %v7813_v33 = vld [vmem:[%s9718_s1 + $0xdd0] sm:$0xff]  }
 0x185   :  { %7178 = vmatpush3.bf16.msra.mxu1 %v7774_v32  ;;  %5710 = vmatprep.mubr.bf16.mxu1 %v1428_v22  ;;  %v7812_v32 = vld [vmem:[%s9718_s1 + $0xd10] sm:$0xff]   ;;  %v7852_v22 = vld [vmem:[%s9718_s1 + $0xe60] sm:$0xff]  }
 0x186   :  { %7179 = vmatprep.subr.bf16.mxu1 %v7777_v36  ;;  %v7814_v34 = vld [vmem:[%s9718_s1 + $0xd90] sm:$0xff]   ;;  %v7816_v36 = vld [vmem:[%s9718_s1 + $0xd18] sm:$0xff]  }
 0x187   :  { %7158 = vmatpush3.bf16.msra.mxu0 %v7776_v35  ;;  %v7815_v35 = vld [vmem:[%s9718_s1 + $0xd58] sm:$0xff]  }
 0x188   :  { %7159 = vmatprep.subr.bf16.mxu0 %v7779_v38  ;;  %v7818_v38 = vld [vmem:[%s9718_s1 + $0xd98] sm:$0xff]  }
 0x189   :  { %7180 = vmatpush3.bf16.msra.mxu1 %v7778_v37  ;;  %v7817_v37 = vld [vmem:[%s9718_s1 + $0xdd8] sm:$0xff]  }
 0x18a   :  { %7181 = vmatprep.subr.bf16.mxu1 %v7781_v40  ;;  %v7820_v40 = vld [vmem:[%s9718_s1 + $0xd20] sm:$0xff]  }
 0x18b   :  { %7160 = vmatpush3.bf16.msra.mxu0 %v7780_v39  ;;  %v7819_v39 = vld [vmem:[%s9718_s1 + $0xd60] sm:$0xff]  }
 0x18c   :  { %7161 = vmatprep.subr.bf16.mxu0 %v7783_v43  ;;  %v7822_v43 = vld [vmem:[%s9718_s1 + $0xda0] sm:$0xff]  }
 0x18d   :  { %7182 = vmatpush3.bf16.msra.mxu1 %v7782_v42  ;;  %v7821_v42 = vld [vmem:[%s9718_s1 + $0xde0] sm:$0xff]  }
 0x18e   :  { %7183 = vmatprep.subr.bf16.mxu1 %v7785_v45  ;;  %v7824_v45 = vld [vmem:[%s9718_s1 + $0xd28] sm:$0xff]  }
 0x18f   :  { %7162 = vmatpush3.bf16.msra.mxu0 %v7784_v44  ;;  %v7823_v44 = vld [vmem:[%s9718_s1 + $0xd68] sm:$0xff]  }
 0x190   :  { %7163 = vmatprep.subr.bf16.mxu0 %v7787_v47  ;;  %v7826_v47 = vld [vmem:[%s9718_s1 + $0xda8] sm:$0xff]  }
 0x191   :  { %7184 = vmatpush3.bf16.msra.mxu1 %v7786_v46  ;;  %v7825_v46 = vld [vmem:[%s9718_s1 + $0xde8] sm:$0xff]  }
 0x192   :  { %7185 = vmatprep.subr.bf16.mxu1 %v7789_v49 }
 0x193   :  { %7164 = vmatpush3.bf16.msra.mxu0 %v7788_v48  ;;  %v7827_v48 = vld [vmem:[%s9718_s1 + $0xd70] sm:$0xff]  }
 0x194   :  { %7165 = vmatprep.subr.bf16.mxu0 %v7791_v51 }
 0x195   :  { %v6863_v56 = vpop.f32.mrb[20].mxu0  ;;  %7186 = vmatpush3.bf16.msra.mxu1 %v7790_v50  ;;  %v7828_v50 = vld [vmem:[%s9718_s1 + $0xd30] sm:$0xff]  }
 0x196   :  { %v6864_v58 = vpop.f32.mrb[21].mxu0  ;;  %7187 = vmatprep.subr.bf16.mxu1 %v7793_v53 }
 0x197   :  { %v6865_v60 = vadd.f32 %v6864_v58, %v6863_v56  ;;  %v6866_v61 = vpop.f32.mrb[22].mxu0  ;;  %v6885_v62 = vpop.f32.mrb[20].mxu1  ;;  %7166 = vmatpush3.bf16.msra.mxu0 %v7792_v52  ;;  %v7829_v52 = vld [vmem:[%s9718_s1 + $0xdf0] sm:$0xff]  }
 0x198   :  { %v6867_v0 = vpop.f32.mrb[23].mxu0  ;;  %v6886_v1 = vpop.f32.mrb[21].mxu1  ;;  %7167 = vmatprep.subr.bf16.mxu0 %v7795_v55  ;;  %v7830_v56 = vld [vmem:[%s9718_s1 + $0xdb0] sm:$0xff]  }
 0x199   :  { %v5113_v4 = vadd.f32 %v6865_v60, %v9219_v26  ;;  %v6887_v5 = vadd.f32 %v6886_v1, %v6885_v62  ;;  %7188 = vmatpush3.bf16.msra.mxu1 %v7794_v54  ;;  %v6888_v8 = vpop.f32.mrb[22].mxu1  ;;  %v7807_v26 = vld [vmem:[%s9718_s1 + $0xd48] sm:$0xff]   ;;  %v7832_v62 = vld [vmem:[%s9718_s1 + $0xd38] sm:$0xff]  }
 0x19a   :  { %7189 = vmatprep.subr.bf16.mxu1 %v7797_v59  ;;  %v6889_v11 = vpop.f32.mrb[23].mxu1  ;;  %v7833_v0 = vld [vmem:[%s9718_s1 + $0xdf8] sm:$0xff]   ;;  %v7839_v8 = vld [vmem:[%s9718_s1 + $0xe80] sm:$0xff]  }
 0x19b   :  { %v9324_v12 = vadd.f32 %v6887_v5, %v5113_v4  ;;  %7168 = vmatpush3.bf16.msra.mxu0 %v7796_v57  ;;  %v7831_v57 = vld [vmem:[%s9718_s1 + $0xd78] sm:$0xff]   ;;  %v1411_v4 = vrot.slane %v9330_v15, %v8076_v41  ;;  %v7836_v5 = vld [vmem:[%s9718_s1 + $0xe40] sm:$0xff]   ;;  %v7841_v11 = vld [vmem:[%s9718_s1 + $0xe08] sm:$0xff]  }
 0x19c   :  { %7169 = vmatprep.subr.bf16.mxu0 %v7799_v2  ;;  %v7845_v15 = vld [vmem:[%s9718_s1 + $0xe10] sm:$0xff]  }
 0x19d   :  { %7190 = vmatpush3.bf16.msra.mxu1 %v7798_v63  ;;  %v1427_v9 = vcombine.high %v1411_v4, %v1411_v4 }
 0x19e   :  { %7191 = vmatprep.subr.bf16.mxu1 %v7801_v10  ;;  %v7840_v10 = vld [vmem:[%s9718_s1 + $0xe48] sm:$0xff]  }
 0x19f   :  { %7170 = vmatpush3.bf16.msra.mxu0 %v7800_v6  ;;  %v7837_v6 = vld [vmem:[%s9718_s1 + $0xe00] sm:$0xff]  }
 0x1a0   :  { %7199 = vmatprep.subr.bf16.mxu0 %v7803_v17  ;;  %v7847_v17 = vld [vmem:[%s9718_s1 + $0xe90] sm:$0xff]  }
 0x1a1   :  { %7192 = vmatpush3.bf16.msra.mxu1 %v7802_v14  ;;  %v7844_v14 = vld [vmem:[%s9718_s1 + $0xe50] sm:$0xff]  }
 0x1a2   :  { %5671 = vmatmul.mubr.bf16.vlgmr.msra.gmra.mrb[48].mxu0 %v1404_v16  ;;  %7221 = vmatprep.subr.bf16.mxu1 %v7805_v21  ;;  %v7846_v16 = vld [vmem:[%s9718_s1 + $0xed0] sm:$0xff]   ;;  %v7851_v21 = vld [vmem:[%s9718_s1 + $0xe98] sm:$0xff]  }
 0x1a3   :  { %7200 = vmatpush3.bf16.msra.mxu0 %v7804_v19  ;;  %5750 = vmatprep.mubr.bf16.mxu0 %v1425_v24  ;;  %v7849_v19 = vld [vmem:[%s9718_s1 + $0xe18] sm:$0xff]   ;;  %v7854_v24 = vld [vmem:[%s9718_s1 + $0xee0] sm:$0xff]  }
 0x1a4   :  { %5711 = vmatmul.mubr.bf16.vlgmr.msra.gmra.mrb[48].mxu1 %v1426_v25  ;;  %7201 = vmatprep.subr.bf16.mxu0 %v7807_v26  ;;  %v7855_v25 = vld [vmem:[%s9718_s1 + $0xea0] sm:$0xff]   ;;  %v7856_v26 = vld [vmem:[%s9718_s1 + $0xe68] sm:$0xff]  }
 0x1a5   :  { %7222 = vmatpush3.bf16.msra.mxu1 %v7806_v23  ;;  %5790 = vmatprep.mubr.bf16.mxu1 %v1429_v28  ;;  %v7853_v23 = vld [vmem:[%s9718_s1 + $0xe20] sm:$0xff]   ;;  %v7858_v28 = vld [vmem:[%s9718_s1 + $0xee8] sm:$0xff]  }
 0x1a6   :  { %7223 = vmatprep.subr.bf16.mxu1 %v7809_v29  ;;  %v7859_v29 = vld [vmem:[%s9718_s1 + $0xea8] sm:$0xff]  }
 0x1a7   :  { %7202 = vmatpush3.bf16.msra.mxu0 %v7808_v27  ;;  %v7857_v27 = vld [vmem:[%s9718_s1 + $0xe28] sm:$0xff]  }
 0x1a8   :  { %7203 = vmatprep.subr.bf16.mxu0 %v7811_v31 }
 0x1a9   :  { %7224 = vmatpush3.bf16.msra.mxu1 %v7810_v30  ;;  %v7860_v30 = vld [vmem:[%s9718_s1 + $0xe70] sm:$0xff]  }
 0x1aa   :  { %7225 = vmatprep.subr.bf16.mxu1 %v7813_v33 }
 0x1ab   :  { %7204 = vmatpush3.bf16.msra.mxu0 %v7812_v32  ;;  %v7861_v32 = vld [vmem:[%s9718_s1 + $0xe30] sm:$0xff]  }
 0x1ac   :  { %7205 = vmatprep.subr.bf16.mxu0 %v7815_v35 }
 0x1ad   :  { %7226 = vmatpush3.bf16.msra.mxu1 %v7814_v34  ;;  %v7862_v34 = vld [vmem:[%s9718_s1 + $0xef0] sm:$0xff]  }
 0x1ae   :  { %7227 = vmatprep.subr.bf16.mxu1 %v7817_v37 }
 0x1af   :  { %7206 = vmatpush3.bf16.msra.mxu0 %v7816_v36 }
 0x1b0   :  { %7207 = vmatprep.subr.bf16.mxu0 %v7819_v39 }
 0x1b1   :  { %7228 = vmatpush3.bf16.msra.mxu1 %v7818_v38 }
 0x1b2   :  { %7229 = vmatprep.subr.bf16.mxu1 %v7821_v42  ;;  %v7864_v42 = vld [vmem:[%s9718_s1 + $0xe78] sm:$0xff]  }
 0x1b3   :  { %7208 = vmatpush3.bf16.msra.mxu0 %v7820_v40  ;;  %v7863_v40 = vld [vmem:[%s9718_s1 + $0xeb0] sm:$0xff]  }
 0x1b4   :  { %7209 = vmatprep.subr.bf16.mxu0 %v7823_v44 }
 0x1b5   :  { %v6907_v49 = vpop.f32.mrb[24].mxu0  ;;  %7230 = vmatpush3.bf16.msra.mxu1 %v7822_v43 }
 0x1b6   :  { %v6908_v51 = vpop.f32.mrb[25].mxu0  ;;  %7231 = vmatprep.subr.bf16.mxu1 %v7825_v46 }
 0x1b7   :  { %v6909_v53 = vadd.f32 %v6908_v51, %v6907_v49  ;;  %v6910_v54 = vpop.f32.mrb[26].mxu0  ;;  %v6929_v55 = vpop.f32.mrb[24].mxu1  ;;  %7210 = vmatpush3.bf16.msra.mxu0 %v7824_v45  ;;  %v29_v45 = vld [vmem:[%s9717_s0 + $0x38] sm:$0xff] }
 0x1b8   :  { %v6911_v58 = vpop.f32.mrb[27].mxu0  ;;  %v6930_v59 = vpop.f32.mrb[25].mxu1  ;;  %7211 = vmatprep.subr.bf16.mxu0 %v7827_v48  ;;  %v1437_v48 = vrot.slane %v29_v45, %v8076_v41 }
 0x1b9   :  { %v5193_v60 = vadd.f32 %v6909_v53, %v9324_v12  ;;  %v6931_v61 = vadd.f32 %v6930_v59, %v6929_v55  ;;  %7232 = vmatpush3.bf16.msra.mxu1 %v7826_v47  ;;  %v6932_v63 = vpop.f32.mrb[26].mxu1  ;;  %v7842_v12 = vld [vmem:[%s9718_s1 + $0xec8] sm:$0xff]   ;;  %v7866_v47 = vld [vmem:[%s9718_s1 + $0xef8] sm:$0xff]   ;;  %v7868_v55 = vld [vmem:[%s9718_s1 + $0xf40] sm:$0xff]  }
 0x1ba   :  { %7233 = vmatprep.subr.bf16.mxu1 %v7829_v52  ;;  %v6933_v1 = vpop.f32.mrb[27].mxu1  ;;  %v7865_v52 = vld [vmem:[%s9718_s1 + $0xe38] sm:$0xff]   ;;  %v1445_v53 = vcombine.high %v1437_v48, %v1437_v48  ;;  %v1453_v54 = vrot.slane %v1437_v48, %v8076_v41  ;;  %v7869_v59 = vld [vmem:[%s9718_s1 + $0xf00] sm:$0xff]   ;;  %v7902_v48 = vld [vmem:[%s9718_s1 + $0x1008] sm:$0xff]  }
 0x1bb   :  { %v9431_v2 = vadd.f32 %v6931_v61, %v5193_v60  ;;  %7212 = vmatpush3.bf16.msra.mxu0 %v7828_v50  ;;  %v1430_v50 = vcombine.high %v29_v45, %v29_v45  ;;  %v7870_v61 = vld [vmem:[%s9718_s1 + $0xfc0] sm:$0xff]  }
 0x1bc   :  { %7213 = vmatprep.subr.bf16.mxu0 %v7831_v57  ;;  %v7867_v57 = vld [vmem:[%s9718_s1 + $0xeb8] sm:$0xff]   ;;  %v1467_v58 = vrot.slane %v1445_v53, %v8076_v41  ;;  %v1475_v63 = vcombine.high %v1453_v54, %v1453_v54  ;;  %v7901_v45 = vld [vmem:[%s9718_s1 + $0x1000] sm:$0xff]  }
 0x1bd   :  { %7234 = vmatpush3.bf16.msra.mxu1 %v7830_v56  ;;  %v9543_v56 = vrot.slane %v1430_v50, %v8076_v41 }
 0x1be   :  { %7235 = vmatprep.subr.bf16.mxu1 %v7833_v0  ;;  %v7872_v0 = vld [vmem:[%s9718_s1 + $0xf48] sm:$0xff]  }
 0x1bf   :  { %7214 = vmatpush3.bf16.msra.mxu0 %v7832_v62  ;;  %v1446_v60 = vcombine.high %v9543_v56, %v9543_v56  ;;  %v1477_v62 = vcombine.high %v1467_v58, %v1467_v58 }
 0x1c0   :  { %7243 = vmatprep.subr.bf16.mxu0 %v7836_v5  ;;  %v7873_v5 = vld [vmem:[%s9718_s1 + $0xf08] sm:$0xff]  }
 0x1c1   :  { %7236 = vmatpush3.bf16.msra.mxu1 %v7835_v3  ;;  %v1474_v1 = vrot.slane %v1446_v60, %v8076_v41  ;;  %v7874_v3 = vld [vmem:[%s9718_s1 + $0xfc8] sm:$0xff]  }
 0x1c2   :  { %5751 = vmatmul.mubr.bf16.vlgmr.msra.gmra.mrb[52].mxu0 %v1411_v4  ;;  %7265 = vmatprep.subr.bf16.mxu1 %v7838_v7  ;;  %v7875_v7 = vld [vmem:[%s9718_s1 + $0xf88] sm:$0xff]  }
 0x1c3   :  { %7244 = vmatpush3.bf16.msra.mxu0 %v7837_v6  ;;  %5830 = vmatprep.mubr.bf16.mxu0 %v1467_v58  ;;  %v1478_v4 = vcombine.high %v1474_v1, %v1474_v1  ;;  %v7876_v6 = vld [vmem:[%s9718_s1 + $0xf50] sm:$0xff]  }
 0x1c4   :  { %5791 = vmatmul.mubr.bf16.vlgmr.msra.gmra.mrb[52].mxu1 %v1427_v9  ;;  %7245 = vmatprep.subr.bf16.mxu0 %v7840_v10  ;;  %v7877_v9 = vld [vmem:[%s9718_s1 + $0xf10] sm:$0xff]   ;;  %v7880_v10 = vld [vmem:[%s9718_s1 + $0xf58] sm:$0xff]  }
 0x1c5   :  { %7266 = vmatpush3.bf16.msra.mxu1 %v7839_v8  ;;  %5870 = vmatprep.mubr.bf16.mxu1 %v1477_v62  ;;  %v7878_v8 = vld [vmem:[%s9718_s1 + $0xfd0] sm:$0xff]  }
 0x1c6   :  { %7267 = vmatprep.subr.bf16.mxu1 %v7842_v12  ;;  %v7882_v12 = vld [vmem:[%s9718_s1 + $0xfd8] sm:$0xff]  }
 0x1c7   :  { %7246 = vmatpush3.bf16.msra.mxu0 %v7841_v11  ;;  %v7879_v11 = vld [vmem:[%s9718_s1 + $0xf90] sm:$0xff]  }
 0x1c8   :  { %7247 = vmatprep.subr.bf16.mxu0 %v7844_v14  ;;  %v7884_v14 = vld [vmem:[%s9718_s1 + $0xf60] sm:$0xff]  }
 0x1c9   :  { %7268 = vmatpush3.bf16.msra.mxu1 %v7843_v13  ;;  %v7881_v13 = vld [vmem:[%s9718_s1 + $0xf18] sm:$0xff]  }
 0x1ca   :  { %7269 = vmatprep.subr.bf16.mxu1 %v7846_v16  ;;  %v7886_v16 = vld [vmem:[%s9718_s1 + $0xfe0] sm:$0xff]  }
 0x1cb   :  { %7248 = vmatpush3.bf16.msra.mxu0 %v7845_v15  ;;  %v7883_v15 = vld [vmem:[%s9718_s1 + $0xf98] sm:$0xff]  }
 0x1cc   :  { %7249 = vmatprep.subr.bf16.mxu0 %v7848_v18  ;;  %v7888_v18 = vld [vmem:[%s9718_s1 + $0xf68] sm:$0xff]  }
 0x1cd   :  { %7270 = vmatpush3.bf16.msra.mxu1 %v7847_v17  ;;  %v7885_v17 = vld [vmem:[%s9718_s1 + $0xf20] sm:$0xff]  }
 0x1ce   :  { %7271 = vmatprep.subr.bf16.mxu1 %v7850_v20  ;;  %v7890_v20 = vld [vmem:[%s9718_s1 + $0xfe8] sm:$0xff]  }
 0x1cf   :  { %7250 = vmatpush3.bf16.msra.mxu0 %v7849_v19  ;;  %v7887_v19 = vld [vmem:[%s9718_s1 + $0xfa0] sm:$0xff]  }
 0x1d0   :  { %7251 = vmatprep.subr.bf16.mxu0 %v7852_v22  ;;  %v7892_v22 = vld [vmem:[%s9718_s1 + $0xf70] sm:$0xff]  }
 0x1d1   :  { %7272 = vmatpush3.bf16.msra.mxu1 %v7851_v21  ;;  %v7889_v21 = vld [vmem:[%s9718_s1 + $0xf28] sm:$0xff]  }
 0x1d2   :  { %7273 = vmatprep.subr.bf16.mxu1 %v7854_v24  ;;  %v7891_v24 = vld [vmem:[%s9718_s1 + $0xfa8] sm:$0xff]  }
 0x1d3   :  { %7252 = vmatpush3.bf16.msra.mxu0 %v7853_v23 }
 0x1d4   :  { %7253 = vmatprep.subr.bf16.mxu0 %v7856_v26  ;;  %v7894_v26 = vld [vmem:[%s9718_s1 + $0xff0] sm:$0xff]  }
 0x1d5   :  { %v6951_v31 = vpop.f32.mrb[28].mxu0  ;;  %7274 = vmatpush3.bf16.msra.mxu1 %v7855_v25 }
 0x1d6   :  { %v6952_v33 = vpop.f32.mrb[29].mxu0  ;;  %7275 = vmatprep.subr.bf16.mxu1 %v7858_v28 }
 0x1d7   :  { %v6953_v35 = vadd.f32 %v6952_v33, %v6951_v31  ;;  %v6954_v36 = vpop.f32.mrb[30].mxu0  ;;  %v6973_v37 = vpop.f32.mrb[28].mxu1  ;;  %7254 = vmatpush3.bf16.msra.mxu0 %v7857_v27  ;;  %v7896_v31 = vld [vmem:[%s9718_s1 + $0xf78] sm:$0xff]  }
 0x1d8   :  { %v6955_v38 = vpop.f32.mrb[31].mxu0  ;;  %v6974_v39 = vpop.f32.mrb[29].mxu1  ;;  %7255 = vmatprep.subr.bf16.mxu0 %v7860_v30  ;;  %v7893_v30 = vld [vmem:[%s9718_s1 + $0xf30] sm:$0xff]  }
 0x1d9   :  { %v5273_v43 = vadd.f32 %v6953_v35, %v9431_v2  ;;  %v6975_v44 = vadd.f32 %v6974_v39, %v6973_v37  ;;  %7276 = vmatpush3.bf16.msra.mxu1 %v7859_v29  ;;  %v6976_v46 = vpop.f32.mrb[30].mxu1  ;;  %v7871_v2 = vld [vmem:[%s9718_s1 + $0xf80] sm:$0xff]   ;;  %v7895_v36 = vld [vmem:[%s9718_s1 + $0xfb0] sm:$0xff]   ;;  %v7898_v38 = vld [vmem:[%s9718_s1 + $0xff8] sm:$0xff]  }
 0x1da   :  { %7277 = vmatprep.subr.bf16.mxu1 %v7862_v34  ;;  %v6977_v49 = vpop.f32.mrb[31].mxu1  ;;  %v7938_v46 = vmov 0.0  }
 0x1db   :  { %v9533_v51 = vadd.f32 %v6975_v44, %v5273_v43  ;;  %7256 = vmatpush3.bf16.msra.mxu0 %v7861_v32  ;;  %v1460_v43 = vrot.slane %v9543_v56, %v8076_v41  ;;  %v7900_v44 = vld [vmem:[%s9718_s1 + $0xfb8] sm:$0xff]  }
 0x1dc   :  { %7257 = vmatprep.subr.bf16.mxu0 %v7864_v42  ;;  %v7897_v42 = vld [vmem:[%s9718_s1 + $0xf38] sm:$0xff]  }
 0x1dd   :  { %7278 = vmatpush3.bf16.msra.mxu1 %v7863_v40 }
 0x1de   :  { %7279 = vmatprep.subr.bf16.mxu1 %v7866_v47  ;;  %v1476_v47 = vcombine.high %v1460_v43, %v1460_v43 }
 0x1df   :  { %7258 = vmatpush3.bf16.msra.mxu0 %v7865_v52 }
 0x1e0   :  { %7287 = vmatprep.subr.bf16.mxu0 %v7868_v55 }
 0x1e1   :  { %7280 = vmatpush3.bf16.msra.mxu1 %v7867_v57 }
 0x1e2   :  { %5831 = vmatmul.mubr.bf16.vlgmr.msra.gmra.mrb[56].mxu0 %v1453_v54  ;;  %7309 = vmatprep.subr.bf16.mxu1 %v7870_v61 }
 0x1e3   :  { %7288 = vmatpush3.bf16.msra.mxu0 %v7869_v59  ;;  %5910 = vmatprep.mubr.bf16.mxu0 %v1474_v1 }
 0x1e4   :  { %5871 = vmatmul.mubr.bf16.vlgmr.msra.gmra.mrb[56].mxu1 %v1475_v63  ;;  %7289 = vmatprep.subr.bf16.mxu0 %v7872_v0 }
 0x1e5   :  { %7310 = vmatpush3.bf16.msra.mxu1 %v7871_v2  ;;  %5950 = vmatprep.mubr.bf16.mxu1 %v1478_v4 }
 0x1e6   :  { %7311 = vmatprep.subr.bf16.mxu1 %v7874_v3 }
 0x1e7   :  { %7290 = vmatpush3.bf16.msra.mxu0 %v7873_v5 }
 0x1e8   :  { %7291 = vmatprep.subr.bf16.mxu0 %v7876_v6 }
 0x1e9   :  { %7312 = vmatpush3.bf16.msra.mxu1 %v7875_v7 }
 0x1ea   :  { %7313 = vmatprep.subr.bf16.mxu1 %v7878_v8 }
 0x1eb   :  { %7292 = vmatpush3.bf16.msra.mxu0 %v7877_v9 }
 0x1ec   :  { %7293 = vmatprep.subr.bf16.mxu0 %v7880_v10 }
 0x1ed   :  { %7314 = vmatpush3.bf16.msra.mxu1 %v7879_v11 }
 0x1ee   :  { %7315 = vmatprep.subr.bf16.mxu1 %v7882_v12 }
 0x1ef   :  { %7294 = vmatpush3.bf16.msra.mxu0 %v7881_v13 }
 0x1f0   :  { %7295 = vmatprep.subr.bf16.mxu0 %v7884_v14 }
 0x1f1   :  { %7316 = vmatpush3.bf16.msra.mxu1 %v7883_v15 }
 0x1f2   :  { %7317 = vmatprep.subr.bf16.mxu1 %v7886_v16 }
 0x1f3   :  { %7296 = vmatpush3.bf16.msra.mxu0 %v7885_v17 }
 0x1f4   :  { %7297 = vmatprep.subr.bf16.mxu0 %v7888_v18 }
 0x1f5   :  { %v6995_v23 = vpop.f32.mrb[32].mxu0  ;;  %7318 = vmatpush3.bf16.msra.mxu1 %v7887_v19 }
 0x1f6   :  { %v6996_v25 = vpop.f32.mrb[33].mxu0  ;;  %7319 = vmatprep.subr.bf16.mxu1 %v7890_v20 }
 0x1f7   :  { %v6997_v27 = vadd.f32 %v6996_v25, %v6995_v23  ;;  %v6998_v28 = vpop.f32.mrb[34].mxu0  ;;  %v7017_v29 = vpop.f32.mrb[32].mxu1  ;;  %7298 = vmatpush3.bf16.msra.mxu0 %v7889_v21 }
 0x1f8   :  { %v6999_v32 = vpop.f32.mrb[35].mxu0  ;;  %v7018_v33 = vpop.f32.mrb[33].mxu1  ;;  %7299 = vmatprep.subr.bf16.mxu0 %v7892_v22 }
 0x1f9   :  { %v5353_v34 = vadd.f32 %v6997_v27, %v9533_v51  ;;  %v7019_v35 = vadd.f32 %v7018_v33, %v7017_v29  ;;  %7320 = vmatpush3.bf16.msra.mxu1 %v7891_v24  ;;  %v7020_v37 = vpop.f32.mrb[34].mxu1 }
 0x1fa   :  { %7321 = vmatprep.subr.bf16.mxu1 %v7894_v26  ;;  %v7021_v39 = vpop.f32.mrb[35].mxu1 }
 0x1fb   :  { %v5393_v40 = vadd.f32 %v7019_v35, %v5353_v34  ;;  %7300 = vmatpush3.bf16.msra.mxu0 %v7893_v30 }
 0x1fc   :  { %7301 = vmatprep.subr.bf16.mxu0 %v7896_v31 }
 0x1fd   :  { %7322 = vmatpush3.bf16.msra.mxu1 %v7895_v36 }
 0x1fe   :  { %7323 = vmatprep.subr.bf16.mxu1 %v7898_v38 }
 0x1ff   :  { %7302 = vmatpush3.bf16.msra.mxu0 %v7897_v42 }
 0x200   :  { %7345 = vmatprep.subr.bf16.mxu0 %v7938_v46 }
 0x201   :  { %7324 = vmatpush3.bf16.msra.mxu1 %v7900_v44 }
 0x202   :  { %5911 = vmatmul.mubr.bf16.vlgmr.msra.gmra.mrb[60].mxu0 %v1460_v43  ;;  %7365 = vmatprep.subr.bf16.mxu1 %v7938_v46 }
 0x203   :  { %7346 = vmatpush3.bf16.msra.mxu0 %v7901_v45  ;;  %7361 = vmatprep.mubr.msk.bf16.mxu0 %vm7939_vm0, %v7938_v46 }
 0x204   :  { %5951 = vmatmul.mubr.bf16.vlgmr.msra.gmra.mrb[60].mxu1 %v1476_v47  ;;  %7347 = vmatprep.subr.bf16.mxu0 %v7938_v46 }
 0x205   :  { %7373 = vmatprep.mubr.msk.bf16.mxu1 %vm7939_vm0, %v7938_v46 }
 0x206   :  { %10 = vsyncpa [#allocation3], 0  ;;  %v7903_v49 = vld [vmem:[%s9718_s1 + $0x1010] sm:$0xff]   ;;  %v7904_v50 = vld [vmem:[%s9718_s1 + $0x1018] sm:$0xff]   ;;  %vm6039_vm1 = vcmask 523264   ;;  %s7940_s13 = smov [#allocation2]  }
 0x207   :  { %7348 = vmatpush3.bf16.msra.mxu0 %v7902_v48  ;;  %v7905_v51 = vld [vmem:[%s9718_s1 + $0x1020] sm:$0xff]   ;;  %v7906_v52 = vld [vmem:[%s9718_s1 + $0x1028] sm:$0xff]   ;;  %v7907_v58 = vld [vmem:[%s9718_s1 + $0x1030] sm:$0xff]   ;;  %s6091_s14 = sshll.u32 %s7940_s13, 4  ;;  %vm6083_vm2 = vcmask 74752   ;;  %s6092_s14 = int_to_ptr.vmem [resolvable:$true] %s6091_s14 }
 0x208   :  { %7349 = vmatprep.subr.bf16.mxu0 %v7938_v46  ;;  %v7908_v2 = vld [vmem:[%s9718_s1 + $0x1038] sm:$0xff]   ;;  %v6100_v3 = vld.sshfl [vmem:[%s9717_s0 + $0x40] sm:$0x1 pattern:$0x75316420]  ;;  %v7910_v29 = vld [vmem:[%s9720_s3 + $0x8] sm:$0xff]   ;;  %p7918_p1 = scmp.lt.s32.totalorder %s6092_s14, %s6092_s14 }
 0x209   :  { %v1492_v4 = vrot.slane %v6100_v3, %v8076_v41  ;;  %v7909_v26 = vld [vmem:[%s9720_s3] sm:$0xff]   ;;  %v7911_v30 = vld [vmem:[%s9720_s3 + $0x10] sm:$0xff]   ;;  %v7912_v36 = vld [vmem:[%s9720_s3 + $0x18] sm:$0xff]   ;;  %s7913_s15 = scalar_lea.vmem %s6092_s14, 32 }
 0x20a   :  { %7366 = vmatpush3.bf16.msra.mxu1 %v7909_v26  ;;  %p7914_p0 = scmp.ne.s32.totalorder %s6092_s14, %s7913_s15  ;;  %p7919_p2 = scmp.lt.s32.totalorder %s7913_s15, %s7913_s15 }
 0x20b   :  { %7350 = vmatpush3.bf16.msra.mxu0 %v7903_v49  ;;  %7367 = vmatprep.subr.bf16.mxu1 %v7938_v46 }
 0x20c   :  { %7351 = vmatprep.subr.bf16.mxu0 %v7938_v46  ;;  %p7920_p3 = por %p7919_p2, %p7918_p1 }
 0x20e   :  { %7368 = vmatpush3.bf16.msra.mxu1 %v7910_v29  ;;  %p7921_p4 = pnand %p7920_p3, %p7914_p0 }
 0x20f   :  { %7352 = vmatpush3.bf16.msra.mxu0 %v7904_v50  ;;  %7369 = vmatprep.subr.bf16.mxu1 %v7938_v46 }
 0x210   :  { %7353 = vmatprep.subr.bf16.mxu0 %v7938_v46 }
 0x212   :  { %7370 = vmatpush3.bf16.msra.mxu1 %v7911_v30 }
 0x213   :  { %7354 = vmatpush3.bf16.msra.mxu0 %v7905_v51  ;;  %7371 = vmatprep.subr.bf16.mxu1 %v7938_v46 }
 0x214   :  { %7355 = vmatprep.subr.bf16.mxu0 %v7938_v46 }
 0x215   :  { %v7039_v53 = vpop.f32.mrb[36].mxu0 }
 0x216   :  { %v7040_v54 = vpop.f32.mrb[37].mxu0  ;;  %7372 = vmatpush3.bf16.msra.mxu1 %v7912_v36 }
 0x217   :  { %v7041_v55 = vadd.f32 %v7040_v54, %v7039_v53  ;;  %v7042_v56 = vpop.f32.mrb[38].mxu0  ;;  %v7061_v57 = vpop.f32.mrb[36].mxu1  ;;  %7356 = vmatpush3.bf16.msra.mxu0 %v7906_v52 }
 0x218   :  { %v7043_v59 = vpop.f32.mrb[39].mxu0  ;;  %v7062_v60 = vpop.f32.mrb[37].mxu1  ;;  %7357 = vmatprep.subr.bf16.mxu0 %v7938_v46 }
 0x219   :  { %v5433_v61 = vadd.f32 %v7041_v55, %v5393_v40  ;;  %v7063_v62 = vadd.f32 %v7062_v60, %v7061_v57  ;;  %v7064_v63 = vpop.f32.mrb[38].mxu1 }
 0x21a   :  { %v7065_v0 = vpop.f32.mrb[39].mxu1 }
 0x21b   :  { %v5473_v1 = vadd.f32 %v7063_v62, %v5433_v61  ;;  %7358 = vmatpush3.bf16.msra.mxu0 %v7907_v58 }
 0x21c   :  { %7359 = vmatprep.subr.bf16.mxu0 %v7938_v46 }
 0x21f   :  { %7360 = vmatpush3.bf16.msra.mxu0 %v7908_v2 }
 0x222   :  { %7362 = vmatmul.mubr.bf16.vlgmr.msra.gmra.mrb[64].mxu0 %v1492_v4 }
 0x235   :  { %v7083_v5 = vpop.f32.mrb[40].mxu0 }
 0x236   :  { %v7084_v6 = vpop.f32.mrb[41].mxu0 }
 0x237   :  { %v7085_v7 = vadd.f32 %v7084_v6, %v7083_v5  ;;  %v7086_v8 = vpop.f32.mrb[42].mxu0  ;;  %v7105_v9 = vpop.f32.mrb[40].mxu1 }
 0x238   :  { %v7087_v10 = vpop.f32.mrb[43].mxu0  ;;  %v7106_v11 = vpop.f32.mrb[41].mxu1 }
 0x239   :  { %v5513_v12 = vadd.f32 %v7085_v7, %v5473_v1  ;;  %v7107_v13 = vadd.f32 %v7106_v11, %v7105_v9  ;;  %v7108_v14 = vpop.f32.mrb[42].mxu1 }
 0x23a   :  { %v7109_v15 = vpop.f32.mrb[43].mxu1 }
 0x23b   :  { %v5553_v16 = vadd.f32 %v7107_v13, %v5513_v12 }
 0x255   :  { %v7127_v17 = vpop.f32.mrb[44].mxu0 }
 0x256   :  { %v7128_v18 = vpop.f32.mrb[45].mxu0 }
 0x257   :  { %v7129_v19 = vadd.f32 %v7128_v18, %v7127_v17  ;;  %v7130_v20 = vpop.f32.mrb[46].mxu0  ;;  %v7149_v21 = vpop.f32.mrb[44].mxu1 }
 0x258   :  { %v7131_v41 = vpop.f32.mrb[47].mxu0  ;;  %v7150_v22 = vpop.f32.mrb[45].mxu1 }
 0x259   :  { %v5593_v23 = vadd.f32 %v7129_v19, %v5553_v16  ;;  %v7151_v24 = vadd.f32 %v7150_v22, %v7149_v21  ;;  %v7152_v25 = vpop.f32.mrb[46].mxu1 }
 0x25a   :  { %v7153_v27 = vpop.f32.mrb[47].mxu1 }
 0x25b   :  { %v5633_v28 = vadd.f32 %v7151_v24, %v5593_v23  ;;  %v6621_v23 = vld [vmem:[%s9721_s4] ss:$0 sm:$0xff] }
 0x275   :  { %v7171_v31 = vpop.f32.mrb[48].mxu0 }
 0x276   :  { %v7172_v32 = vpop.f32.mrb[49].mxu0 }
 0x277   :  { %v7173_v33 = vadd.f32 %v7172_v32, %v7171_v31  ;;  %v7174_v34 = vpop.f32.mrb[50].mxu0  ;;  %v7193_v35 = vpop.f32.mrb[48].mxu1 }
 0x278   :  { %v7175_v37 = vpop.f32.mrb[51].mxu0  ;;  %v7194_v38 = vpop.f32.mrb[49].mxu1 }
 0x279   :  { %v5673_v39 = vadd.f32 %v7173_v33, %v5633_v28  ;;  %v7195_v40 = vadd.f32 %v7194_v38, %v7193_v35  ;;  %v7196_v42 = vpop.f32.mrb[50].mxu1 }
 0x27a   :  { %v7197_v43 = vpop.f32.mrb[51].mxu1 }
 0x27b   :  { %v5713_v44 = vadd.f32 %v7195_v40, %v5673_v39 }
 0x295   :  { %v7215_v45 = vpop.f32.mrb[52].mxu0 }
 0x296   :  { %v7216_v47 = vpop.f32.mrb[53].mxu0 }
 0x297   :  { %v7217_v48 = vadd.f32 %v7216_v47, %v7215_v45  ;;  %v7218_v49 = vpop.f32.mrb[54].mxu0  ;;  %v7237_v46 = vpop.f32.mrb[52].mxu1 }
 0x298   :  { %v7219_v50 = vpop.f32.mrb[55].mxu0  ;;  %v7238_v51 = vpop.f32.mrb[53].mxu1 }
 0x299   :  { %v5753_v52 = vadd.f32 %v7217_v48, %v5713_v44  ;;  %v7239_v53 = vadd.f32 %v7238_v51, %v7237_v46  ;;  %v7240_v54 = vpop.f32.mrb[54].mxu1 }
 0x29a   :  { %v7241_v55 = vpop.f32.mrb[55].mxu1 }
 0x29b   :  { %v5793_v56 = vadd.f32 %v7239_v53, %v5753_v52 }
 0x2b5   :  { %v7259_v57 = vpop.f32.mrb[56].mxu0 }
 0x2b6   :  { %v7260_v58 = vpop.f32.mrb[57].mxu0 }
 0x2b7   :  { %v7261_v59 = vadd.f32 %v7260_v58, %v7259_v57  ;;  %v7262_v60 = vpop.f32.mrb[58].mxu0  ;;  %v7281_v61 = vpop.f32.mrb[56].mxu1 }
 0x2b8   :  { %v7263_v62 = vpop.f32.mrb[59].mxu0  ;;  %v7282_v63 = vpop.f32.mrb[57].mxu1 }
 0x2b9   :  { %v5833_v0 = vadd.f32 %v7261_v59, %v5793_v56  ;;  %v7283_v1 = vadd.f32 %v7282_v63, %v7281_v61  ;;  %v7284_v2 = vpop.f32.mrb[58].mxu1 }
 0x2ba   :  { %v7285_v3 = vpop.f32.mrb[59].mxu1 }
 0x2bb   :  { %v5873_v4 = vadd.f32 %v7283_v1, %v5833_v0 }
 0x2d5   :  { %v7303_v5 = vpop.f32.mrb[60].mxu0 }
 0x2d6   :  { %v7304_v6 = vpop.f32.mrb[61].mxu0 }
 0x2d7   :  { %v7305_v7 = vadd.f32 %v7304_v6, %v7303_v5  ;;  %v7306_v8 = vpop.f32.mrb[62].mxu0  ;;  %v7325_v9 = vpop.f32.mrb[60].mxu1 }
 0x2d8   :  { %v7307_v10 = vpop.f32.mrb[63].mxu0  ;;  %v7326_v11 = vpop.f32.mrb[61].mxu1 }
 0x2d9   :  { %v5913_v12 = vadd.f32 %v7305_v7, %v5873_v4  ;;  %v7327_v13 = vadd.f32 %v7326_v11, %v7325_v9  ;;  %v7328_v14 = vpop.f32.mrb[62].mxu1 }
 0x2da   :  { %v7329_v15 = vpop.f32.mrb[63].mxu1 }
 0x2db   :  { %v5953_v16 = vadd.f32 %v7327_v13, %v5913_v12 }
 0x2f5   :  { %v5992_v17 = vpop.f32.mrb[64].mxu0 }
 0x2f6   :  { %v5993_v18 = vadd.f32 %v5992_v17, %v5953_v16  ;;  %v7363_v19 = vpop.f32.mrb[65].mxu0 }
 0x2f7   :  { %v5995_v20 = vpop.f32.mrb[66].mxu0 }
 0x2f8   :  { %v5998_v21 = vmax.f32 %v5993_v18, 0.0  ;;  %v7364_v41 = vpop.f32.mrb[67].mxu0 }
 0x2fa   :  { %v5999_v22 = vpack.c.bf16 %v5998_v21, %v5998_v21 }
 0x2fc   :  { %7374 = vmatmul.mubr.msk.bf16.vlgmr.msra.gmra.mrb[64].mxu1 %vm6039_vm1, %v5999_v22 }
 0x3cf   :  { %v6077_v24 = vpop.f32.mrb[64].mxu1 }
 0x3d0   :  { %v6078_v25 = vadd.f32 %v6621_v23, %v6077_v24  ;;  %v7375_v26 = vpop.f32.mrb[65].mxu1 }
 0x3d1   :  { %v6080_v27 = vpop.f32.mrb[66].mxu1 }
 0x3d2   :  { %v7376_v28 = vpop.f32.mrb[67].mxu1  ;;  %6084 = vst.msk [vmem:[#allocation2] sm:$0x3] %vm6083_vm2, %v6078_v25 }
 0x3d3   :  { %7924 = shalt.err (!%p7921_p4)
}
 0x3d4   :  { %s7925_s4 = scalar_lea.hbm %s9722_s5, 32 }
 0x3d5   :  { %p7926_p5 = scmp.ne.s32.totalorder %s9722_s5, %s7925_s4  ;;  %p7929_p6 = scmp.lt.u32.totalorder %s7925_s4, %s9722_s5 }
 0x3d7   :  { %p7931_p7 = pnand %p7929_p6, %p7926_p5 }
 0x3d9   :  { %7934 = shalt.err (!%p7931_p7)
}
 0x3da   :  { %6094 = dma.vmem_to_hbm [thread:$0]  %s6092_s14, 32, %s9722_s5, [#allocation3]  }
 0x3db   :  { %7935 = dma.done.wait [#allocation3], 32  }
 0x3dc   :  { %7936 = vsyncadd [#allocation3], 4294967264 }
 0x3dd   :  { %6098 = vsyncpa [#allocation3], 1 }

</bundles_post_ra>
